<compile_context>
chip_gen: v7x
topology: tpu7x:2x2x1
jax: 0.10.0
libtpu: 0.0.40
codegen_flags: <defaults>
</compile_context>

<pallas_src>
import functools

import jax
import jax.numpy as jnp
from jax.experimental import pallas as pl
from jax.experimental.pallas import tpu as pltpu

IN_CH = 3            # RGB input, as EfficientNetV2-M expects
NUM_FEATURES = 1280  # EfficientNetV2-M classifier[1].in_features
N_METADATA = 77
M_PAD = 128          # metadata contraction padded to a clean lane width
NUM_CLASSES = 1


def _silu_fast(x):
    # exp and approx-reciprocal both issue on the EUP slot -> hidden under MXU.
    return x * pl.reciprocal(1.0 + jnp.exp(-x), approx=True)


def _silu_exact(x):
    return x / (1.0 + jnp.exp(-x))


# ---------------------------------------------------------------------------
# Fused kernel: per (batch-block b, P-tile k) grid point
#   patches(bt,Pt,K) @ stem_w -> SiLU -> masked row-sum into acc (GAP numerator)
#   at last k: GAP -> Linear(1280,128)+SiLU -> split-cat Linear(205,128)+SiLU
#              -> Linear(128,64)+SiLU -> Linear(64,16)+SiLU -> Linear(16,1)
# ---------------------------------------------------------------------------
def _fused_kernel(patch_ref, meta_ref, stem_w_ref, stem_b_ref,
                  w1_ref, b1_ref,
                  w2a_ref, w2b_ref, b2_ref,
                  w3_ref, b3_ref,
                  w4_ref, b4_ref,
                  w5_ref, b5_ref,
                  out_ref, acc_ref,
                  *, bt, p_tile, p_total, apply_mask):
    k = pl.program_id(1)
    nk = pl.num_programs(1)

    @pl.when(k == 0)
    def _init():
        acc_ref[...] = jnp.zeros_like(acc_ref)

    stem_w = stem_w_ref[...]          # (K, C) bf16, VMEM-resident
    stem_b = stem_b_ref[...]          # (1, C) f32

    if apply_mask:
        row = k * p_tile + jax.lax.broadcasted_iota(jnp.int32, (p_tile, 1), 0)
        valid = row < p_total         # mask zero-padded P rows out of the GAP

    sums = []
    for i in range(bt):               # static, small (<= 8): unrolled
        h = jnp.dot(patch_ref[i], stem_w,
                    preferred_element_type=jnp.float32)        # (Pt, C) f32
        h = _silu_fast(h + stem_b)
        if apply_mask:
            h = jnp.where(valid, h, 0.0)
        sums.append(jnp.sum(h, axis=0, keepdims=True))          # (1, C)
    acc_ref[...] += jnp.concatenate(sums, axis=0)                # (bt, C)

    @pl.when(k == nk - 1)
    def _head():
        feat = acc_ref[...] * (1.0 / float(p_total))             # GAP (bt, C)
        m = meta_ref[...]                                        # (bt, M_PAD)
        h = _silu_exact(
            jnp.dot(feat, w1_ref[...], preferred_element_type=jnp.float32)
            + b1_ref[...])
        # cat((h, m), dim=1) @ W2  ==  h @ W2a + m @ W2b  (single shared bias b2)
        h = _silu_exact(
            jnp.dot(h, w2a_ref[...], preferred_element_type=jnp.float32)
            + jnp.dot(m, w2b_ref[...], preferred_element_type=jnp.float32)
            + b2_ref[...])
        h = _silu_exact(
            jnp.dot(h, w3_ref[...], preferred_element_type=jnp.float32)
            + b3_ref[...])
        h = _silu_exact(
            jnp.dot(h, w4_ref[...], preferred_element_type=jnp.float32)
            + b4_ref[...])
        out_ref[...] = (
            jnp.dot(h, w5_ref[...], preferred_element_type=jnp.float32)
            + b5_ref[...])


# ---------------------------------------------------------------------------
# im2col for the 3x3 / stride 2 / pad 1 conv stem (pure pads/slices, bf16).
# Output spatial extent matches torch: Ho = floor((H-1)/2)+1 = ceil(H/2).
# ---------------------------------------------------------------------------
def _im2col_s2p1(x_nhwc, kh=3, kw=3, stride=2):
    B, H, W, C = x_nhwc.shape
    Ho, Wo = (H + 1) // 2, (W + 1) // 2
    xp = jnp.pad(x_nhwc, ((0, 0), (1, 1), (1, 1), (0, 0)))
    cols = []
    for dy in range(kh):
        for dx in range(kw):
            cols.append(xp[:, dy:dy + H:stride, dx:dx + W:stride, :])
    patches = jnp.stack(cols, axis=3)                  # (B, Ho, Wo, kh*kw, C)
    return patches.reshape(B, Ho * Wo, kh * kw * C)    # (B, P, K)


def _round_up(x, m):
    return ((x + m - 1) // m) * m


def _batch_tile(B):
    if B <= 8:
        return B
    return 8 if B % 8 == 0 else B  # fallback: whole batch per block


def _p_tile_for(P, bt):
    # keep the per-step (bt, p_tile, 1280) f32 activation around <= ~5 MiB so
    # it fits every generation's default scoped VMEM (incl. v7x 64 MiB phys).
    cap = _round_up(max(8, 1024 // bt), 8)
    return min(_round_up(P, 8), cap)


def custom_efficientnet_v2_forward(params, x_nchw, metadatas):
    # NCHW -> NHWC, bf16 for the dominant (patches) DMA traffic.
    x = jnp.transpose(x_nchw, (0, 2, 3, 1)).astype(jnp.bfloat16)
    patches = _im2col_s2p1(x)                          # (B, P, K) bf16
    B, P, K = patches.shape
    C = NUM_FEATURES

    bt = _batch_tile(B)
    p_tile = _p_tile_for(P, bt)
    p_pad = _round_up(P, p_tile)
    if p_pad != P:
        patches = jnp.pad(patches, ((0, 0), (0, p_pad - P), (0, 0)))
    nb, nk = B // bt, p_pad // p_tile

    meta = metadatas.astype(jnp.float32)
    meta = jnp.pad(meta, ((0, 0), (0, M_PAD - meta.shape[1])))      # (B, 128)
    w2b = jnp.pad(params["w2b"],
                  ((0, M_PAD - params["w2b"].shape[0]), (0, 0)))    # (128, 128)

    stem_w = params["stem_w"].astype(jnp.bfloat16)                  # (K, C)

    kernel = functools.partial(_fused_kernel, bt=bt, p_tile=p_tile,
                               p_total=P, apply_mask=(p_pad != P))

    const2 = lambda b, k: (0, 0)   # weights: fetched once, VMEM-resident
    in_specs = [
        pl.BlockSpec((bt, p_tile, K), lambda b, k: (b, k, 0)),   # patches
        pl.BlockSpec((bt, M_PAD), lambda b, k: (b, 0)),          # metadata
        pl.BlockSpec((K, C), const2),                            # stem_w
        pl.BlockSpec((1, C), const2),                            # stem_b
        pl.BlockSpec((C, 128), const2),                          # w1
        pl.BlockSpec((1, 128), const2),                          # b1
        pl.BlockSpec((128, 128), const2),                        # w2a
        pl.BlockSpec((M_PAD, 128), const2),                      # w2b (padded)
        pl.BlockSpec((1, 128), const2),                          # b2
        pl.BlockSpec((128, 64), const2),                         # w3
        pl.BlockSpec((1, 64), const2),                           # b3
        pl.BlockSpec((64, 16), const2),                          # w4
        pl.BlockSpec((1, 16), const2),                           # b4
        pl.BlockSpec((16, NUM_CLASSES), const2),                 # w5
        pl.BlockSpec((1, NUM_CLASSES), const2),                  # b5
    ]

    out = pl.pallas_call(
        kernel,
        out_shape=jax.ShapeDtypeStruct((B, NUM_CLASSES), jnp.float32),
        grid=(nb, nk),
        in_specs=in_specs,
        out_specs=pl.BlockSpec((bt, NUM_CLASSES), lambda b, k: (b, 0)),
        scratch_shapes=[pltpu.VMEM((bt, C), jnp.float32)],
        compiler_params=pltpu.CompilerParams(
            dimension_semantics=("parallel", "arbitrary"),
            vmem_limit_bytes=32 * 1024 * 1024),
    )(patches, meta, stem_w, params["stem_b"],
      params["w1"], params["b1"],
      params["w2a"], w2b, params["b2"],
      params["w3"], params["b3"],
      params["w4"], params["b4"],
      params["w5"], params["b5"])
    return out


def init_params(key):
    ks = jax.random.split(key, 7)

    def lin(k, fan_in, fan_out):
        kw_, kb_ = jax.random.split(k)
        w = jax.random.normal(kw_, (fan_in, fan_out), jnp.float32) / jnp.sqrt(
            jnp.float32(fan_in))
        b = 0.01 * jax.random.normal(kb_, (1, fan_out), jnp.float32)
        return w, b

    stem_w, stem_b = lin(ks[0], 3 * 3 * IN_CH, NUM_FEATURES)
    w1, b1 = lin(ks[1], NUM_FEATURES, 128)     # feature_reduction
    # classifier[0] = Linear(128 + 77, 128) split into (feature, metadata)
    # halves; the single Linear has ONE bias -> w2a's generated bias is
    # intentionally dropped and b2 (from the metadata half) is the shared bias.
    w2a, _ = lin(ks[2], 128, 128)
    w2b, b2 = lin(ks[3], N_METADATA, 128)
    w3, b3 = lin(ks[4], 128, 64)
    w4, b4 = lin(ks[5], 64, 16)
    w5, b5 = lin(ks[6], 16, NUM_CLASSES)
    return dict(stem_w=stem_w, stem_b=stem_b,
                w1=w1, b1=b1, w2a=w2a, w2b=w2b, b2=b2,
                w3=w3, b3=b3, w4=w4, b4=b4, w5=w5, b5=b5)


if __name__ == "__main__":
    key = jax.random.PRNGKey(0)
    kx, km = jax.random.split(key)
    x = jax.random.normal(kx, (2, IN_CH, 16, 16), jnp.float32)   # NCHW, like PyTorch
    metadatas = jax.random.normal(km, (2, N_METADATA), jnp.float32)

    params = init_params(jax.random.PRNGKey(42))
    out = custom_efficientnet_v2_forward(params, x, metadatas)
    out = jax.block_until_ready(out)
    assert out.shape == (2, NUM_CLASSES) and out.dtype == jnp.float32
    print("KERNEL_OK")
</pallas_src>

<mosaic_0001>
module attributes {stable_mosaic.version = 11 : i64} {
  func.func @_fused_kernel(%arg0: i32, %arg1: i32, %arg2: memref<2x64x27xbf16, #tpu.memory_space<vmem>>, %arg3: memref<2x128xf32, #tpu.memory_space<vmem>>, %arg4: memref<27x1280xbf16, #tpu.memory_space<vmem>>, %arg5: memref<1x1280xf32, #tpu.memory_space<vmem>>, %arg6: memref<1280x128xf32, #tpu.memory_space<vmem>>, %arg7: memref<1x128xf32, #tpu.memory_space<vmem>>, %arg8: memref<128x128xf32, #tpu.memory_space<vmem>>, %arg9: memref<128x128xf32, #tpu.memory_space<vmem>>, %arg10: memref<1x128xf32, #tpu.memory_space<vmem>>, %arg11: memref<128x64xf32, #tpu.memory_space<vmem>>, %arg12: memref<1x64xf32, #tpu.memory_space<vmem>>, %arg13: memref<64x16xf32, #tpu.memory_space<vmem>>, %arg14: memref<1x16xf32, #tpu.memory_space<vmem>>, %arg15: memref<16x1xf32, #tpu.memory_space<vmem>>, %arg16: memref<1x1xf32, #tpu.memory_space<vmem>>, %arg17: memref<2x1xf32, #tpu.memory_space<vmem>>, %arg18: memref<2x1280xf32, #tpu.memory_space<vmem>>) attributes {dimension_semantics = [#tpu.dimension_semantics<parallel>, #tpu.dimension_semantics<arbitrary>], iteration_bounds = array<i64: 1, 1>, scalar_prefetch = 0 : i64, scratch_operands = 1 : i64, tpu.core_type = #tpu.core_type<tc>, window_params = [{transform_indices = @transform_0, window_bounds = array<i64: 2, 64, 27>}, {transform_indices = @transform_1, window_bounds = array<i64: 2, 128>}, {pipeline_mode = #tpu.pipeline_mode<synchronous>, transform_indices = @transform_2, window_bounds = array<i64: 27, 1280>}, {pipeline_mode = #tpu.pipeline_mode<synchronous>, transform_indices = @transform_3, window_bounds = array<i64: 1, 1280>}, {pipeline_mode = #tpu.pipeline_mode<synchronous>, transform_indices = @transform_4, window_bounds = array<i64: 1280, 128>}, {pipeline_mode = #tpu.pipeline_mode<synchronous>, transform_indices = @transform_5, window_bounds = array<i64: 1, 128>}, {pipeline_mode = #tpu.pipeline_mode<synchronous>, transform_indices = @transform_6, window_bounds = array<i64: 128, 128>}, {pipeline_mode = #tpu.pipeline_mode<synchronous>, transform_indices = @transform_7, window_bounds = array<i64: 128, 128>}, {pipeline_mode = #tpu.pipeline_mode<synchronous>, transform_indices = @transform_8, window_bounds = array<i64: 1, 128>}, {pipeline_mode = #tpu.pipeline_mode<synchronous>, transform_indices = @transform_9, window_bounds = array<i64: 128, 64>}, {pipeline_mode = #tpu.pipeline_mode<synchronous>, transform_indices = @transform_10, window_bounds = array<i64: 1, 64>}, {pipeline_mode = #tpu.pipeline_mode<synchronous>, transform_indices = @transform_11, window_bounds = array<i64: 64, 16>}, {pipeline_mode = #tpu.pipeline_mode<synchronous>, transform_indices = @transform_12, window_bounds = array<i64: 1, 16>}, {pipeline_mode = #tpu.pipeline_mode<synchronous>, transform_indices = @transform_13, window_bounds = array<i64: 16, 1>}, {pipeline_mode = #tpu.pipeline_mode<synchronous>, transform_indices = @transform_14, window_bounds = array<i64: 1, 1>}, {transform_indices = @transform_15, window_bounds = array<i64: 2, 1>}]} {
    %c0_i32 = arith.constant 0 : i32
    %0 = arith.cmpi eq, %arg1, %c0_i32 : i32
    %1 = arith.extui %0 : i1 to i32
    %c0_i32_0 = arith.constant 0 : i32
    %2 = arith.cmpi ne, %1, %c0_i32_0 : i32
    scf.if %2 {
      %cst_22 = arith.constant 0.000000e+00 : f32
      %40 = vector.broadcast %cst_22 : f32 to vector<2x1280xf32>
      %c0_23 = arith.constant 0 : index
      %c0_24 = arith.constant 0 : index
      %41 = vector.load %arg18[%c0_23, %c0_24] : memref<2x1280xf32, #tpu.memory_space<vmem>>, vector<2x1280xf32>
      tpu.vector_store %arg18[%c0_23, %c0_24], %40 {strides = array<i32>} : memref<2x1280xf32, #tpu.memory_space<vmem>>, vector<2x1280xf32>,
    } else {
    }
    %c0 = arith.constant 0 : index
    %c0_1 = arith.constant 0 : index
    %3 = vector.load %arg4[%c0, %c0_1] : memref<27x1280xbf16, #tpu.memory_space<vmem>>, vector<27x1280xbf16>
    %c0_2 = arith.constant 0 : index
    %c0_3 = arith.constant 0 : index
    %4 = vector.load %arg5[%c0_2, %c0_3] : memref<1x1280xf32, #tpu.memory_space<vmem>>, vector<1x1280xf32>
    %c0_4 = arith.constant 0 : index
    %c0_5 = arith.constant 0 : index
    %c0_6 = arith.constant 0 : index
    %5 = vector.load %arg2[%c0_4, %c0_5, %c0_6] : memref<2x64x27xbf16, #tpu.memory_space<vmem>>, vector<1x64x27xbf16>
    %6 = vector.shape_cast %5 : vector<1x64x27xbf16> to vector<64x27xbf16>
    %cst = arith.constant dense<0.000000e+00> : vector<64x1280xf32>
    %7 = tpu.matmul %6, %3, %cst {dimension_numbers = #tpu.dot_dimension_numbers<[1], [0], [0], [1], [0, 0, 1, 1], [], []>} : vector<64x27xbf16>, vector<27x1280xbf16>, vector<64x1280xf32> -> vector<64x1280xf32>
    %8 = vector.broadcast %4 : vector<1x1280xf32> to vector<64x1280xf32>
    %9 = arith.addf %7, %8 : vector<64x1280xf32>
    %cst_7 = arith.constant 0.000000e+00 : f32
    %10 = vector.broadcast %cst_7 : f32 to vector<64x1280xf32>
    %11 = arith.subf %10, %9 : vector<64x1280xf32>
    %12 = math.exp %11 : vector<64x1280xf32>
    %cst_8 = arith.constant 1.000000e+00 : f32
    %13 = vector.broadcast %cst_8 : f32 to vector<64x1280xf32>
    %14 = arith.addf %13, %12 : vector<64x1280xf32>
    %15 = tpu.reciprocal %14 {approx = true} : vector<64x1280xf32> -> vector<64x1280xf32>
    %16 = arith.mulf %9, %15 : vector<64x1280xf32>
    %cst_9 = arith.constant dense<0.000000e+00> : vector<1280xf32>
    %17 = vector.multi_reduction <add>, %16, %cst_9 [0] : vector<64x1280xf32> to vector<1280xf32>
    %18 = vector.shape_cast %17 : vector<1280xf32> to vector<1x1280xf32>
    %c1 = arith.constant 1 : index
    %c0_10 = arith.constant 0 : index
    %c0_11 = arith.constant 0 : index
    %19 = vector.load %arg2[%c1, %c0_10, %c0_11] : memref<2x64x27xbf16, #tpu.memory_space<vmem>>, vector<1x64x27xbf16>
    %20 = vector.shape_cast %19 : vector<1x64x27xbf16> to vector<64x27xbf16>
    %cst_12 = arith.constant dense<0.000000e+00> : vector<64x1280xf32>
    %21 = tpu.matmul %20, %3, %cst_12 {dimension_numbers = #tpu.dot_dimension_numbers<[1], [0], [0], [1], [0, 0, 1, 1], [], []>} : vector<64x27xbf16>, vector<27x1280xbf16>, vector<64x1280xf32> -> vector<64x1280xf32>
    %22 = vector.broadcast %4 : vector<1x1280xf32> to vector<64x1280xf32>
    %23 = arith.addf %21, %22 : vector<64x1280xf32>
    %cst_13 = arith.constant 0.000000e+00 : f32
    %24 = vector.broadcast %cst_13 : f32 to vector<64x1280xf32>
    %25 = arith.subf %24, %23 : vector<64x1280xf32>
    %26 = math.exp %25 : vector<64x1280xf32>
    %cst_14 = arith.constant 1.000000e+00 : f32
    %27 = vector.broadcast %cst_14 : f32 to vector<64x1280xf32>
    %28 = arith.addf %27, %26 : vector<64x1280xf32>
    %29 = tpu.reciprocal %28 {approx = true} : vector<64x1280xf32> -> vector<64x1280xf32>
    %30 = arith.mulf %23, %29 : vector<64x1280xf32>
    %cst_15 = arith.constant dense<0.000000e+00> : vector<1280xf32>
    %31 = vector.multi_reduction <add>, %30, %cst_15 [0] : vector<64x1280xf32> to vector<1280xf32>
    %32 = vector.shape_cast %31 : vector<1280xf32> to vector<1x1280xf32>
    %c0_16 = arith.constant 0 : index
    %c0_17 = arith.constant 0 : index
    %33 = vector.load %arg18[%c0_16, %c0_17] : memref<2x1280xf32, #tpu.memory_space<vmem>>, vector<2x1280xf32>
    %34 = tpu.concatenate %18, %32 in 0 : vector<1x1280xf32>, vector<1x1280xf32> -> vector<2x1280xf32>
    %35 = arith.addf %33, %34 : vector<2x1280xf32>
    %c0_18 = arith.constant 0 : index
    %c0_19 = arith.constant 0 : index
    %36 = vector.load %arg18[%c0_18, %c0_19] : memref<2x1280xf32, #tpu.memory_space<vmem>>, vector<2x1280xf32>
    tpu.vector_store %arg18[%c0_18, %c0_19], %35 {strides = array<i32>} : memref<2x1280xf32, #tpu.memory_space<vmem>>, vector<2x1280xf32>,
    %c0_i32_20 = arith.constant 0 : i32
    %37 = arith.cmpi eq, %arg1, %c0_i32_20 : i32
    %38 = arith.extui %37 : i1 to i32
    %c0_i32_21 = arith.constant 0 : i32
    %39 = arith.cmpi ne, %38, %c0_i32_21 : i32
    scf.if %39 {
      %c0_22 = arith.constant 0 : index
      %c0_23 = arith.constant 0 : index
      %40 = vector.load %arg18[%c0_22, %c0_23] : memref<2x1280xf32, #tpu.memory_space<vmem>>, vector<2x1280xf32>
      %cst_24 = arith.constant 1.562500e-02 : f32
      %41 = vector.broadcast %cst_24 : f32 to vector<2x1280xf32>
      %42 = arith.mulf %40, %41 : vector<2x1280xf32>
      %c0_25 = arith.constant 0 : index
      %c0_26 = arith.constant 0 : index
      %43 = vector.load %arg3[%c0_25, %c0_26] : memref<2x128xf32, #tpu.memory_space<vmem>>, vector<2x128xf32>
      %c0_27 = arith.constant 0 : index
      %c0_28 = arith.constant 0 : index
      %44 = vector.load %arg6[%c0_27, %c0_28] : memref<1280x128xf32, #tpu.memory_space<vmem>>, vector<1280x128xf32>
      %cst_29 = arith.constant dense<0.000000e+00> : vector<2x128xf32>
      %45 = tpu.matmul %42, %44, %cst_29 {dimension_numbers = #tpu.dot_dimension_numbers<[1], [0], [0], [1], [0, 0, 1, 1], [], []>} : vector<2x1280xf32>, vector<1280x128xf32>, vector<2x128xf32> -> vector<2x128xf32>
      %c0_30 = arith.constant 0 : index
      %c0_31 = arith.constant 0 : index
      %46 = vector.load %arg7[%c0_30, %c0_31] : memref<1x128xf32, #tpu.memory_space<vmem>>, vector<1x128xf32>
      %47 = vector.broadcast %46 : vector<1x128xf32> to vector<2x128xf32>
      %48 = arith.addf %45, %47 : vector<2x128xf32>
      %cst_32 = arith.constant 0.000000e+00 : f32
      %49 = vector.broadcast %cst_32 : f32 to vector<2x128xf32>
      %50 = arith.subf %49, %48 : vector<2x128xf32>
      %51 = math.exp %50 : vector<2x128xf32>
      %cst_33 = arith.constant 1.000000e+00 : f32
      %52 = vector.broadcast %cst_33 : f32 to vector<2x128xf32>
      %53 = arith.addf %52, %51 : vector<2x128xf32>
      %54 = arith.divf %48, %53 : vector<2x128xf32>
      %c0_34 = arith.constant 0 : index
      %c0_35 = arith.constant 0 : index
      %55 = vector.load %arg8[%c0_34, %c0_35] : memref<128x128xf32, #tpu.memory_space<vmem>>, vector<128x128xf32>
      %cst_36 = arith.constant dense<0.000000e+00> : vector<2x128xf32>
      %56 = tpu.matmul %54, %55, %cst_36 {dimension_numbers = #tpu.dot_dimension_numbers<[1], [0], [0], [1], [0, 0, 1, 1], [], []>} : vector<2x128xf32>, vector<128x128xf32>, vector<2x128xf32> -> vector<2x128xf32>
      %c0_37 = arith.constant 0 : index
      %c0_38 = arith.constant 0 : index
      %57 = vector.load %arg9[%c0_37, %c0_38] : memref<128x128xf32, #tpu.memory_space<vmem>>, vector<128x128xf32>
      %cst_39 = arith.constant dense<0.000000e+00> : vector<2x128xf32>
      %58 = tpu.matmul %43, %57, %cst_39 {dimension_numbers = #tpu.dot_dimension_numbers<[1], [0], [0], [1], [0, 0, 1, 1], [], []>} : vector<2x128xf32>, vector<128x128xf32>, vector<2x128xf32> -> vector<2x128xf32>
      %59 = arith.addf %56, %58 : vector<2x128xf32>
      %c0_40 = arith.constant 0 : index
      %c0_41 = arith.constant 0 : index
      %60 = vector.load %arg10[%c0_40, %c0_41] : memref<1x128xf32, #tpu.memory_space<vmem>>, vector<1x128xf32>
      %61 = vector.broadcast %60 : vector<1x128xf32> to vector<2x128xf32>
      %62 = arith.addf %59, %61 : vector<2x128xf32>
      %cst_42 = arith.constant 0.000000e+00 : f32
      %63 = vector.broadcast %cst_42 : f32 to vector<2x128xf32>
      %64 = arith.subf %63, %62 : vector<2x128xf32>
      %65 = math.exp %64 : vector<2x128xf32>
      %cst_43 = arith.constant 1.000000e+00 : f32
      %66 = vector.broadcast %cst_43 : f32 to vector<2x128xf32>
      %67 = arith.addf %66, %65 : vector<2x128xf32>
      %68 = arith.divf %62, %67 : vector<2x128xf32>
      %c0_44 = arith.constant 0 : index
      %c0_45 = arith.constant 0 : index
      %69 = vector.load %arg11[%c0_44, %c0_45] : memref<128x64xf32, #tpu.memory_space<vmem>>, vector<128x64xf32>
      %cst_46 = arith.constant dense<0.000000e+00> : vector<2x64xf32>
      %70 = tpu.matmul %68, %69, %cst_46 {dimension_numbers = #tpu.dot_dimension_numbers<[1], [0], [0], [1], [0, 0, 1, 1], [], []>} : vector<2x128xf32>, vector<128x64xf32>, vector<2x64xf32> -> vector<2x64xf32>
      %c0_47 = arith.constant 0 : index
      %c0_48 = arith.constant 0 : index
      %71 = vector.load %arg12[%c0_47, %c0_48] : memref<1x64xf32, #tpu.memory_space<vmem>>, vector<1x64xf32>
      %72 = vector.broadcast %71 : vector<1x64xf32> to vector<2x64xf32>
      %73 = arith.addf %70, %72 : vector<2x64xf32>
      %cst_49 = arith.constant 0.000000e+00 : f32
      %74 = vector.broadcast %cst_49 : f32 to vector<2x64xf32>
      %75 = arith.subf %74, %73 : vector<2x64xf32>
      %76 = math.exp %75 : vector<2x64xf32>
      %cst_50 = arith.constant 1.000000e+00 : f32
      %77 = vector.broadcast %cst_50 : f32 to vector<2x64xf32>
      %78 = arith.addf %77, %76 : vector<2x64xf32>
      %79 = arith.divf %73, %78 : vector<2x64xf32>
      %c0_51 = arith.constant 0 : index
      %c0_52 = arith.constant 0 : index
      %80 = vector.load %arg13[%c0_51, %c0_52] : memref<64x16xf32, #tpu.memory_space<vmem>>, vector<64x16xf32>
      %cst_53 = arith.constant dense<0.000000e+00> : vector<2x16xf32>
      %81 = tpu.matmul %79, %80, %cst_53 {dimension_numbers = #tpu.dot_dimension_numbers<[1], [0], [0], [1], [0, 0, 1, 1], [], []>} : vector<2x64xf32>, vector<64x16xf32>, vector<2x16xf32> -> vector<2x16xf32>
      %c0_54 = arith.constant 0 : index
      %c0_55 = arith.constant 0 : index
      %82 = vector.load %arg14[%c0_54, %c0_55] : memref<1x16xf32, #tpu.memory_space<vmem>>, vector<1x16xf32>
      %83 = vector.broadcast %82 : vector<1x16xf32> to vector<2x16xf32>
      %84 = arith.addf %81, %83 : vector<2x16xf32>
      %cst_56 = arith.constant 0.000000e+00 : f32
      %85 = vector.broadcast %cst_56 : f32 to vector<2x16xf32>
      %86 = arith.subf %85, %84 : vector<2x16xf32>
      %87 = math.exp %86 : vector<2x16xf32>
      %cst_57 = arith.constant 1.000000e+00 : f32
      %88 = vector.broadcast %cst_57 : f32 to vector<2x16xf32>
      %89 = arith.addf %88, %87 : vector<2x16xf32>
      %90 = arith.divf %84, %89 : vector<2x16xf32>
      %c0_58 = arith.constant 0 : index
      %c0_59 = arith.constant 0 : index
      %91 = vector.load %arg15[%c0_58, %c0_59] : memref<16x1xf32, #tpu.memory_space<vmem>>, vector<16x1xf32>
      %cst_60 = arith.constant dense<0.000000e+00> : vector<2x1xf32>
      %92 = tpu.matmul %90, %91, %cst_60 {dimension_numbers = #tpu.dot_dimension_numbers<[1], [0], [0], [1], [0, 0, 1, 1], [], []>} : vector<2x16xf32>, vector<16x1xf32>, vector<2x1xf32> -> vector<2x1xf32>
      %c0_61 = arith.constant 0 : index
      %c0_62 = arith.constant 0 : index
      %93 = vector.load %arg16[%c0_61, %c0_62] : memref<1x1xf32, #tpu.memory_space<vmem>>, vector<1x1xf32>
      %94 = vector.broadcast %93 : vector<1x1xf32> to vector<2x1xf32>
      %95 = arith.addf %92, %94 : vector<2x1xf32>
      %c0_63 = arith.constant 0 : index
      %c0_64 = arith.constant 0 : index
      %96 = vector.load %arg17[%c0_63, %c0_64] : memref<2x1xf32, #tpu.memory_space<vmem>>, vector<2x1xf32>
      tpu.vector_store %arg17[%c0_63, %c0_64], %95 {strides = array<i32>} : memref<2x1xf32, #tpu.memory_space<vmem>>, vector<2x1xf32>,
    } else {
    }
    return
  }
  func.func @transform_0(%arg0: i32, %arg1: i32) -> (i32, i32, i32) {
    %c0_i32 = arith.constant 0 : i32
    %c0_i32_0 = arith.constant 0 : i32
    return %arg0, %arg1, %c0_i32 : i32, i32, i32
  }
  func.func @transform_1(%arg0: i32, %arg1: i32) -> (i32, i32) {
    %c0_i32 = arith.constant 0 : i32
    %c0_i32_0 = arith.constant 0 : i32
    return %arg0, %c0_i32 : i32, i32
  }
  func.func @transform_2(%arg0: i32, %arg1: i32) -> (i32, i32) {
    %c0_i32 = arith.constant 0 : i32
    %c0_i32_0 = arith.constant 0 : i32
    %c0_i32_1 = arith.constant 0 : i32
    return %c0_i32, %c0_i32_0 : i32, i32
  }
  func.func @transform_3(%arg0: i32, %arg1: i32) -> (i32, i32) {
    %c0_i32 = arith.constant 0 : i32
    %c0_i32_0 = arith.constant 0 : i32
    %c0_i32_1 = arith.constant 0 : i32
    return %c0_i32, %c0_i32_0 : i32, i32
  }
  func.func @transform_4(%arg0: i32, %arg1: i32) -> (i32, i32) {
    %c0_i32 = arith.constant 0 : i32
    %c0_i32_0 = arith.constant 0 : i32
    %c0_i32_1 = arith.constant 0 : i32
    return %c0_i32, %c0_i32_0 : i32, i32
  }
  func.func @transform_5(%arg0: i32, %arg1: i32) -> (i32, i32) {
    %c0_i32 = arith.constant 0 : i32
    %c0_i32_0 = arith.constant 0 : i32
    %c0_i32_1 = arith.constant 0 : i32
    return %c0_i32, %c0_i32_0 : i32, i32
  }
  func.func @transform_6(%arg0: i32, %arg1: i32) -> (i32, i32) {
    %c0_i32 = arith.constant 0 : i32
    %c0_i32_0 = arith.constant 0 : i32
    %c0_i32_1 = arith.constant 0 : i32
    return %c0_i32, %c0_i32_0 : i32, i32
  }
  func.func @transform_7(%arg0: i32, %arg1: i32) -> (i32, i32) {
    %c0_i32 = arith.constant 0 : i32
    %c0_i32_0 = arith.constant 0 : i32
    %c0_i32_1 = arith.constant 0 : i32
    return %c0_i32, %c0_i32_0 : i32, i32
  }
  func.func @transform_8(%arg0: i32, %arg1: i32) -> (i32, i32) {
    %c0_i32 = arith.constant 0 : i32
    %c0_i32_0 = arith.constant 0 : i32
    %c0_i32_1 = arith.constant 0 : i32
    return %c0_i32, %c0_i32_0 : i32, i32
  }
  func.func @transform_9(%arg0: i32, %arg1: i32) -> (i32, i32) {
    %c0_i32 = arith.constant 0 : i32
    %c0_i32_0 = arith.constant 0 : i32
    %c0_i32_1 = arith.constant 0 : i32
    return %c0_i32, %c0_i32_0 : i32, i32
  }
  func.func @transform_10(%arg0: i32, %arg1: i32) -> (i32, i32) {
    %c0_i32 = arith.constant 0 : i32
    %c0_i32_0 = arith.constant 0 : i32
    %c0_i32_1 = arith.constant 0 : i32
    return %c0_i32, %c0_i32_0 : i32, i32
  }
  func.func @transform_11(%arg0: i32, %arg1: i32) -> (i32, i32) {
    %c0_i32 = arith.constant 0 : i32
    %c0_i32_0 = arith.constant 0 : i32
    %c0_i32_1 = arith.constant 0 : i32
    return %c0_i32, %c0_i32_0 : i32, i32
  }
  func.func @transform_12(%arg0: i32, %arg1: i32) -> (i32, i32) {
    %c0_i32 = arith.constant 0 : i32
    %c0_i32_0 = arith.constant 0 : i32
    %c0_i32_1 = arith.constant 0 : i32
    return %c0_i32, %c0_i32_0 : i32, i32
  }
  func.func @transform_13(%arg0: i32, %arg1: i32) -> (i32, i32) {
    %c0_i32 = arith.constant 0 : i32
    %c0_i32_0 = arith.constant 0 : i32
    %c0_i32_1 = arith.constant 0 : i32
    return %c0_i32, %c0_i32_0 : i32, i32
  }
  func.func @transform_14(%arg0: i32, %arg1: i32) -> (i32, i32) {
    %c0_i32 = arith.constant 0 : i32
    %c0_i32_0 = arith.constant 0 : i32
    %c0_i32_1 = arith.constant 0 : i32
    return %c0_i32, %c0_i32_0 : i32, i32
  }
  func.func @transform_15(%arg0: i32, %arg1: i32) -> (i32, i32) {
    %c0_i32 = arith.constant 0 : i32
    %c0_i32_0 = arith.constant 0 : i32
    return %arg0, %c0_i32 : i32, i32
  }
}

</mosaic_0001>

<bundles_post_ra>
// kernel: tpu_custom_call.1
= control target key start
LH: loop header
LB: loop body
LE: loop exit
PB: predicated region body
PF: predicated region fallthrough
CT: control target
= control target key end

     0   :  { %s7014_s0 = inlined_call_operand.vmem [shape: bf16[2,64,27], index: 0, kind: input, shape index: {}]   ;;  %s7015_s1 = inlined_call_operand.vmem [shape: f32[2,128], index: 1, kind: input, shape index: {}]   ;;  %s7016_s2 = inlined_call_operand.vmem [shape: bf16[27,1280], index: 2, kind: input, shape index: {}]   ;;  %s7017_s3 = inlined_call_operand.vmem [shape: f32[1,1280], index: 3, kind: input, shape index: {}]   ;;  %s7018_s4 = inlined_call_operand.hbm [shape: f32[1280,128], index: 4, kind: input, shape index: {}]   ;;  %s7019_s5 = inlined_call_operand.vmem [shape: f32[1,128], index: 5, kind: input, shape index: {}]   ;;  %s7020_s6 = inlined_call_operand.vmem [shape: f32[128,128], index: 6, kind: input, shape index: {}]   ;;  %s7021_s7 = inlined_call_operand.hbm [shape: f32[128,128], index: 7, kind: input, shape index: {}]   ;;  %s7022_s8 = inlined_call_operand.vmem [shape: f32[1,128], index: 8, kind: input, shape index: {}]   ;;  %s7023_s9 = inlined_call_operand.vmem [shape: f32[128,64], index: 9, kind: input, shape index: {}]   ;;  %s7024_s10 = inlined_call_operand.vmem [shape: f32[1,64], index: 10, kind: input, shape index: {}]   ;;  %s7025_s11 = inlined_call_operand.vmem [shape: f32[64,16], index: 11, kind: input, shape index: {}]   ;;  %s7026_s12 = inlined_call_operand.vmem [shape: f32[1,16], index: 12, kind: input, shape index: {}]   ;;  %s7027_s13 = inlined_call_operand.vmem [shape: f32[16,1], index: 13, kind: input, shape index: {}]   ;;  %s7028_s14 = inlined_call_operand.<no memory space> [shape: f32[1,1], index: 14, kind: input, shape index: {}]   ;;  %s7029_s15 = inlined_call_operand.vmem [shape: f32[2,1], index: 15, kind: output, shape index: {}]  }
   0x1   :  { %v20_v0 = vstv %s7028_s14 }
   0x2   :  { %21 = vst [vmem:[#allocation3] sm:$0x1] %v20_v0 }
   0x3   :  { %22 = vsyncpa [#allocation5], 0 }
   0x4   :  { %23 = vsyncpa [#allocation7], 0  ;;  %s4903_s20 = smov [#allocation4]   ;;  %s4855_s24 = scalar_lea.hbm %s7018_s4, 20480 }
   0x5   :  { %s37_s21 = sshll.u32 %s4903_s20, 4  ;;  %p4856_p0 = scmp.ne.s32.totalorder %s7018_s4, %s4855_s24  ;;  %s38_s21 = int_to_ptr.vmem [resolvable:$true] %s37_s21 }
   0x6   :  { %p4859_p1 = scmp.lt.u32.totalorder %s4855_s24, %s7018_s4 }
   0x8   :  { %p4861_p2 = pnand %p4859_p1, %p4856_p0 }
   0xa   :  { %4864 = shalt.err (!%p4861_p2)
}
   0xb   :  { %s4865_s14 = scalar_lea.vmem %s38_s21, 20480  ;;  %p4870_p4 = scmp.lt.s32.totalorder %s38_s21, %s38_s21 }
   0xc   :  { %p4866_p3 = scmp.ne.s32.totalorder %s38_s21, %s4865_s14  ;;  %p4871_p5 = scmp.lt.s32.totalorder %s4865_s14, %s4865_s14 }
   0xe   :  { %p4872_p6 = por %p4871_p5, %p4870_p4 }
  0x10   :  { %p4873_p7 = pnand %p4872_p6, %p4866_p3 }
  0x12   :  { %4876 = shalt.err (!%p4873_p7)
}
  0x13   :  { %s4904_s29 = smov 128   ;;  %s4905_s30 = smov 8  }
  0x14   :  { %43 = dma.hbm_to_vmem [thread:$0]  %s7018_s4, 20480, %s38_s21, [#allocation5], %s4904_s29, %s4904_s29, %s4905_s30  }
  0x15   :  { %s4906_s18 = smov [#allocation6]   ;;  %s4877_s23 = scalar_lea.hbm %s7021_s7, 2048 }
  0x16   :  { %s53_s19 = sshll.u32 %s4906_s18, 4  ;;  %p4878_p8 = scmp.ne.s32.totalorder %s7021_s7, %s4877_s23  ;;  %s54_s19 = int_to_ptr.vmem [resolvable:$true] %s53_s19 }
  0x17   :  { %p4881_p9 = scmp.lt.u32.totalorder %s4877_s23, %s7021_s7 }
  0x19   :  { %p4883_p10 = pnand %p4881_p9, %p4878_p8 }
  0x1b   :  { %4886 = shalt.err (!%p4883_p10)
}
  0x1c   :  { %s4887_s28 = scalar_lea.vmem %s54_s19, 2048  ;;  %p4892_p12 = scmp.lt.s32.totalorder %s54_s19, %s54_s19 }
  0x1d   :  { %p4888_p11 = scmp.ne.s32.totalorder %s54_s19, %s4887_s28  ;;  %p4893_p13 = scmp.lt.s32.totalorder %s4887_s28, %s4887_s28 }
  0x1f   :  { %p4894_p0 = por %p4893_p13, %p4892_p12 }
  0x21   :  { %p4895_p1 = pnand %p4894_p0, %p4888_p11 }
  0x23   :  { %4898 = shalt.err (!%p4895_p1)
}
  0x24   :  { %59 = dma.hbm_to_vmem [thread:$0]  %s7021_s7, 2048, %s54_s19, [#allocation7], %s4904_s29, %s4904_s29, %s4905_s30  }
  0x25   :  { %4899 = dma.done.wait [#allocation5], 20480  }
  0x26   :  { %4900 = vsyncadd [#allocation5], 4294946816 }
  0x27   :  { %4901 = dma.done.wait [#allocation7], 2048  }
  0x28   :  { %4902 = vsyncadd [#allocation7], 4294965248  ;;  %v4907_v1 = vmov 0   ;;  %vm293_vm0 = vcmask 1044480   ;;  %vm294_vm1 = vcmask 1045504   ;;  %v4908_v2 = vmov 65535  }
  0x29   :  { %359 = vmatprep.mubr.bf16.mxu0 %v4907_v1  ;;  %432 = vmatprep.mubr.bf16.mxu1 %v4907_v1  ;;  %v295_v3 = vsel %vm293_vm0, 4294967295, %v4908_v2  ;;  %v4161_v4 = vld [vmem:[%s7016_s2 + $0x4] ss:$40 sps:$4 sm:$0xff]   ;;  %v5033_v6 = vld [vmem:[%s7016_s2] ss:$40 sps:$4 sm:$0xff]   ;;  %vm280_vm2 = vcmask 220160   ;;  %v120_v43 = vlaneseq }
  0x2a   :  { %v5028_v5 = vld [vmem:[%s7016_s2 + $0xc] ss:$40 sps:$4 sm:$0xff]   ;;  %327 = vmatprep.subr.bf16.mxu0 %v4161_v4  ;;  %v5038_v7 = vld [vmem:[%s7016_s2 + $0x8] ss:$40 sps:$4 sm:$0xff]   ;;  %v5040_v8 = vsel %vm294_vm1, %v295_v3, 0  ;;  %v5079_v18 = vld [vmem:[%s7014_s0] sm:$0xff]  }
  0x2b   :  { %400 = vmatprep.subr.bf16.mxu1 %v5028_v5  ;;  %v4167_v9 = vld [vmem:[%s7016_s2 + $0x54] ss:$40 sps:$4 sm:$0x3f]   ;;  %328 = vmatpush1.bf16.msra.mxu0 %v5033_v6  ;;  %v4171_v12 = vld [vmem:[%s7016_s2 + $0x50] ss:$40 sps:$4 sm:$0x3f]  }
  0x2c   :  { %401 = vmatpush1.bf16.msra.mxu1 %v5038_v7  ;;  %v4169_v10 = vld [vmem:[%s7016_s2 + $0x5c] ss:$40 sps:$4 sm:$0x3f]   ;;  %v5052_v11 = vand.u32 %v4167_v9, %v5040_v8  ;;  %v4172_v13 = vld [vmem:[%s7016_s2 + $0x58] ss:$40 sps:$4 sm:$0x3f]   ;;  %v5065_v15 = vand.u32 %v4171_v12, %v5040_v8 }
  0x2d   :  { %v5061_v14 = vand.u32 %v4169_v10, %v5040_v8  ;;  %v5068_v16 = vand.u32 %v4172_v13, %v5040_v8  ;;  %v5073_v17 = vld [vmem:[%s7016_s2 + $0x14] ss:$40 sps:$4 sm:$0xff]   ;;  %v5086_v19 = vld [vmem:[%s7016_s2 + $0x10] ss:$40 sps:$4 sm:$0xff]   ;;  %v5124_v27 = vld [vmem:[%s7014_s0 + $0x8] sm:$0xff]   ;;  %v5274_v44 = vshrl.u32 %v120_v43, 7 }
  0x2e   :  { %329 = vmatprep.subr.bf16.mxu0 %v5052_v11  ;;  %v4179_v20 = vld [vmem:[%s7016_s2 + $0x60] ss:$40 sps:$4 sm:$0x3f]   ;;  %v4181_v21 = vld [vmem:[%s7016_s2 + $0x64] ss:$40 sps:$4 sm:$0x3f]  }
  0x2f   :  { %402 = vmatprep.subr.bf16.mxu1 %v5061_v14  ;;  %330 = vmatpush1.bf16.msra.mxu0 %v5065_v15  ;;  %v5102_v22 = vand.u32 %v4181_v21, %v5040_v8  ;;  %v5105_v23 = vand.u32 %v4179_v20, %v5040_v8  ;;  %v5110_v24 = vld [vmem:[%s7016_s2 + $0x18] ss:$40 sps:$4 sm:$0xff]   ;;  %v5115_v25 = vld [vmem:[%s7016_s2 + $0x1c] ss:$40 sps:$4 sm:$0xff]   ;;  %v4178_v32 = vld [vmem:[%s7014_s0 + $0x10] sm:$0xff]   ;;  %7060 = vst [vmem:[#allocation10_spill] sm:$0xff] %v5274_v44 }
  0x30   :  { %403 = vmatpush1.bf16.msra.mxu1 %v5068_v16  ;;  %473 = vmatprep.subr.bf16.mxu0 %v5073_v17  ;;  %v4186_v26 = vld [vmem:[%s7016_s2 + $0x68] ss:$40 sps:$4 sm:$0x3f]   ;;  %v4188_v28 = vld [vmem:[%s7016_s2 + $0x6c] ss:$40 sps:$4 sm:$0x3f]  }
  0x31   :  { %546 = vmatprep.subr.bf16.mxu1 %v5115_v25  ;;  %v5135_v29 = vld [vmem:[%s7016_s2 + $0x24] ss:$40 sps:$4 sm:$0xff]   ;;  %v5139_v30 = vand.u32 %v4188_v28, %v5040_v8  ;;  %v5142_v31 = vand.u32 %v4186_v26, %v5040_v8  ;;  %v4182_v33 = vld [vmem:[%s7014_s0 + $0x18] sm:$0xff]   ;;  %v4189_v35 = vld [vmem:[%s7016_s2 + $0x20] ss:$40 sps:$4 sm:$0xff]   ;;  %v7031_v45 = vsub.s32 0, %v5274_v44 }
  0x32   :  { %3476 = vmatmul.mubr.msk.bf16.vlgmr.msra.gmra.mrb[0].mxu0 %vm280_vm2, %v5079_v18  ;;  %v4194_v34 = vld [vmem:[%s7016_s2 + $0x74] ss:$40 sps:$4 sm:$0x3f]   ;;  %v4192_v36 = vld [vmem:[%s7016_s2 + $0x70] ss:$40 sps:$4 sm:$0x3f]  }
  0x33   :  { %3480 = vmatmul.mubr.msk.bf16.vlgmr.msra.gmra.mrb[0].mxu1 %vm280_vm2, %v5079_v18  ;;  %474 = vmatpush1.bf16.msra.mxu0 %v5086_v19  ;;  %v325_v37 = vand.u32 %v4194_v34, %v5040_v8  ;;  %v322_v38 = vand.u32 %v4192_v36, %v5040_v8  ;;  %v4195_v39 = vld [vmem:[%s7014_s0 + $0x20] sm:$0xff]   ;;  %v4196_v40 = vld [vmem:[%s7014_s0 + $0x28] sm:$0xff]   ;;  %v4197_v41 = vld [vmem:[%s7014_s0 + $0x30] sm:$0xff]   ;;  %v130_v46 = vsub.s32 2, %v5274_v44  ;;  %v7030_v48 = vsub.s32 1, %v5274_v44 }
  0x34   :  { %369 = vmatprep.mubr.bf16.mxu0 %v4907_v1  ;;  %442 = vmatprep.mubr.bf16.mxu1 %v4907_v1  ;;  %v4198_v42 = vld [vmem:[%s7014_s0 + $0x38] sm:$0xff]   ;;  %v5281_v47 = vld [vmem:[%s7017_s3] sm:$0xff]  ;;  %v134_v49 = vsub.s32 3, %v5274_v44  ;;  %vm2321_vm3 = vcmask 1040384   ;;  %vm4912_vm4 = vmmov 0   ;;  %vm3281_vm5 = vcmask 523264  }
  0x35   :  { %475 = vmatprep.subr.bf16.mxu0 %v5102_v22  ;;  %547 = vmatpush1.bf16.msra.mxu1 %v5110_v24  ;;  %v5288_v50 = vrot.slane %v5281_v47, %v7031_v45  ;;  %v5291_v51 = vrot.slane %v5281_v47, %v130_v46  ;;  %v5296_v52 = vrot.slane %v5281_v47, %v7030_v48  ;;  %vm3370_vm6 = vcmask 130048  }
  0x36   :  { %548 = vmatprep.subr.bf16.mxu1 %v5139_v30  ;;  %v5299_v53 = vrot.slane %v5281_v47, %v134_v49  ;;  %vm3444_vm7 = vcmask 1024  }
  0x37   :  { %476 = vmatpush1.bf16.msra.mxu0 %v5105_v23  ;;  %7061 = vst [vmem:[#allocation11_spill] sm:$0xff] %v5288_v50  ;;  %7062 = vst [vmem:[#allocation12_spill] sm:$0xff] %v5291_v51 }
  0x38   :  { %619 = vmatprep.subr.bf16.mxu0 %v5135_v29  ;;  %7063 = vst [vmem:[#allocation13_spill] sm:$0xff] %v5296_v52  ;;  %7064 = vst [vmem:[#allocation14_spill] sm:$0xff] %v5299_v53 }
  0x39   :  { %549 = vmatpush1.bf16.msra.mxu1 %v5142_v31 }
  0x3a   :  { %3477 = vmatmul.mubr.msk.bf16.gmra.mrb[4].mxu0 %vm280_vm2, %v5124_v27  ;;  %1343 = vmatprep.subr.bf16.mxu1 %v4161_v4 }
  0x3b   :  { %3481 = vmatmul.mubr.msk.bf16.gmra.mrb[4].mxu1 %vm280_vm2, %v5124_v27  ;;  %379 = vmatprep.mubr.bf16.mxu0 %v4907_v1 }
  0x3c   :  { %452 = vmatprep.mubr.bf16.mxu1 %v4907_v1 }
  0x42   :  { %3478 = vmatmul.mubr.msk.bf16.gmra.mrb[8].mxu0 %vm280_vm2, %v4178_v32 }
  0x43   :  { %3482 = vmatmul.mubr.msk.bf16.gmra.mrb[8].mxu1 %vm280_vm2, %v4178_v32  ;;  %389 = vmatprep.mubr.bf16.mxu0 %v4907_v1 }
  0x44   :  { %462 = vmatprep.mubr.bf16.mxu1 %v4907_v1 }
  0x4a   :  { %3479 = vmatmul.mubr.msk.bf16.gmra.mrb[12].mxu0 %vm280_vm2, %v4182_v33 }
  0x4b   :  { %3483 = vmatmul.mubr.msk.bf16.gmra.mrb[12].mxu1 %vm280_vm2, %v4182_v33  ;;  %505 = vmatprep.mubr.bf16.mxu0 %v4907_v1 }
  0x4c   :  { %578 = vmatprep.mubr.bf16.mxu1 %v4907_v1 }
  0x52   :  { %3484 = vmatmul.mubr.msk.bf16.vlgmr.msra.gmra.mrb[16].mxu0 %vm280_vm2, %v5079_v18 }
  0x53   :  { %3488 = vmatmul.mubr.msk.bf16.vlgmr.msra.gmra.mrb[16].mxu1 %vm280_vm2, %v5079_v18  ;;  %620 = vmatpush1.bf16.msra.mxu0 %v4189_v35 }
  0x54   :  { %515 = vmatprep.mubr.bf16.mxu0 %v4907_v1  ;;  %588 = vmatprep.mubr.bf16.mxu1 %v4907_v1 }
  0x55   :  { %621 = vmatprep.subr.bf16.mxu0 %v325_v37  ;;  %1344 = vmatpush1.bf16.msra.mxu1 %v5033_v6 }
  0x56   :  { %1345 = vmatprep.subr.bf16.mxu1 %v5052_v11 }
  0x57   :  { %622 = vmatpush1.bf16.msra.mxu0 %v322_v38 }
  0x58   :  { %1416 = vmatprep.subr.bf16.mxu0 %v5028_v5 }
  0x59   :  { %1346 = vmatpush1.bf16.msra.mxu1 %v5065_v15 }
  0x5a   :  { %3485 = vmatmul.mubr.msk.bf16.gmra.mrb[20].mxu0 %vm280_vm2, %v5124_v27  ;;  %1489 = vmatprep.subr.bf16.mxu1 %v5073_v17 }
  0x5b   :  { %3489 = vmatmul.mubr.msk.bf16.gmra.mrb[20].mxu1 %vm280_vm2, %v5124_v27  ;;  %525 = vmatprep.mubr.bf16.mxu0 %v4907_v1 }
  0x5c   :  { %598 = vmatprep.mubr.bf16.mxu1 %v4907_v1 }
  0x62   :  { %3486 = vmatmul.mubr.msk.bf16.gmra.mrb[24].mxu0 %vm280_vm2, %v4178_v32 }
  0x63   :  { %3490 = vmatmul.mubr.msk.bf16.gmra.mrb[24].mxu1 %vm280_vm2, %v4178_v32  ;;  %535 = vmatprep.mubr.bf16.mxu0 %v4907_v1 }
  0x64   :  { %608 = vmatprep.mubr.bf16.mxu1 %v4907_v1 }
  0x6a   :  { %3487 = vmatmul.mubr.msk.bf16.gmra.mrb[28].mxu0 %vm280_vm2, %v4182_v33 }
  0x6b   :  { %3491 = vmatmul.mubr.msk.bf16.gmra.mrb[28].mxu1 %vm280_vm2, %v4182_v33  ;;  %651 = vmatprep.mubr.bf16.mxu0 %v4907_v1 }
  0x6c   :  { %1375 = vmatprep.mubr.bf16.mxu1 %v4907_v1 }
  0x72   :  { %3492 = vmatmul.mubr.msk.bf16.vlgmr.msra.gmra.mrb[32].mxu0 %vm280_vm2, %v5079_v18 }
  0x73   :  { %3508 = vmatmul.mubr.msk.bf16.vlgmr.msra.gmra.mrb[32].mxu1 %vm280_vm2, %v4195_v39  ;;  %1417 = vmatpush1.bf16.msra.mxu0 %v5038_v7 }
  0x74   :  { %661 = vmatprep.mubr.bf16.mxu0 %v4907_v1  ;;  %1385 = vmatprep.mubr.bf16.mxu1 %v4907_v1 }
  0x75   :  { %1418 = vmatprep.subr.bf16.mxu0 %v5061_v14  ;;  %1490 = vmatpush1.bf16.msra.mxu1 %v5086_v19 }
  0x76   :  { %1491 = vmatprep.subr.bf16.mxu1 %v5102_v22 }
  0x77   :  { %1419 = vmatpush1.bf16.msra.mxu0 %v5068_v16 }
  0x78   :  { %1562 = vmatprep.subr.bf16.mxu0 %v5115_v25 }
  0x79   :  { %1492 = vmatpush1.bf16.msra.mxu1 %v5105_v23 }
  0x7a   :  { %3493 = vmatmul.mubr.msk.bf16.gmra.mrb[36].mxu0 %vm280_vm2, %v5124_v27  ;;  %1635 = vmatprep.subr.bf16.mxu1 %v5135_v29 }
  0x7b   :  { %3509 = vmatmul.mubr.msk.bf16.gmra.mrb[36].mxu1 %vm280_vm2, %v4196_v40  ;;  %671 = vmatprep.mubr.bf16.mxu0 %v4907_v1 }
  0x7c   :  { %1395 = vmatprep.mubr.bf16.mxu1 %v4907_v1 }
  0x82   :  { %3494 = vmatmul.mubr.msk.bf16.gmra.mrb[40].mxu0 %vm280_vm2, %v4178_v32 }
  0x83   :  { %3510 = vmatmul.mubr.msk.bf16.gmra.mrb[40].mxu1 %vm280_vm2, %v4197_v41  ;;  %681 = vmatprep.mubr.bf16.mxu0 %v4907_v1 }
  0x84   :  { %1405 = vmatprep.mubr.bf16.mxu1 %v4907_v1 }
  0x8a   :  { %3495 = vmatmul.mubr.msk.bf16.gmra.mrb[44].mxu0 %vm280_vm2, %v4182_v33 }
  0x8b   :  { %3511 = vmatmul.mubr.msk.bf16.gmra.mrb[44].mxu1 %vm280_vm2, %v4198_v42  ;;  %1448 = vmatprep.mubr.bf16.mxu0 %v4907_v1 }
  0x8c   :  { %1521 = vmatprep.mubr.bf16.mxu1 %v4907_v1 }
  0x92   :  { %3512 = vmatmul.mubr.msk.bf16.vlgmr.msra.gmra.mrb[48].mxu0 %vm280_vm2, %v4195_v39 }
  0x93   :  { %3516 = vmatmul.mubr.msk.bf16.vlgmr.msra.gmra.mrb[48].mxu1 %vm280_vm2, %v4195_v39  ;;  %1563 = vmatpush1.bf16.msra.mxu0 %v5110_v24 }
  0x94   :  { %1458 = vmatprep.mubr.bf16.mxu0 %v4907_v1  ;;  %1531 = vmatprep.mubr.bf16.mxu1 %v4907_v1 }
  0x95   :  { %1564 = vmatprep.subr.bf16.mxu0 %v5139_v30  ;;  %1636 = vmatpush1.bf16.msra.mxu1 %v4189_v35 }
  0x96   :  { %1637 = vmatprep.subr.bf16.mxu1 %v325_v37 }
  0x97   :  { %1565 = vmatpush1.bf16.msra.mxu0 %v5142_v31 }
  0x99   :  { %1638 = vmatpush1.bf16.msra.mxu1 %v322_v38 }
  0x9a   :  { %3513 = vmatmul.mubr.msk.bf16.gmra.mrb[52].mxu0 %vm280_vm2, %v4196_v40 }
  0x9b   :  { %3517 = vmatmul.mubr.msk.bf16.gmra.mrb[52].mxu1 %vm280_vm2, %v4196_v40  ;;  %1468 = vmatprep.mubr.bf16.mxu0 %v4907_v1 }
  0x9c   :  { %1541 = vmatprep.mubr.bf16.mxu1 %v4907_v1 }
  0xa2   :  { %3514 = vmatmul.mubr.msk.bf16.gmra.mrb[56].mxu0 %vm280_vm2, %v4197_v41 }
  0xa3   :  { %3518 = vmatmul.mubr.msk.bf16.gmra.mrb[56].mxu1 %vm280_vm2, %v4197_v41  ;;  %1478 = vmatprep.mubr.bf16.mxu0 %v4907_v1 }
  0xa4   :  { %1551 = vmatprep.mubr.bf16.mxu1 %v4907_v1 }
  0xaa   :  { %3515 = vmatmul.mubr.msk.bf16.gmra.mrb[60].mxu0 %vm280_vm2, %v4198_v42 }
  0xab   :  { %3519 = vmatmul.mubr.msk.bf16.gmra.mrb[60].mxu1 %vm280_vm2, %v4198_v42  ;;  %1594 = vmatprep.mubr.bf16.mxu0 %v4907_v1 }
  0xac   :  { %1667 = vmatprep.mubr.bf16.mxu1 %v4907_v1 }
  0xb2   :  { %3520 = vmatmul.mubr.msk.bf16.vlgmr.msra.gmra.mrb[64].mxu0 %vm280_vm2, %v4195_v39 }
  0xb3   :  { %3524 = vmatmul.mubr.msk.bf16.vlgmr.msra.gmra.mrb[64].mxu1 %vm280_vm2, %v4195_v39  ;;  %1604 = vmatprep.mubr.bf16.mxu0 %v4907_v1 }
  0xb4   :  { %1677 = vmatprep.mubr.bf16.mxu1 %v4907_v1 }
  0xba   :  { %3521 = vmatmul.mubr.msk.bf16.gmra.mrb[68].mxu0 %vm280_vm2, %v4196_v40 }
  0xbb   :  { %3525 = vmatmul.mubr.msk.bf16.gmra.mrb[68].mxu1 %vm280_vm2, %v4196_v40  ;;  %1614 = vmatprep.mubr.bf16.mxu0 %v4907_v1 }
  0xbc   :  { %1687 = vmatprep.mubr.bf16.mxu1 %v4907_v1 }
  0xc2   :  { %3522 = vmatmul.mubr.msk.bf16.gmra.mrb[72].mxu0 %vm280_vm2, %v4197_v41 }
  0xc3   :  { %3526 = vmatmul.mubr.msk.bf16.gmra.mrb[72].mxu1 %vm280_vm2, %v4197_v41  ;;  %1624 = vmatprep.mubr.bf16.mxu0 %v4907_v1 }
  0xc4   :  { %1697 = vmatprep.mubr.bf16.mxu1 %v4907_v1 }
  0xca   :  { %3523 = vmatmul.mubr.msk.bf16.gmra.mrb[76].mxu0 %vm280_vm2, %v4198_v42 }
  0xcb   :  { %3527 = vmatmul.mubr.msk.bf16.gmra.mrb[76].mxu1 %vm280_vm2, %v4198_v42 }
 0x105   :  { %v361_v54 = vpop.f32.mrb[0].mxu0 }
 0x106   :  { %v434_v55 = vpop.f32.mrb[0].mxu1  ;;  %v5302_v56 = vadd.f32 %v361_v54, %v5288_v50  ;;  %v363_v57 = vpop.f32.mrb[1].mxu0  ;;  %v138_v54 = vsub.s32 4, %v5274_v44 }
 0x107   :  { %v5305_v58 = vadd.f32 %v434_v55, %v5291_v51  ;;  %v436_v59 = vpop.f32.mrb[1].mxu1  ;;  %v5308_v60 = vadd.f32 %v363_v57, %v5296_v52  ;;  %v365_v61 = vpop.f32.mrb[2].mxu0 }
 0x108   :  { %v5311_v62 = vadd.f32 %v436_v59, %v5299_v53  ;;  %v438_v63 = vpop.f32.mrb[2].mxu1  ;;  %v692_v0 = vsub.f32 0.0, %v5302_v56  ;;  %v5315_v1 = vadd.f32 %v365_v61, %v5288_v50  ;;  %v367_v3 = vpop.f32.mrb[3].mxu0 }
 0x109   :  { %v694_v2 = vsub.f32 0.0, %v5305_v58  ;;  %v5319_v4 = vadd.f32 %v438_v63, %v5291_v51  ;;  %v440_v5 = vpop.f32.mrb[3].mxu1  ;;  %v693_v6 = vsub.f32 0.0, %v5308_v60  ;;  %v5323_v7 = vadd.f32 %v367_v3, %v5296_v52 }
 0x10a   :  { %v695_v8 = vsub.f32 0.0, %v5311_v62  ;;  %v5327_v9 = vadd.f32 %v440_v5, %v5299_v53  ;;  %v772_v10 = vmul.f32 1.442695, %v692_v0  ;;  %v702_v11 = vsub.f32 0.0, %v5315_v1 }
 0x10b   :  { %v704_v12 = vsub.f32 0.0, %v5319_v4  ;;  %v774_v13 = vmul.f32 1.442695, %v693_v6  ;;  %v776_v14 = vmul.f32 1.442695, %v694_v2  ;;  %v703_v15 = vsub.f32 0.0, %v5323_v7 }
 0x10c   :  { %v705_v16 = vsub.f32 0.0, %v5327_v9  ;;  %4199 = vpow2.f32 %v772_v10  ;;  %v792_v17 = vmul.f32 1.442695, %v702_v11  ;;  %v778_v19 = vmul.f32 1.442695, %v695_v8 }
 0x10d   :  { %4201 = vpow2.f32 %v774_v13  ;;  %v794_v18 = vmul.f32 1.442695, %v703_v15  ;;  %v371_v20 = vpop.f32.mrb[4].mxu0  ;;  %v796_v22 = vmul.f32 1.442695, %v704_v12  ;;  %v146_v2 = vsub.s32 6, %v5274_v44 }
 0x10e   :  { %v444_v21 = vpop.f32.mrb[4].mxu1  ;;  %4203 = vpow2.f32 %v792_v17  ;;  %v5334_v23 = vadd.f32 %v371_v20, %v5288_v50  ;;  %v373_v25 = vpop.f32.mrb[5].mxu0  ;;  %v798_v27 = vmul.f32 1.442695, %v705_v16  ;;  %v5364_v15 = vrot.slane %v5281_v47, %v138_v54 }
 0x10f   :  { %v5337_v24 = vadd.f32 %v444_v21, %v5291_v51  ;;  %v446_v26 = vpop.f32.mrb[5].mxu1  ;;  %4205 = vpow2.f32 %v776_v14  ;;  %v5340_v28 = vadd.f32 %v373_v25, %v5296_v52  ;;  %v375_v30 = vpop.f32.mrb[6].mxu0 }
 0x110   :  { %v5343_v29 = vadd.f32 %v446_v26, %v5299_v53  ;;  %v448_v31 = vpop.f32.mrb[6].mxu1  ;;  %4207 = vpow2.f32 %v794_v18  ;;  %v712_v32 = vsub.f32 0.0, %v5334_v23  ;;  %v5348_v34 = vadd.f32 %v375_v30, %v5288_v50  ;;  %v377_v35 = vpop.f32.mrb[7].mxu0 }
 0x111   :  { %v714_v33 = vsub.f32 0.0, %v5337_v24  ;;  %v450_v36 = vpop.f32.mrb[7].mxu1  ;;  %4209 = vpow2.f32 %v778_v19  ;;  %v713_v37 = vsub.f32 0.0, %v5340_v28  ;;  %v5354_v46 = vadd.f32 %v448_v31, %v5291_v51 }
 0x112   :  { %v715_v38 = vsub.f32 0.0, %v5343_v29  ;;  %4211 = vpow2.f32 %v796_v22  ;;  %v812_v39 = vmul.f32 1.442695, %v712_v32  ;;  %v722_v41 = vsub.f32 0.0, %v5348_v34 }
 0x113   :  { %v816_v40 = vmul.f32 1.442695, %v714_v33  ;;  %4213 = vpow2.f32 %v798_v27  ;;  %v814_v42 = vmul.f32 1.442695, %v713_v37  ;;  %v5358_v55 = vadd.f32 %v377_v35, %v5296_v52 }
 0x114   :  { %v818_v43 = vmul.f32 1.442695, %v715_v38  ;;  %4215 = vpow2.f32 %v812_v39  ;;  %v832_v49 = vmul.f32 1.442695, %v722_v41  ;;  %v724_v6 = vsub.f32 0.0, %v5354_v46 }
 0x115   :  { %4217 = vpow2.f32 %v816_v40  ;;  %v381_v57 = vpop.f32.mrb[8].mxu0  ;;  %v723_v19 = vsub.f32 0.0, %v5358_v55  ;;  %v5369_v20 = vadd.f32 %v450_v36, %v5299_v53  ;;  %v5375_v27 = vrot.slane %v5281_v47, %v146_v2 }
 0x116   :  { %v454_v59 = vpop.f32.mrb[8].mxu1  ;;  %v4200_v61 = vpop.eup %4199  ;;  %4219 = vpow2.f32 %v814_v42  ;;  %v5372_v26 = vadd.f32 %v381_v57, %v5288_v50  ;;  %v5377_v32 = vmul.f32 1.442695, %v724_v6 }
 0x117   :  { %v383_v63 = vpop.f32.mrb[9].mxu0  ;;  %v456_v0 = vpop.f32.mrb[9].mxu1  ;;  %v932_v5 = vadd.f32 1.0, %v4200_v61  ;;  %4221 = vpow2.f32 %v818_v43  ;;  %7066 = vst [vmem:[#allocation16_spill] sm:$0xff] %v5375_v27  ;;  %v5380_v33 = vadd.f32 %v454_v59, %v5291_v51  ;;  %v834_v41 = vmul.f32 1.442695, %v723_v19 }
 0x118   :  { %v4202_v3 = vpop.eup %4201  ;;  %v385_v8 = vpop.f32.mrb[10].mxu0  ;;  %4223 = vpow2.f32 %v832_v49  ;;  %7065 = vst [vmem:[#allocation15_spill] sm:$0xff] %v5372_v26  ;;  %v5383_v37 = vadd.f32 %v383_v63, %v5296_v52  ;;  %v5386_v38 = vadd.f32 %v456_v0, %v5299_v53  ;;  %v725_v42 = vsub.f32 0.0, %v5369_v20 }
 0x119   :  { %v458_v10 = vpop.f32.mrb[10].mxu1  ;;  %v4204_v12 = vpop.eup %4203  ;;  %v933_v13 = vadd.f32 1.0, %v4202_v3  ;;  %4225 = vrcp.f32 %v932_v5  ;;  %7067 = vst [vmem:[#allocation17_spill] sm:$0xff] %v5380_v33  ;;  %v732_v59 = vsub.f32 0.0, %v5372_v26  ;;  %v5391_v61 = vadd.f32 %v385_v8, %v5288_v50 }
 0x11a   :  { %v387_v14 = vpop.f32.mrb[11].mxu0  ;;  %v4206_v17 = vpop.eup %4205  ;;  %v942_v18 = vadd.f32 1.0, %v4204_v12  ;;  %7068 = vst [vmem:[#allocation18_spill] sm:$0xff] %v5383_v37  ;;  %7069 = vst [vmem:[#allocation19_spill] sm:$0xff] %v5386_v38  ;;  %v734_v5 = vsub.f32 0.0, %v5380_v33  ;;  %v5399_v6 = vadd.f32 %v458_v10, %v5291_v51  ;;  %v735_v19 = vsub.f32 0.0, %v5386_v38 }
 0x11b   :  { %v460_v21 = vpop.f32.mrb[11].mxu1  ;;  %v4208_v22 = vpop.eup %4207  ;;  %4227 = vrcp.f32 %v933_v13  ;;  %v934_v25 = vadd.f32 1.0, %v4206_v17  ;;  %7070 = vst [vmem:[#allocation20_spill] sm:$0xff] %v5391_v61  ;;  %v838_v10 = vmul.f32 1.442695, %v725_v42 }
 0x11c   :  { %v4210_v30 = vpop.eup %4209  ;;  %4229 = vrcp.f32 %v942_v18  ;;  %v943_v31 = vadd.f32 1.0, %v4208_v22  ;;  %7071 = vst [vmem:[#allocation21_spill] sm:$0xff] %v5399_v6  ;;  %v733_v18 = vsub.f32 0.0, %v5383_v37  ;;  %v744_v48 = vsub.f32 0.0, %v5399_v6 }
 0x11d   :  { %v4212_v35 = vpop.eup %4211  ;;  %4231 = vrcp.f32 %v934_v25  ;;  %v935_v36 = vadd.f32 1.0, %v4210_v30  ;;  %v391_v43 = vpop.f32.mrb[12].mxu0  ;;  %v5417_v45 = vadd.f32 %v460_v21, %v5299_v53  ;;  %v856_v42 = vmul.f32 1.442695, %v734_v5 }
 0x11e   :  { %v4214_v39 = vpop.eup %4213  ;;  %4233 = vrcp.f32 %v943_v31  ;;  %v944_v40 = vadd.f32 1.0, %v4212_v35  ;;  %v464_v49 = vpop.f32.mrb[12].mxu1  ;;  %v5412_v35 = vadd.f32 %v387_v14, %v5296_v52  ;;  %v858_v14 = vmul.f32 1.442695, %v735_v19 }
 0x11f   :  { %v4216_v54 = vpop.eup %4215  ;;  %4235 = vrcp.f32 %v935_v36  ;;  %v945_v57 = vadd.f32 1.0, %v4214_v39  ;;  %v5393_v63 = vpop.f32.mrb[13].mxu0  ;;  %7073 = vst [vmem:[#allocation23_spill] sm:$0xff] %v5417_v45  ;;  %v745_v11 = vsub.f32 0.0, %v5417_v45 }
 0x120   :  { %v5395_v0 = vpop.f32.mrb[13].mxu1  ;;  %v4218_v2 = vpop.eup %4217  ;;  %4237 = vrcp.f32 %v944_v40  ;;  %v952_v3 = vadd.f32 1.0, %v4216_v54  ;;  %7072 = vst [vmem:[#allocation22_spill] sm:$0xff] %v5412_v35  ;;  %v852_v40 = vmul.f32 1.442695, %v732_v59  ;;  %v742_v54 = vsub.f32 0.0, %v5391_v61 }
 0x121   :  { %v5401_v12 = vpop.f32.mrb[14].mxu0  ;;  %v5403_v13 = vpop.f32.mrb[14].mxu1  ;;  %4239 = vrcp.f32 %v945_v57  ;;  %v954_v8 = vadd.f32 1.0, %v4218_v2  ;;  %v5421_v59 = vadd.f32 %v391_v43, %v5288_v50 }
 0x122   :  { %v4220_v17 = vpop.eup %4219  ;;  %v5407_v22 = vpop.f32.mrb[15].mxu0  ;;  %4241 = vrcp.f32 %v952_v3 }
 0x123   :  { %v5409_v25 = vpop.f32.mrb[15].mxu1  ;;  %v4222_v30 = vpop.eup %4221  ;;  %v953_v31 = vadd.f32 1.0, %v4220_v17  ;;  %4243 = vrcp.f32 %v954_v8  ;;  %v854_v17 = vmul.f32 1.442695, %v733_v18  ;;  %v743_v8 = vsub.f32 0.0, %v5412_v35 }
 0x124   :  { %v4224_v36 = vpop.eup %4223  ;;  %v955_v39 = vadd.f32 1.0, %v4222_v30  ;;  %v5424_v30 = vadd.f32 %v464_v49, %v5291_v51  ;;  %v872_v18 = vmul.f32 1.442695, %v742_v54  ;;  %v876_v49 = vmul.f32 1.442695, %v744_v48 }
 0x125   :  { %v4226_v57 = vpop.eup %4225  ;;  %4245 = vrcp.f32 %v953_v31  ;;  %v962_v2 = vadd.f32 1.0, %v4224_v36  ;;  %v5426_v31 = vpop.f32.mrb[16].mxu0  ;;  %v7074_v35 = vsub.s32 5, %v5274_v44  ;;  %v874_v61 = vmul.f32 1.442695, %v743_v8 }
 0x126   :  { %v4228_v3 = vpop.eup %4227  ;;  %4247 = vrcp.f32 %v955_v39  ;;  %v5428_v36 = vpop.f32.mrb[16].mxu1  ;;  %v1092_v39 = vmul.f32 %v4226_v57, %v5302_v56  ;;  %v754_v38 = vsub.f32 0.0, %v5424_v30 }
 0x127   :  { %v4230_v16 = vpop.eup %4229  ;;  %4249 = vrcp.f32 %v962_v2  ;;  %v5433_v19 = vpop.f32.mrb[17].mxu0  ;;  %v5441_v6 = vrot.slane %v5281_v47, %v7074_v35  ;;  %v752_v35 = vsub.f32 0.0, %v5421_v59 }
 0x128   :  { %v4232_v21 = vpop.eup %4231  ;;  %v1102_v5 = vmul.f32 %v4230_v16, %v5315_v1  ;;  %4251 = vpow2.f32 %v5377_v32  ;;  %v5435_v2 = vpop.f32.mrb[17].mxu1  ;;  %v1093_v32 = vmul.f32 %v4228_v3, %v5308_v60 }
 0x129   :  { %v4234_v43 = vpop.eup %4233  ;;  %4253 = vpow2.f32 %v834_v41  ;;  %v5443_v56 = vpop.f32.mrb[18].mxu0  ;;  %v1094_v33 = vmul.f32 %v4232_v21, %v5305_v58 }
 0x12a   :  { %v5445_v1 = vpop.f32.mrb[18].mxu1  ;;  %v4236_v16 = vpop.eup %4235  ;;  %v1172_v54 = vadd.f32 %v1102_v5, %v1092_v39  ;;  %v1103_v57 = vmul.f32 %v4234_v43, %v5323_v7  ;;  %4255 = vpow2.f32 %v838_v10  ;;  %v878_v39 = vmul.f32 1.442695, %v745_v11 }
 0x12b   :  { %v5449_v41 = vpop.f32.mrb[19].mxu0  ;;  %v5451_v48 = vpop.f32.mrb[19].mxu1  ;;  %4257 = vpow2.f32 %v852_v40  ;;  %v1095_v10 = vmul.f32 %v4236_v16, %v5311_v62  ;;  %v5462_v43 = vadd.f32 %v5393_v63, %v5296_v52 }
 0x12c   :  { %v4238_v45 = vpop.eup %4237  ;;  %v1185_v26 = vadd.f32 %v1103_v57, %v1093_v32  ;;  %4259 = vpow2.f32 %v856_v42 }
 0x12d   :  { %v4240_v37 = vpop.eup %4239  ;;  %v1104_v60 = vmul.f32 %v4238_v45, %v5319_v4  ;;  %4261 = vpow2.f32 %v854_v17  ;;  %v892_v4 = vmul.f32 1.442695, %v752_v35  ;;  %v5465_v62 = vpop.f32.mrb[20].mxu0 }
 0x12e   :  { %v4242_v7 = vpop.eup %4241  ;;  %v1105_v3 = vmul.f32 %v4240_v37, %v5327_v9  ;;  %4263 = vpow2.f32 %v858_v14  ;;  %v5467_v9 = vpop.f32.mrb[20].mxu1 }
 0x12f   :  { %v4244_v40 = vpop.eup %4243  ;;  %v1198_v8 = vadd.f32 %v1104_v60, %v1094_v33  ;;  %v1112_v5 = vmul.f32 %v4242_v7, %v5334_v23  ;;  %4265 = vpow2.f32 %v872_v18  ;;  %v896_v23 = vmul.f32 1.442695, %v754_v38  ;;  %v5470_v42 = vpop.f32.mrb[21].mxu0 }
 0x130   :  { %v4246_v58 = vpop.eup %4245  ;;  %v1211_v21 = vadd.f32 %v1105_v3, %v1095_v10  ;;  %v1114_v45 = vmul.f32 %v4244_v40, %v5337_v24  ;;  %4267 = vpow2.f32 %v876_v49  ;;  %v5472_v63 = vpop.f32.mrb[21].mxu1  ;;  %v5479_v18 = vadd.f32 %v5395_v0, %v5299_v53 }
 0x131   :  { %v4248_v11 = vpop.eup %4247  ;;  %v1173_v37 = vadd.f32 %v1172_v54, %v1112_v5  ;;  %v1113_v33 = vmul.f32 %v4246_v58, %v5340_v28  ;;  %4269 = vpow2.f32 %v874_v61  ;;  %v5481_v16 = vpop.f32.mrb[22].mxu0  ;;  %v7075_v54 = vsub.s32 7, %v5274_v44 }
 0x132   :  { %v4250_v17 = vpop.eup %4249  ;;  %v5474_v14 = vadd.f32 %v1198_v8, %v1114_v45  ;;  %v1115_v24 = vmul.f32 %v4248_v11, %v5343_v29  ;;  %v5483_v32 = vpop.f32.mrb[22].mxu1  ;;  %4271 = vpow2.f32 %v878_v39  ;;  %v755_v40 = vsub.f32 0.0, %v5479_v18 }
 0x133   :  { %v4252_v28 = vpop.eup %4251  ;;  %v5485_v38 = vadd.f32 %v1185_v26, %v1113_v33  ;;  %v1122_v49 = vmul.f32 %v4250_v17, %v5348_v34  ;;  %v5491_v57 = vrot.slane %v5281_v47, %v7075_v54  ;;  %v5493_v29 = vpop.f32.mrb[23].mxu0  ;;  %4273 = vpow2.f32 %v892_v4 }
 0x134   :  { %v5495_v61 = vpop.f32.mrb[23].mxu1  ;;  %v4254_v0 = vpop.eup %4253  ;;  %v5497_v35 = vadd.f32 %v1211_v21, %v1115_v24  ;;  %v964_v60 = vadd.f32 1.0, %v4252_v28  ;;  %v753_v26 = vsub.f32 0.0, %v5462_v43  ;;  %4275 = vpow2.f32 %v896_v23 }
 0x135   :  { %7076 = vst [vmem:[#allocation24_spill] sm:$0xff] %v5491_v57  ;;  %v4256_v7 = vpop.eup %4255  ;;  %v5500_v10 = vadd.f32 %v1173_v37, %v1122_v49  ;;  %v963_v34 = vadd.f32 1.0, %v4254_v0  ;;  %v5504_v47 = vadd.f32 %v5401_v12, %v5288_v50  ;;  %v5509_v8 = vadd.f32 %v5403_v13, %v5291_v51  ;;  %v5525_v37 = vpop.f32.mrb[24].mxu0 }
 0x136   :  { %v4258_v3 = vpop.eup %4257  ;;  %4277 = vrcp.f32 %v964_v60  ;;  %v965_v39 = vadd.f32 1.0, %v4256_v7  ;;  %v5513_v21 = vadd.f32 %v5407_v22, %v5296_v52  ;;  %v5517_v12 = vadd.f32 %v5409_v25, %v5299_v53  ;;  %v5527_v33 = vpop.f32.mrb[24].mxu1 }
 0x137   :  { %v4260_v5 = vpop.eup %4259  ;;  %4279 = vrcp.f32 %v963_v34  ;;  %v972_v58 = vadd.f32 1.0, %v4258_v3  ;;  %v5519_v11 = vmul.f32 1.442695, %v753_v26  ;;  %v5523_v13 = vadd.f32 %v5426_v31, %v5364_v15  ;;  %v5534_v24 = vpop.f32.mrb[25].mxu0 }
 0x138   :  { %v4262_v45 = vpop.eup %4261  ;;  %4281 = vrcp.f32 %v965_v39  ;;  %v974_v4 = vadd.f32 1.0, %v4260_v5  ;;  %v762_v17 = vsub.f32 0.0, %v5504_v47  ;;  %v5532_v25 = vadd.f32 %v5433_v19, %v5441_v6  ;;  %v5536_v28 = vpop.f32.mrb[25].mxu1 }
 0x139   :  { %v4264_v23 = vpop.eup %4263  ;;  %4283 = vrcp.f32 %v972_v58  ;;  %v973_v22 = vadd.f32 1.0, %v4262_v45  ;;  %v898_v54 = vmul.f32 1.442695, %v755_v40  ;;  %v764_v0 = vsub.f32 0.0, %v5509_v8  ;;  %v5539_v60 = vpop.f32.mrb[26].mxu0 }
 0x13a   :  { %v4266_v49 = vpop.eup %4265  ;;  %4285 = vrcp.f32 %v974_v4  ;;  %v975_v31 = vadd.f32 1.0, %v4264_v23  ;;  %v5541_v26 = vpop.f32.mrb[26].mxu1  ;;  %v763_v19 = vsub.f32 0.0, %v5513_v21  ;;  %v765_v3 = vsub.f32 0.0, %v5517_v12 }
 0x13b   :  { %7077 = vst [vmem:[#allocation25_spill] sm:$0xff] %v5541_v26  ;;  %v4268_v7 = vpop.eup %4267  ;;  %4287 = vrcp.f32 %v973_v22  ;;  %v982_v34 = vadd.f32 1.0, %v4266_v49  ;;  %v5545_v39 = vpop.f32.mrb[27].mxu0  ;;  %v696_v45 = vsub.f32 0.0, %v5523_v13  ;;  %v5552_v4 = vadd.f32 %v5443_v56, %v5364_v15 }
 0x13c   :  { %7078 = vst [vmem:[#allocation26_spill] sm:$0xff] %v5545_v39  ;;  %v5547_v5 = vpop.f32.mrb[27].mxu1  ;;  %v4270_v58 = vpop.eup %4269  ;;  %4289 = vrcp.f32 %v975_v31  ;;  %v984_v40 = vadd.f32 1.0, %v4268_v7  ;;  %v912_v49 = vmul.f32 1.442695, %v762_v17  ;;  %v697_v53 = vsub.f32 0.0, %v5532_v25 }
 0x13d   :  { %7079 = vst [vmem:[#allocation27_spill] sm:$0xff] %v5547_v5  ;;  %v4272_v23 = vpop.eup %4271  ;;  %4291 = vrcp.f32 %v982_v34  ;;  %v983_v22 = vadd.f32 1.0, %v4270_v58  ;;  %v916_v50 = vmul.f32 1.442695, %v764_v0  ;;  %v5557_v31 = vadd.f32 %v5428_v36, %v5375_v27  ;;  %v5560_v44 = vpop.f32.mrb[28].mxu0 }
 0x13e   :  { %v4274_v51 = vpop.eup %4273  ;;  %4293 = vrcp.f32 %v984_v40  ;;  %v985_v52 = vadd.f32 1.0, %v4272_v23  ;;  %v914_v39 = vmul.f32 1.442695, %v763_v19  ;;  %v918_v56 = vmul.f32 1.442695, %v765_v3  ;;  %7080 = vst [vmem:[#allocation28_spill] sm:$0xff] %v5560_v44 }
 0x13f   :  { %v4276_v7 = vpop.eup %4275  ;;  %4295 = vrcp.f32 %v983_v22  ;;  %v992_v5 = vadd.f32 1.0, %v4274_v51  ;;  %v780_v58 = vmul.f32 1.442695, %v696_v45  ;;  %v706_v17 = vsub.f32 0.0, %v5552_v4  ;;  %v5562_v40 = vpop.f32.mrb[28].mxu1 }
 0x140   :  { %v4278_v26 = vpop.eup %4277  ;;  %4297 = vrcp.f32 %v985_v52  ;;  %v994_v34 = vadd.f32 1.0, %v4276_v7  ;;  %7081 = vst [vmem:[#allocation29_spill] sm:$0xff] %v5562_v40  ;;  %v782_v36 = vmul.f32 1.442695, %v697_v53  ;;  %v5567_v51 = vadd.f32 %v5449_v41, %v5441_v6  ;;  %v5569_v19 = vpop.f32.mrb[29].mxu0  ;;  %v7090_v40 = vld [vmem:[#allocation18_spill] sm:$0xff] }
 0x141   :  { %v4280_v0 = vpop.eup %4279  ;;  %v1124_v23 = vmul.f32 %v4278_v26, %v5354_v46  ;;  %4299 = vrcp.f32 %v992_v5  ;;  %7082 = vst [vmem:[#allocation30_spill] sm:$0xff] %v5569_v19  ;;  %v5571_v52 = vpop.f32.mrb[29].mxu1  ;;  %v698_v22 = vsub.f32 0.0, %v5557_v31  ;;  %v5577_v7 = vadd.f32 %v5435_v2, %v5491_v57 }
 0x142   :  { %7083 = vst [vmem:[#allocation31_spill] sm:$0xff] %v5571_v52  ;;  %v4282_v3 = vpop.eup %4281  ;;  %v1123_v45 = vmul.f32 %v4280_v0, %v5358_v55  ;;  %4301 = vrcp.f32 %v994_v34  ;;  %v5579_v46 = vpop.f32.mrb[30].mxu0  ;;  %v5588_v55 = vadd.f32 %v5445_v1, %v5375_v27  ;;  %v7088_v52 = vld [vmem:[#allocation15_spill] sm:$0xff]  ;;  %v800_v19 = vmul.f32 1.442695, %v706_v17 }
 0x143   :  { %7084 = vst [vmem:[#allocation32_spill] sm:$0xff] %v5579_v46  ;;  %v5581_v53 = vpop.f32.mrb[30].mxu1  ;;  %v4284_v41 = vpop.eup %4283  ;;  %v1200_v26 = vadd.f32 %v5474_v14, %v1124_v23  ;;  %v1125_v5 = vmul.f32 %v4282_v3, %v5369_v20  ;;  %4303 = vpow2.f32 %v5519_v11  ;;  %v7089_v23 = vld [vmem:[#allocation17_spill] sm:$0xff]  ;;  %v707_v1 = vsub.f32 0.0, %v5567_v51 }
 0x144   :  { %7085 = vst [vmem:[#allocation33_spill] sm:$0xff] %v5581_v53  ;;  %v5590_v34 = vpop.f32.mrb[31].mxu0  ;;  %v5592_v0 = vpop.f32.mrb[31].mxu1  ;;  %v1187_v46 = vadd.f32 %v5485_v38, %v1123_v45  ;;  %v1132_v53 = vmul.f32 %v4284_v41, %v7088_v52  ;;  %4305 = vpow2.f32 %v898_v54  ;;  %v699_v38 = vsub.f32 0.0, %v5577_v7  ;;  %v7091_v54 = vld [vmem:[#allocation19_spill] sm:$0xff] }
 0x145   :  { %7086 = vst [vmem:[#allocation34_spill] sm:$0xff] %v5590_v34  ;;  %7087 = vst [vmem:[#allocation35_spill] sm:$0xff] %v5592_v0  ;;  %v4286_v2 = vpop.eup %4285  ;;  %v1213_v20 = vadd.f32 %v5497_v35, %v1125_v5  ;;  %4307 = vpow2.f32 %v912_v49  ;;  %v708_v35 = vsub.f32 0.0, %v5588_v55  ;;  %v7092_v49 = vld [vmem:[#allocation20_spill] sm:$0xff]  ;;  %v5605_v44 = vpop.f32.mrb[32].mxu0 }
 0x146   :  { %v4288_v14 = vpop.eup %4287  ;;  %v1134_v11 = vmul.f32 %v4286_v2, %v7089_v23  ;;  %v1175_v34 = vadd.f32 %v5500_v10, %v1132_v53  ;;  %4309 = vpow2.f32 %v916_v50  ;;  %v784_v23 = vmul.f32 1.442695, %v698_v22  ;;  %v5607_v10 = vpop.f32.mrb[32].mxu1  ;;  %v7093_v53 = vld [vmem:[#allocation21_spill] sm:$0xff] }
 0x147   :  { %v4290_v3 = vpop.eup %4289  ;;  %v1133_v0 = vmul.f32 %v4288_v14, %v7090_v40  ;;  %4311 = vpow2.f32 %v914_v39  ;;  %v5612_v39 = vpop.f32.mrb[33].mxu1 }
 0x148   :  { %v4292_v45 = vpop.eup %4291  ;;  %v1201_v52 = vadd.f32 %v1200_v26, %v1134_v11  ;;  %v1135_v17 = vmul.f32 %v4290_v3, %v7091_v54  ;;  %4313 = vpow2.f32 %v918_v56  ;;  %v802_v26 = vmul.f32 1.442695, %v707_v1  ;;  %v5610_v11 = vpop.f32.mrb[33].mxu0  ;;  %7094 = vst [vmem:[#allocation15_spill] sm:$0xff] %v5612_v39 }
 0x149   :  { %v4294_v41 = vpop.eup %4293  ;;  %v1188_v5 = vadd.f32 %v1187_v46, %v1133_v0  ;;  %v1142_v2 = vmul.f32 %v4292_v45, %v7092_v49  ;;  %4315 = vpow2.f32 %v780_v58  ;;  %v7095_v0 = vld [vmem:[#allocation22_spill] sm:$0xff]  ;;  %v786_v56 = vmul.f32 1.442695, %v699_v38  ;;  %v5615_v22 = vpop.f32.mrb[34].mxu0 }
 0x14a   :  { %v4296_v50 = vpop.eup %4295  ;;  %v1214_v40 = vadd.f32 %v1213_v20, %v1135_v17  ;;  %v1144_v14 = vmul.f32 %v4294_v41, %v7093_v53  ;;  %4317 = vpow2.f32 %v782_v36  ;;  %v5617_v54 = vpop.f32.mrb[34].mxu1  ;;  %v7096_v17 = vld [vmem:[#allocation23_spill] sm:$0xff]  ;;  %v804_v58 = vmul.f32 1.442695, %v708_v35 }
 0x14b   :  { %v4298_v3 = vpop.eup %4297  ;;  %v1176_v46 = vadd.f32 %v1175_v34, %v1142_v2  ;;  %v1143_v45 = vmul.f32 %v4296_v50, %v7095_v0  ;;  %4319 = vpow2.f32 %v800_v19  ;;  %v5620_v1 = vpop.f32.mrb[35].mxu0 }
 0x14c   :  { %v4300_v49 = vpop.eup %4299  ;;  %v1202_v20 = vadd.f32 %v1201_v52, %v1144_v14  ;;  %v1145_v41 = vmul.f32 %v4298_v3, %v7096_v17  ;;  %v5622_v53 = vpop.f32.mrb[35].mxu1  ;;  %4321 = vpow2.f32 %v784_v23  ;;  %v5636_v23 = vadd.f32 %v5451_v48, %v5491_v57 }
 0x14d   :  { %v4302_v39 = vpop.eup %4301  ;;  %v5624_v34 = vadd.f32 %v1188_v5, %v1143_v45  ;;  %v1152_v36 = vmul.f32 %v4300_v49, %v5421_v59  ;;  %4323 = vpow2.f32 %v802_v26  ;;  %v5648_v45 = vadd.f32 %v5467_v9, %v5375_v27 }
 0x14e   :  { %v4304_v38 = vpop.eup %4303  ;;  %v5627_v2 = vadd.f32 %v1214_v40, %v1145_v41  ;;  %v1154_v50 = vmul.f32 %v4302_v39, %v5424_v30  ;;  %4325 = vpow2.f32 %v786_v56  ;;  %v5638_v40 = vpop.f32.mrb[36].mxu0  ;;  %v5656_v17 = vadd.f32 %v5470_v42, %v5441_v6 }
 0x14f   :  { %v4306_v52 = vpop.eup %4305  ;;  %v5630_v14 = vadd.f32 %v1176_v46, %v1152_v36  ;;  %v993_v19 = vadd.f32 1.0, %v4304_v38  ;;  %4327 = vpow2.f32 %v804_v58  ;;  %7097 = vst [vmem:[#allocation17_spill] sm:$0xff] %v5638_v40  ;;  %v5640_v30 = vpop.f32.mrb[36].mxu1  ;;  %v5644_v46 = vadd.f32 %v5465_v62, %v5364_v15 }
 0x150   :  { %v4308_v35 = vpop.eup %4307  ;;  %v5632_v3 = vadd.f32 %v1202_v20, %v1154_v50  ;;  %v995_v0 = vadd.f32 1.0, %v4306_v52  ;;  %7098 = vst [vmem:[#allocation18_spill] sm:$0xff] %v5640_v30  ;;  %v5650_v56 = vpop.f32.mrb[37].mxu0  ;;  %v5664_v9 = vadd.f32 %v5472_v63, %v5491_v57  ;;  %v709_v42 = vsub.f32 0.0, %v5636_v23 }
 0x151   :  { %v4310_v5 = vpop.eup %4309  ;;  %4329 = vrcp.f32 %v993_v19  ;;  %v1002_v59 = vadd.f32 1.0, %v4308_v35  ;;  %7099 = vst [vmem:[#allocation19_spill] sm:$0xff] %v5650_v56  ;;  %v5652_v49 = vpop.f32.mrb[37].mxu1  ;;  %v5673_v35 = vadd.f32 %v5481_v16, %v5364_v15  ;;  %v718_v63 = vsub.f32 0.0, %v5648_v45 }
 0x152   :  { %v4312_v26 = vpop.eup %4311  ;;  %4331 = vrcp.f32 %v995_v0  ;;  %v1004_v39 = vadd.f32 1.0, %v4310_v5  ;;  %7100 = vst [vmem:[#allocation20_spill] sm:$0xff] %v5652_v49  ;;  %v5658_v41 = vpop.f32.mrb[38].mxu0  ;;  %v5694_v49 = vadd.f32 %v5495_v61, %v5491_v57 }
 0x153   :  { %v4314_v48 = vpop.eup %4313  ;;  %4333 = vrcp.f32 %v1002_v59  ;;  %v1003_v20 = vadd.f32 1.0, %v4312_v26  ;;  %7101 = vst [vmem:[#allocation21_spill] sm:$0xff] %v5658_v41  ;;  %v5660_v58 = vpop.f32.mrb[38].mxu1  ;;  %v716_v59 = vsub.f32 0.0, %v5644_v46 }
 0x154   :  { %7102 = vst [vmem:[#allocation22_spill] sm:$0xff] %v5660_v58  ;;  %v4316_v62 = vpop.eup %4315  ;;  %4335 = vrcp.f32 %v1004_v39  ;;  %v1005_v36 = vadd.f32 1.0, %v4314_v48  ;;  %v5666_v38 = vpop.f32.mrb[39].mxu0  ;;  %v717_v48 = vsub.f32 0.0, %v5656_v17 }
 0x155   :  { %7103 = vst [vmem:[#allocation23_spill] sm:$0xff] %v5666_v38  ;;  %v5668_v50 = vpop.f32.mrb[39].mxu1  ;;  %v4318_v52 = vpop.eup %4317  ;;  %4337 = vrcp.f32 %v1003_v20  ;;  %v936_v19 = vadd.f32 1.0, %v4316_v62  ;;  %v5680_v20 = vadd.f32 %v5483_v32, %v5375_v27 }
 0x156   :  { %7104 = vst [vmem:[#allocation36_spill] sm:$0xff] %v5668_v50  ;;  %v4320_v0 = vpop.eup %4319  ;;  %4339 = vrcp.f32 %v1005_v36  ;;  %v937_v5 = vadd.f32 1.0, %v4318_v52  ;;  %v719_v50 = vsub.f32 0.0, %v5664_v9  ;;  %v5685_v36 = vadd.f32 %v5493_v29, %v5441_v6  ;;  %v5688_v58 = vpop.f32.mrb[40].mxu0 }
 0x157   :  { %v4322_v26 = vpop.eup %4321  ;;  %4341 = vrcp.f32 %v936_v19  ;;  %v946_v39 = vadd.f32 1.0, %v4320_v0  ;;  %v806_v19 = vmul.f32 1.442695, %v709_v42  ;;  %v726_v0 = vsub.f32 0.0, %v5673_v35  ;;  %7105 = vst [vmem:[#allocation37_spill] sm:$0xff] %v5688_v58  ;;  %v5690_v41 = vpop.f32.mrb[40].mxu1 }
 0x158   :  { %v4324_v62 = vpop.eup %4323  ;;  %4343 = vrcp.f32 %v937_v5  ;;  %v938_v16 = vadd.f32 1.0, %v4322_v26  ;;  %7106 = vst [vmem:[#allocation38_spill] sm:$0xff] %v5690_v41  ;;  %v820_v5 = vmul.f32 1.442695, %v716_v59  ;;  %v824_v26 = vmul.f32 1.442695, %v718_v63 }
 0x159   :  { %v4326_v52 = vpop.eup %4325  ;;  %4345 = vrcp.f32 %v946_v39  ;;  %v947_v38 = vadd.f32 1.0, %v4324_v62  ;;  %v5696_v29 = vpop.f32.mrb[41].mxu0  ;;  %v822_v62 = vmul.f32 1.442695, %v717_v48  ;;  %v728_v58 = vsub.f32 0.0, %v5680_v20 }
 0x15a   :  { %v4328_v32 = vpop.eup %4327  ;;  %4347 = vrcp.f32 %v938_v16  ;;  %7107 = vst [vmem:[#allocation39_spill] sm:$0xff] %v5696_v29  ;;  %v5698_v56 = vpop.f32.mrb[41].mxu1  ;;  %v826_v16 = vmul.f32 1.442695, %v719_v50  ;;  %v727_v61 = vsub.f32 0.0, %v5685_v36  ;;  %v729_v50 = vsub.f32 0.0, %v5694_v49 }
 0x15b   :  { %7108 = vst [vmem:[#allocation40_spill] sm:$0xff] %v5698_v56  ;;  %v4330_v39 = vpop.eup %4329  ;;  %4349 = vrcp.f32 %v947_v38  ;;  %v948_v42 = vadd.f32 1.0, %v4328_v32  ;;  %v5701_v30 = vpop.f32.mrb[42].mxu0  ;;  %v840_v48 = vmul.f32 1.442695, %v726_v0  ;;  %v5714_v32 = vadd.f32 %v5525_v37, %v5364_v15 }
 0x15c   :  { %7109 = vst [vmem:[#allocation41_spill] sm:$0xff] %v5701_v30  ;;  %v5703_v41 = vpop.f32.mrb[42].mxu1  ;;  %v4332_v59 = vpop.eup %4331  ;;  %v1153_v63 = vmul.f32 %v4330_v39, %v5462_v43 }
 0x15d   :  { %7110 = vst [vmem:[#allocation42_spill] sm:$0xff] %v5703_v41  ;;  %v5707_v40 = vpop.f32.mrb[43].mxu0  ;;  %v5709_v29 = vpop.f32.mrb[43].mxu1  ;;  %v1155_v38 = vmul.f32 %v4332_v59, %v5479_v18  ;;  %4351 = vrcp.f32 %v948_v42  ;;  %v844_v18 = vmul.f32 1.442695, %v728_v58 }
 0x15e   :  { %7111 = vst [vmem:[#allocation43_spill] sm:$0xff] %v5707_v40  ;;  %7112 = vst [vmem:[#allocation44_spill] sm:$0xff] %v5709_v29  ;;  %v4334_v56 = vpop.eup %4333  ;;  %v1190_v30 = vadd.f32 %v5624_v34, %v1153_v63  ;;  %4353 = vpow2.f32 %v806_v19  ;;  %v842_v34 = vmul.f32 1.442695, %v727_v61  ;;  %v939_v19 = vadd.f32 1.0, %v4326_v52 }
 0x15f   :  { %v4336_v41 = vpop.eup %4335  ;;  %v1162_v43 = vmul.f32 %v4334_v56, %v5504_v47  ;;  %v1216_v29 = vadd.f32 %v5627_v2, %v1155_v38  ;;  %4355 = vpow2.f32 %v820_v5  ;;  %v736_v2 = vsub.f32 0.0, %v5714_v32  ;;  %v109_v61 = vld [vmem:[%s7017_s3 + $0x8] sm:$0x3] }
 0x160   :  { %v4338_v39 = vpop.eup %4337  ;;  %v1164_v40 = vmul.f32 %v4336_v41, %v5509_v8  ;;  %4357 = vpow2.f32 %v824_v26  ;;  %v5730_v8 = vpop.f32.mrb[44].mxu0  ;;  %v5744_v26 = vadd.f32 %v5527_v33, %v5375_v27 }
 0x161   :  { %v4340_v0 = vpop.eup %4339  ;;  %v5722_v42 = vadd.f32 %v5630_v14, %v1162_v43  ;;  %v1163_v37 = vmul.f32 %v4338_v39, %v5513_v21  ;;  %4359 = vpow2.f32 %v822_v62  ;;  %7113 = vst [vmem:[#allocation45_spill] sm:$0xff] %v5730_v8  ;;  %v5732_v41 = vpop.f32.mrb[44].mxu1  ;;  %v860_v43 = vmul.f32 1.442695, %v736_v2 }
 0x162   :  { %v4342_v59 = vpop.eup %4341  ;;  %v5726_v47 = vadd.f32 %v5632_v3, %v1164_v40  ;;  %v1165_v56 = vmul.f32 %v4340_v0, %v5517_v12  ;;  %7114 = vst [vmem:[#allocation46_spill] sm:$0xff] %v5732_v41  ;;  %4361 = vpow2.f32 %v826_v16  ;;  %v5736_v21 = vpop.f32.mrb[45].mxu0  ;;  %v846_v12 = vmul.f32 1.442695, %v729_v50 }
 0x163   :  { %v4344_v58 = vpop.eup %4343  ;;  %v5734_v14 = vadd.f32 %v1190_v30, %v1163_v37  ;;  %7115 = vst [vmem:[#allocation47_spill] sm:$0xff] %v5736_v21  ;;  %v5738_v5 = vpop.f32.mrb[45].mxu1  ;;  %4363 = vpow2.f32 %v840_v48  ;;  %v1096_v52 = vmul.f32 %v4342_v59, %v5523_v13  ;;  %v5765_v13 = vadd.f32 %v5536_v28, %v5491_v57  ;;  %v7122_v37 = vld [vmem:[#allocation10_spill] sm:$0xff] }
 0x164   :  { %7116 = vst [vmem:[#allocation48_spill] sm:$0xff] %v5738_v5  ;;  %v4346_v3 = vpop.eup %4345  ;;  %v5740_v40 = vadd.f32 %v1216_v29, %v1165_v56  ;;  %v5746_v62 = vpop.f32.mrb[46].mxu0  ;;  %4365 = vpow2.f32 %v844_v18  ;;  %v5754_v29 = vadd.f32 %v5534_v24, %v5441_v6  ;;  %v1097_v24 = vmul.f32 %v4344_v58, %v5532_v25 }
 0x165   :  { %7118 = vst [vmem:[#allocation50_spill] sm:$0xff] %v5746_v62  ;;  %v5748_v63 = vpop.f32.mrb[46].mxu1  ;;  %v4348_v30 = vpop.eup %4347  ;;  %v1106_v16 = vmul.f32 %v4346_v3, %v5552_v4  ;;  %4367 = vpow2.f32 %v842_v34  ;;  %v5769_v4 = vadd.f32 %v5539_v60, %v5364_v15  ;;  %v738_v0 = vsub.f32 0.0, %v5744_v26 }
 0x166   :  { %7117 = vst [vmem:[#allocation49_spill] sm:$0xff] %v5740_v40  ;;  %7119 = vst [vmem:[#allocation51_spill] sm:$0xff] %v5748_v63  ;;  %v5759_v33 = vpop.f32.mrb[47].mxu0  ;;  %v5761_v38 = vpop.f32.mrb[47].mxu1  ;;  %4369 = vrcp.f32 %v939_v19  ;;  %v7123_v34 = vsub.s32 0, %v7122_v37  ;;  %v1098_v56 = vmul.f32 %v4348_v30, %v5557_v31  ;;  %v737_v2 = vsub.f32 0.0, %v5754_v29 }
 0x167   :  { %7120 = vst [vmem:[#allocation52_spill] sm:$0xff] %v5759_v33  ;;  %7121 = vst [vmem:[#allocation53_spill] sm:$0xff] %v5761_v38  ;;  %v4350_v48 = vpop.eup %4349  ;;  %v5772_v50 = vadd.f32 %v1106_v16, %v1096_v52  ;;  %4371 = vpow2.f32 %v846_v12  ;;  %v739_v19 = vsub.f32 0.0, %v5765_v13  ;;  %v746_v3 = vsub.f32 0.0, %v5769_v4  ;;  %v5787_v12 = vpop.f32.mrb[48].mxu0  ;;  %v7126_v30 = vld [vmem:[#allocation25_spill] sm:$0xff] }
 0x168   :  { %v1107_v39 = vmul.f32 %v4350_v48, %v5567_v51  ;;  %v4352_v18 = vpop.eup %4351  ;;  %v5778_v59 = vrot.slane %v109_v61, %v7123_v34  ;;  %4373 = vpow2.f32 %v860_v43  ;;  %7124 = vst [vmem:[#allocation54_spill] sm:$0xff] %v5787_v12  ;;  %v5789_v52 = vpop.f32.mrb[48].mxu1  ;;  %v862_v38 = vmul.f32 1.442695, %v737_v2 }
 0x169   :  { %v4354_v28 = vpop.eup %4353  ;;  %v1108_v25 = vmul.f32 %v4352_v18, %v5588_v55  ;;  %7125 = vst [vmem:[#allocation55_spill] sm:$0xff] %v5789_v52  ;;  %v5795_v55 = vadd.f32 %v7126_v30, %v5375_v27  ;;  %v5801_v43 = vpop.f32.mrb[49].mxu0 }
 0x16a   :  { %v5781_v60 = vadd.f32 %v1107_v39, %v1097_v24  ;;  %v4356_v58 = vpop.eup %4355  ;;  %v949_v51 = vadd.f32 1.0, %v4354_v28  ;;  %v7127_v24 = vld [vmem:[#allocation26_spill] sm:$0xff]  ;;  %7128 = vst [vmem:[#allocation25_spill] sm:$0xff] %v5801_v43  ;;  %v5803_v18 = vpop.f32.mrb[49].mxu1  ;;  %v1179_v28 = vrot.slane %v5722_v42, 4 }
 0x16b   :  { %v4358_v16 = vpop.eup %4357  ;;  %v5791_v48 = vadd.f32 %v1108_v25, %v1098_v56  ;;  %v956_v31 = vadd.f32 1.0, %v4356_v58  ;;  %v5799_v39 = vadd.f32 %v7127_v24, %v5441_v6  ;;  %7129 = vst [vmem:[#allocation26_spill] sm:$0xff] %v5803_v18  ;;  %v864_v56 = vmul.f32 1.442695, %v738_v0  ;;  %v5806_v25 = vpop.f32.mrb[50].mxu0 }
 0x16c   :  { %v4360_v34 = vpop.eup %4359  ;;  %4375 = vrcp.f32 %v949_v51  ;;  %v958_v52 = vadd.f32 1.0, %v4358_v16  ;;  %7130 = vst [vmem:[#allocation56_spill] sm:$0xff] %v5806_v25  ;;  %v5808_v58 = vpop.f32.mrb[50].mxu1  ;;  %v7132_v24 = vsub.s32 1, %v7122_v37  ;;  %v866_v0 = vmul.f32 1.442695, %v739_v19 }
 0x16d   :  { %7131 = vst [vmem:[#allocation57_spill] sm:$0xff] %v5808_v58  ;;  %v4362_v30 = vpop.eup %4361  ;;  %4377 = vrcp.f32 %v956_v31  ;;  %v957_v12 = vadd.f32 1.0, %v4360_v34  ;;  %v5814_v43 = vpop.f32.mrb[51].mxu0  ;;  %v880_v16 = vmul.f32 1.442695, %v746_v3  ;;  %v748_v31 = vsub.f32 0.0, %v5795_v55 }
 0x16e   :  { %v5812_v33 = vrot.slane %v109_v61, %v7132_v24  ;;  %7133 = vst [vmem:[#allocation58_spill] sm:$0xff] %v5814_v43  ;;  %v5816_v18 = vpop.f32.mrb[51].mxu1  ;;  %v4364_v63 = vpop.eup %4363  ;;  %4379 = vrcp.f32 %v958_v52  ;;  %v959_v51 = vadd.f32 1.0, %v4362_v30  ;;  %v747_v2 = vsub.f32 0.0, %v5799_v39  ;;  %v7136_v19 = vld [vmem:[#allocation27_spill] sm:$0xff] }
 0x16f   :  { %7134 = vst [vmem:[#allocation59_spill] sm:$0xff] %v5816_v18  ;;  %v4366_v25 = vpop.eup %4365  ;;  %4381 = vrcp.f32 %v957_v12  ;;  %v966_v58 = vadd.f32 1.0, %v4364_v63  ;;  %v5821_v61 = vadd.f32 %v1179_v28, %v5722_v42  ;;  %v5826_v3 = vadd.f32 %v7136_v19, %v5491_v57  ;;  %v7137_v63 = vld [vmem:[#allocation28_spill] sm:$0xff]  ;;  %v7138_v42 = vld [vmem:[#allocation29_spill] sm:$0xff]  ;;  %v5844_v19 = vpop.f32.mrb[52].mxu0 }
 0x170   :  { %v4368_v34 = vpop.eup %4367  ;;  %4383 = vrcp.f32 %v959_v51  ;;  %v968_v37 = vadd.f32 1.0, %v4366_v25  ;;  %v5830_v12 = vadd.f32 %v7137_v63, %v5364_v15  ;;  %v5834_v28 = vadd.f32 %v7138_v42, %v5375_v27  ;;  %v7139_v51 = vld [vmem:[#allocation30_spill] sm:$0xff]  ;;  %7141 = vst [vmem:[#allocation27_spill] sm:$0xff] %v5844_v19  ;;  %v5846_v24 = vpop.f32.mrb[52].mxu1 }
 0x171   :  { %7135 = vst [vmem:[#allocation60_spill] sm:$0xff] %v5821_v61  ;;  %v4370_v18 = vpop.eup %4369  ;;  %4385 = vrcp.f32 %v966_v58  ;;  %v967_v52 = vadd.f32 1.0, %v4368_v34  ;;  %v5838_v25 = vadd.f32 %v7139_v51, %v5441_v6  ;;  %v7140_v58 = vld [vmem:[#allocation31_spill] sm:$0xff]  ;;  %7142 = vst [vmem:[#allocation28_spill] sm:$0xff] %v5846_v24  ;;  %v5850_v42 = vpop.f32.mrb[53].mxu0 }
 0x172   :  { %v4372_v30 = vpop.eup %4371  ;;  %4387 = vrcp.f32 %v968_v37  ;;  %v5842_v34 = vadd.f32 %v7140_v58, %v5491_v57  ;;  %v749_v37 = vsub.f32 0.0, %v5826_v3  ;;  %v756_v43 = vsub.f32 0.0, %v5830_v12  ;;  %7143 = vst [vmem:[#allocation29_spill] sm:$0xff] %v5850_v42  ;;  %v5852_v62 = vpop.f32.mrb[53].mxu1 }
 0x173   :  { %4389 = vrcp.f32 %v967_v52  ;;  %v969_v63 = vadd.f32 1.0, %v4372_v30  ;;  %7144 = vst [vmem:[#allocation30_spill] sm:$0xff] %v5852_v62  ;;  %v4374_v51 = vpop.eup %4373  ;;  %v1099_v5 = vmul.f32 %v4370_v18, %v5577_v7  ;;  %v758_v58 = vsub.f32 0.0, %v5834_v28  ;;  %v5857_v21 = vpop.f32.mrb[54].mxu0 }
 0x174   :  { %4391 = vpow2.f32 %v864_v56  ;;  %v757_v19 = vsub.f32 0.0, %v5838_v25  ;;  %7145 = vst [vmem:[#allocation31_spill] sm:$0xff] %v5857_v21  ;;  %v5859_v52 = vpop.f32.mrb[54].mxu1  ;;  %v976_v30 = vadd.f32 1.0, %v4374_v51  ;;  %v884_v24 = vmul.f32 1.442695, %v748_v31 }
 0x175   :  { %7146 = vst [vmem:[#allocation61_spill] sm:$0xff] %v5859_v52  ;;  %4393 = vrcp.f32 %v969_v63  ;;  %v759_v41 = vsub.f32 0.0, %v5842_v34  ;;  %v5862_v42 = vpop.f32.mrb[55].mxu0  ;;  %v882_v8 = vmul.f32 1.442695, %v747_v2  ;;  %v7148_v21 = vld [vmem:[#allocation32_spill] sm:$0xff] }
 0x176   :  { %7147 = vst [vmem:[#allocation62_spill] sm:$0xff] %v5862_v42  ;;  %v4376_v62 = vpop.eup %4375  ;;  %4395 = vpow2.f32 %v862_v38  ;;  %v886_v7 = vmul.f32 1.442695, %v749_v37  ;;  %v900_v18 = vmul.f32 1.442695, %v756_v43  ;;  %v5867_v40 = vadd.f32 %v7148_v21, %v5364_v15  ;;  %v7149_v63 = vld [vmem:[#allocation33_spill] sm:$0xff] }
 0x177   :  { %v4378_v56 = vpop.eup %4377  ;;  %v1109_v61 = vmul.f32 %v4376_v62, %v5636_v23  ;;  %4397 = vrcp.f32 %v976_v30  ;;  %v5871_v31 = vadd.f32 %v7149_v63, %v5375_v27  ;;  %v5873_v51 = vpop.f32.mrb[55].mxu1  ;;  %v904_v2 = vmul.f32 1.442695, %v758_v58 }
 0x178   :  { %7150 = vst [vmem:[#allocation32_spill] sm:$0xff] %v5873_v51  ;;  %v4380_v42 = vpop.eup %4379  ;;  %v1116_v38 = vmul.f32 %v4378_v56, %v5644_v46  ;;  %4399 = vpow2.f32 %v866_v0  ;;  %v902_v43 = vmul.f32 1.442695, %v757_v19  ;;  %v906_v62 = vmul.f32 1.442695, %v759_v41  ;;  %v5880_v51 = vpop.f32.mrb[56].mxu0 }
 0x179   :  { %v4382_v37 = vpop.eup %4381  ;;  %v1263_v52 = vadd.f32 %v1109_v61, %v1099_v5  ;;  %v1118_v23 = vmul.f32 %v4380_v42, %v5648_v45  ;;  %4401 = vpow2.f32 %v880_v16  ;;  %v766_v27 = vsub.f32 0.0, %v5867_v40  ;;  %v5882_v46 = vpop.f32.mrb[56].mxu1 }
 0x17a   :  { %v4384_v21 = vpop.eup %4383  ;;  %v1225_v30 = vadd.f32 %v5772_v50, %v1116_v38  ;;  %v1117_v63 = vmul.f32 %v4382_v37, %v5656_v17  ;;  %4403 = vpow2.f32 %v884_v24  ;;  %v768_v45 = vsub.f32 0.0, %v5871_v31  ;;  %v5887_v41 = vpop.f32.mrb[57].mxu0  ;;  %v7151_v24 = vld [vmem:[#allocation34_spill] sm:$0xff]  ;;  %v7154_v38 = vld [vmem:[#allocation35_spill] sm:$0xff] }
 0x17b   :  { %v4386_v0 = vpop.eup %4385  ;;  %v1251_v19 = vadd.f32 %v5791_v48, %v1118_v23  ;;  %v1119_v5 = vmul.f32 %v4384_v21, %v5664_v9  ;;  %4405 = vpow2.f32 %v882_v8  ;;  %v5889_v50 = vpop.f32.mrb[57].mxu1  ;;  %v5895_v42 = vadd.f32 %v7151_v24, %v5441_v6 }
 0x17c   :  { %v4388_v17 = vpop.eup %4387  ;;  %v1238_v16 = vadd.f32 %v5781_v60, %v1117_v63  ;;  %v1126_v61 = vmul.f32 %v4386_v0, %v5673_v35  ;;  %4407 = vpow2.f32 %v886_v7  ;;  %v5897_v48 = vpop.f32.mrb[58].mxu0  ;;  %v5904_v37 = vadd.f32 %v7154_v38, %v5491_v57 }
 0x17d   :  { %7152 = vst [vmem:[#allocation33_spill] sm:$0xff] %v5897_v48  ;;  %v5899_v9 = vpop.f32.mrb[58].mxu1  ;;  %v4390_v8 = vpop.eup %4389  ;;  %v1264_v58 = vadd.f32 %v1263_v52, %v1119_v5  ;;  %v1128_v56 = vmul.f32 %v4388_v17, %v5680_v20  ;;  %4409 = vpow2.f32 %v900_v18  ;;  %v920_v63 = vmul.f32 1.442695, %v766_v27 }
 0x17e   :  { %7153 = vst [vmem:[#allocation34_spill] sm:$0xff] %v5899_v9  ;;  %v5906_v60 = vpop.f32.mrb[59].mxu0  ;;  %v5908_v35 = vpop.f32.mrb[59].mxu1  ;;  %v1226_v23 = vadd.f32 %v1225_v30, %v1126_v61  ;;  %v1127_v21 = vmul.f32 %v4390_v8, %v5685_v36  ;;  %4411 = vpow2.f32 %v904_v2  ;;  %v924_v20 = vmul.f32 1.442695, %v768_v45 }
 0x17f   :  { %7155 = vst [vmem:[#allocation35_spill] sm:$0xff] %v5906_v60  ;;  %7156 = vst [vmem:[#allocation63_spill] sm:$0xff] %v5908_v35  ;;  %v4392_v7 = vpop.eup %4391  ;;  %v5911_v24 = vadd.f32 %v1251_v19, %v1128_v56  ;;  %4413 = vpow2.f32 %v902_v43  ;;  %v767_v38 = vsub.f32 0.0, %v5895_v42  ;;  %v5919_v27 = vadd.f32 %v5605_v44, %v5778_v59  ;;  %v5934_v45 = vpop.f32.mrb[60].mxu1  ;;  %v7165_v60 = vld [vmem:[#allocation18_spill] sm:$0xff] }
 0x180   :  { %v4394_v0 = vpop.eup %4393  ;;  %v978_v52 = vadd.f32 1.0, %v4392_v7  ;;  %v5913_v5 = vadd.f32 %v1238_v16, %v1127_v21  ;;  %4415 = vpow2.f32 %v906_v62  ;;  %v5923_v36 = vadd.f32 %v5610_v11, %v5812_v33  ;;  %v5932_v62 = vpop.f32.mrb[60].mxu0  ;;  %7158 = vst [vmem:[#allocation65_spill] sm:$0xff] %v5934_v45 }
 0x181   :  { %v4396_v18 = vpop.eup %4395  ;;  %v1129_v17 = vmul.f32 %v4394_v0, %v5694_v49  ;;  %v5930_v49 = vadd.f32 %v5615_v22, %v5778_v59  ;;  %7157 = vst [vmem:[#allocation64_spill] sm:$0xff] %v5932_v62  ;;  %v769_v61 = vsub.f32 0.0, %v5904_v37  ;;  %v5938_v8 = vpop.f32.mrb[61].mxu0  ;;  %v922_v22 = vmul.f32 1.442695, %v767_v38 }
 0x182   :  { %v4398_v57 = vpop.eup %4397  ;;  %4417 = vrcp.f32 %v978_v52  ;;  %v977_v30 = vadd.f32 1.0, %v4396_v18  ;;  %7159 = vst [vmem:[#allocation66_spill] sm:$0xff] %v5938_v8  ;;  %v700_v21 = vsub.f32 0.0, %v5919_v27  ;;  %v5951_v38 = vadd.f32 %v5620_v1, %v5812_v33  ;;  %v5963_v62 = vpop.f32.mrb[61].mxu1 }
 0x183   :  { %v4400_v2 = vpop.eup %4399  ;;  %v5925_v43 = vadd.f32 %v1264_v58, %v1129_v17  ;;  %v1136_v19 = vmul.f32 %v4398_v57, %v5714_v32  ;;  %4419 = vpow2.f32 %v920_v63  ;;  %v701_v63 = vsub.f32 0.0, %v5923_v36  ;;  %v7160_v17 = vld [vmem:[#allocation11_spill] sm:$0xff] }
 0x184   :  { %v4402_v44 = vpop.eup %4401  ;;  %4421 = vrcp.f32 %v977_v30  ;;  %v979_v11 = vadd.f32 1.0, %v4400_v2  ;;  %v710_v18 = vsub.f32 0.0, %v5930_v49  ;;  %v5947_v30 = vadd.f32 %v5607_v10, %v7160_v17  ;;  %v7161_v2 = vld [vmem:[#allocation13_spill] sm:$0xff]  ;;  %7163 = vst [vmem:[#allocation11_spill] sm:$0xff] %v5963_v62 }
 0x185   :  { %v4404_v58 = vpop.eup %4403  ;;  %v5940_v57 = vadd.f32 %v1226_v23, %v1136_v19  ;;  %v986_v32 = vadd.f32 1.0, %v4402_v44  ;;  %4423 = vpow2.f32 %v924_v20  ;;  %v7162_v19 = vld [vmem:[#allocation15_spill] sm:$0xff]  ;;  %v788_v8 = vmul.f32 1.442695, %v700_v21 }
 0x186   :  { %v4406_v56 = vpop.eup %4405  ;;  %4425 = vrcp.f32 %v979_v11  ;;  %v988_v7 = vadd.f32 1.0, %v4404_v58  ;;  %v5955_v44 = vadd.f32 %v7162_v19, %v7161_v2  ;;  %v790_v45 = vmul.f32 1.442695, %v701_v63 }
 0x187   :  { %v4408_v0 = vpop.eup %4407  ;;  %4427 = vrcp.f32 %v986_v32  ;;  %v987_v52 = vadd.f32 1.0, %v4406_v56  ;;  %v926_v32 = vmul.f32 1.442695, %v769_v61  ;;  %v1708_v56 = vsub.f32 0.0, %v5947_v30 }
 0x188   :  { %v4410_v23 = vpop.eup %4409  ;;  %4429 = vrcp.f32 %v988_v7  ;;  %v989_v20 = vadd.f32 1.0, %v4408_v0  ;;  %v5960_v7 = vadd.f32 %v5617_v54, %v7160_v17  ;;  %v711_v19 = vsub.f32 0.0, %v5951_v38 }
 0x189   :  { %v4412_v11 = vpop.eup %4411  ;;  %4431 = vrcp.f32 %v987_v52  ;;  %v996_v58 = vadd.f32 1.0, %v4410_v23  ;;  %v808_v23 = vmul.f32 1.442695, %v710_v18  ;;  %v1788_v54 = vmul.f32 1.442695, %v1708_v56 }
 0x18a   :  { %v4414_v16 = vpop.eup %4413  ;;  %4433 = vrcp.f32 %v989_v20  ;;  %v998_v10 = vadd.f32 1.0, %v4412_v11  ;;  %v1709_v20 = vsub.f32 0.0, %v5955_v44  ;;  %v1718_v62 = vsub.f32 0.0, %v5960_v7 }
 0x18b   :  { %v4416_v1 = vpop.eup %4415  ;;  %4435 = vrcp.f32 %v996_v58  ;;  %v997_v0 = vadd.f32 1.0, %v4414_v16  ;;  %v5969_v58 = vadd.f32 %v5622_v53, %v7161_v2  ;;  %v810_v56 = vmul.f32 1.442695, %v711_v19  ;;  %v5980_v53 = vpop.f32.mrb[62].mxu1 }
 0x18c   :  { %v4418_v52 = vpop.eup %4417  ;;  %4437 = vrcp.f32 %v998_v10  ;;  %v999_v61 = vadd.f32 1.0, %v4416_v1  ;;  %v7164_v10 = vld [vmem:[#allocation17_spill] sm:$0xff]  ;;  %v5984_v9 = vadd.f32 %v7165_v60, %v7160_v17  ;;  %v5991_v19 = vpop.f32.mrb[63].mxu1 }
 0x18d   :  { %v4420_v11 = vpop.eup %4419  ;;  %v1138_v21 = vmul.f32 %v4418_v52, %v5744_v26  ;;  %4439 = vrcp.f32 %v997_v0  ;;  %v5974_v1 = vadd.f32 %v7164_v10, %v5778_v59  ;;  %v5978_v0 = vpop.f32.mrb[62].mxu0  ;;  %7167 = vst [vmem:[#allocation15_spill] sm:$0xff] %v5991_v19 }
 0x18e   :  { %v4422_v16 = vpop.eup %4421  ;;  %4441 = vrcp.f32 %v999_v61  ;;  %v1006_v63 = vadd.f32 1.0, %v4420_v11  ;;  %v1790_v11 = vmul.f32 1.442695, %v1709_v20  ;;  %v1808_v20 = vmul.f32 1.442695, %v1718_v62 }
 0x18f   :  { %v4424_v18 = vpop.eup %4423  ;;  %v1253_v35 = vadd.f32 %v5911_v24, %v1138_v21  ;;  %v1137_v26 = vmul.f32 %v4422_v16, %v5754_v29  ;;  %4443 = vpow2.f32 %v922_v22  ;;  %v1719_v29 = vsub.f32 0.0, %v5969_v58  ;;  %v5989_v22 = vpop.f32.mrb[63].mxu0 }
 0x190   :  { %v4426_v52 = vpop.eup %4425  ;;  %4445 = vrcp.f32 %v1006_v63  ;;  %v1008_v61 = vadd.f32 1.0, %v4424_v18  ;;  %7166 = vst [vmem:[#allocation13_spill] sm:$0xff] %v5989_v22  ;;  %v720_v60 = vsub.f32 0.0, %v5974_v1 }
 0x191   :  { %v4428_v10 = vpop.eup %4427  ;;  %v1240_v48 = vadd.f32 %v5913_v5, %v1137_v26  ;;  %v1139_v24 = vmul.f32 %v4426_v52, %v5765_v13  ;;  %4447 = vpow2.f32 %v926_v32  ;;  %v7168_v13 = vld [vmem:[#allocation19_spill] sm:$0xff] }
 0x192   :  { %v4430_v21 = vpop.eup %4429  ;;  %v1146_v16 = vmul.f32 %v4428_v10, %v5769_v4  ;;  %4449 = vrcp.f32 %v1008_v61  ;;  %v5999_v32 = vadd.f32 %v7168_v13, %v5812_v33  ;;  %v1728_v4 = vsub.f32 0.0, %v5984_v9 }
 0x193   :  { %v4432_v63 = vpop.eup %4431  ;;  %v1266_v18 = vadd.f32 %v5925_v43, %v1139_v24  ;;  %v1148_v5 = vmul.f32 %v4430_v21, %v5795_v55  ;;  %4451 = vpow2.f32 %v788_v8  ;;  %v1810_v43 = vmul.f32 1.442695, %v1719_v29 }
 0x194   :  { %v4434_v26 = vpop.eup %4433  ;;  %v1228_v52 = vadd.f32 %v5940_v57, %v1146_v16  ;;  %v1147_v19 = vmul.f32 %v4432_v63, %v5799_v39  ;;  %4453 = vpow2.f32 %v790_v45  ;;  %v828_v21 = vmul.f32 1.442695, %v720_v60  ;;  %v6008_v45 = vpop.f32.mrb[64].mxu0 }
 0x195   :  { %v4436_v62 = vpop.eup %4435  ;;  %v1254_v61 = vadd.f32 %v1253_v35, %v1148_v5  ;;  %v1149_v10 = vmul.f32 %v4434_v26, %v5826_v3  ;;  %4455 = vpow2.f32 %v808_v23  ;;  %v721_v39 = vsub.f32 0.0, %v5999_v32  ;;  %v6010_v35 = vpop.f32.mrb[64].mxu1  ;;  %v7172_v5 = vld [vmem:[#allocation49_spill] sm:$0xff] }
 0x196   :  { %v4438_v55 = vpop.eup %4437  ;;  %v1241_v8 = vadd.f32 %v1240_v48, %v1147_v19  ;;  %v1156_v24 = vmul.f32 %v4436_v62, %v5830_v12  ;;  %4457 = vpow2.f32 %v1788_v54  ;;  %7169 = vst [vmem:[#allocation17_spill] sm:$0xff] %v6010_v35  ;;  %v7170_v23 = vrot.slane %v5726_v47, 4  ;;  %v6016_v54 = vpop.f32.mrb[65].mxu0 }
 0x197   :  { %v4440_v13 = vpop.eup %4439  ;;  %v1267_v22 = vadd.f32 %v1266_v18, %v1149_v10  ;;  %v1158_v57 = vmul.f32 %v4438_v55, %v5834_v28  ;;  %4459 = vpow2.f32 %v810_v56  ;;  %v6018_v19 = vpop.f32.mrb[65].mxu1  ;;  %v1828_v60 = vmul.f32 1.442695, %v1728_v4  ;;  %v7176_v55 = vld [vmem:[#allocation60_spill] sm:$0xff] }
 0x198   :  { %v4442_v3 = vpop.eup %4441  ;;  %v1206_v48 = vadd.f32 %v7170_v23, %v5726_v47  ;;  %v1229_v29 = vadd.f32 %v1228_v52, %v1156_v24  ;;  %v1157_v12 = vmul.f32 %v4440_v13, %v5838_v25  ;;  %4461 = vpow2.f32 %v1790_v11  ;;  %7171 = vst [vmem:[#allocation18_spill] sm:$0xff] %v6018_v19  ;;  %v6021_v63 = vpop.f32.mrb[66].mxu0 }
 0x199   :  { %v4444_v28 = vpop.eup %4443  ;;  %v1255_v56 = vadd.f32 %v1254_v61, %v1158_v57  ;;  %v1159_v16 = vmul.f32 %v4442_v3, %v5842_v34  ;;  %4463 = vpow2.f32 %v1808_v20  ;;  %v1218_v26 = vrot.slane %v7172_v5, 4  ;;  %v6026_v25 = vpop.f32.mrb[67].mxu0 }
 0x19a   :  { %v4446_v18 = vpop.eup %4445  ;;  %v6024_v47 = vadd.f32 %v1241_v8, %v1157_v12  ;;  %v1007_v52 = vadd.f32 1.0, %v4444_v28  ;;  %4465 = vpow2.f32 %v1810_v43  ;;  %7173 = vst [vmem:[#allocation19_spill] sm:$0xff] %v6026_v25  ;;  %v6028_v11 = vpop.f32.mrb[66].mxu1  ;;  %v830_v20 = vmul.f32 1.442695, %v721_v39 }
 0x19b   :  { %7174 = vst [vmem:[#allocation49_spill] sm:$0xff] %v6028_v11  ;;  %v4448_v62 = vpop.eup %4447  ;;  %v6030_v10 = vadd.f32 %v1267_v22, %v1159_v16  ;;  %v1166_v34 = vmul.f32 %v4446_v18, %v5867_v40  ;;  %4467 = vpow2.f32 %v828_v21  ;;  %v6033_v4 = vpop.f32.mrb[67].mxu1  ;;  %v1181_v24 = vrot.slane %v7176_v55, 2 }
 0x19c   :  { %7175 = vst [vmem:[#allocation67_spill] sm:$0xff] %v6033_v4  ;;  %v4450_v61 = vpop.eup %4449  ;;  %v7177_v8 = vrot.slane %v5734_v14, 4  ;;  %4469 = vrcp.f32 %v1007_v52  ;;  %v1009_v13 = vadd.f32 1.0, %v4448_v62  ;;  %v1207_v21 = vrot.slane %v1206_v48, 2  ;;  %v6097_v11 = vpop.f32.mrb[68].mxu1 }
 0x19d   :  { %v4452_v57 = vpop.eup %4451  ;;  %v6039_v3 = vadd.f32 %v1229_v29, %v1166_v34  ;;  %v1168_v22 = vmul.f32 %v4450_v61, %v5871_v31  ;;  %4471 = vpow2.f32 %v1828_v60  ;;  %v6043_v39 = vadd.f32 %v1218_v26, %v7172_v5  ;;  %v7180_v26 = vld [vmem:[#allocation21_spill] sm:$0xff] }
 0x19e   :  { %v1193_v43 = vadd.f32 %v7177_v8, %v5734_v14  ;;  %v4454_v40 = vpop.eup %4453  ;;  %4473 = vrcp.f32 %v1009_v13  ;;  %v940_v23 = vadd.f32 1.0, %v4452_v57  ;;  %v7179_v14 = vld [vmem:[#allocation20_spill] sm:$0xff]  ;;  %v1182_v31 = vadd.f32 %v1181_v24, %v7176_v55  ;;  %v7181_v57 = vld [vmem:[#allocation22_spill] sm:$0xff]  ;;  %7187 = vst [vmem:[#allocation21_spill] sm:$0xff] %v6097_v11 }
 0x19f   :  { %v4456_v12 = vpop.eup %4455  ;;  %v6045_v28 = vadd.f32 %v1255_v56, %v1168_v22  ;;  %v941_v16 = vadd.f32 1.0, %v4454_v40  ;;  %4475 = vpow2.f32 %v830_v20  ;;  %v6049_v18 = vadd.f32 %v7179_v14, %v7161_v2 }
 0x1a0   :  { %v4458_v29 = vpop.eup %4457  ;;  %v1194_v60 = vrot.slane %v1193_v43, 2  ;;  %4477 = vrcp.f32 %v940_v23  ;;  %v950_v52 = vadd.f32 1.0, %v4456_v12  ;;  %v6054_v34 = vadd.f32 %v7180_v26, %v5778_v59 }
 0x1a1   :  { %7178 = vst [vmem:[#allocation60_spill] sm:$0xff] %v6045_v28  ;;  %v4460_v62 = vpop.eup %4459  ;;  %4479 = vrcp.f32 %v941_v16  ;;  %v1948_v5 = vadd.f32 1.0, %v4458_v29  ;;  %v6056_v61 = vadd.f32 %v1207_v21, %v1206_v48  ;;  %v1220_v20 = vrot.slane %v6043_v39, 2  ;;  %v7182_v29 = vld [vmem:[#allocation23_spill] sm:$0xff] }
 0x1a2   :  { %v4462_v56 = vpop.eup %4461  ;;  %4481 = vrcp.f32 %v950_v52  ;;  %v951_v8 = vadd.f32 1.0, %v4460_v62  ;;  %v1729_v24 = vsub.f32 0.0, %v6049_v18  ;;  %v6062_v22 = vadd.f32 %v7181_v57, %v7160_v17 }
 0x1a3   :  { %v4464_v13 = vpop.eup %4463  ;;  %4483 = vrcp.f32 %v1948_v5  ;;  %v1949_v55 = vadd.f32 1.0, %v4462_v56  ;;  %v1183_v23 = vrot.slane %v1182_v31, 1  ;;  %v6064_v12 = vadd.f32 %v1194_v60, %v1193_v43  ;;  %v7184_v5 = vld [vmem:[#allocation37_spill] sm:$0xff] }
 0x1a4   :  { %v4466_v40 = vpop.eup %4465  ;;  %4485 = vrcp.f32 %v951_v8  ;;  %v1958_v48 = vadd.f32 1.0, %v4464_v13  ;;  %v730_v14 = vsub.f32 0.0, %v6054_v34  ;;  %v6069_v52 = vadd.f32 %v7182_v29, %v5812_v33 }
 0x1a5   :  { %v4468_v21 = vpop.eup %4467  ;;  %4487 = vrcp.f32 %v1949_v55  ;;  %v1959_v16 = vadd.f32 1.0, %v4466_v40  ;;  %v1231_v26 = vrot.slane %v6039_v3, 4  ;;  %v1830_v8 = vmul.f32 1.442695, %v1729_v24  ;;  %v7183_v40 = vld [vmem:[#allocation36_spill] sm:$0xff] }
 0x1a6   :  { %v4470_v62 = vpop.eup %4469  ;;  %4489 = vrcp.f32 %v1958_v48  ;;  %v960_v56 = vadd.f32 1.0, %v4468_v21  ;;  %v1738_v13 = vsub.f32 0.0, %v6062_v22  ;;  %v6077_v29 = vadd.f32 %v7183_v40, %v7161_v2  ;;  %v7185_v40 = vld [vmem:[#allocation38_spill] sm:$0xff] }
 0x1a7   :  { %v4472_v43 = vpop.eup %4471  ;;  %v1167_v60 = vmul.f32 %v4470_v62, %v5895_v42  ;;  %4491 = vrcp.f32 %v1959_v16  ;;  %v6081_v28 = vadd.f32 %v7184_v5, %v5778_v59  ;;  %v848_v24 = vmul.f32 1.442695, %v730_v14  ;;  %v6095_v5 = vpop.f32.mrb[68].mxu0 }
 0x1a8   :  { %v4474_v55 = vpop.eup %4473  ;;  %4493 = vrcp.f32 %v960_v56  ;;  %v1968_v57 = vadd.f32 1.0, %v4472_v43  ;;  %v731_v16 = vsub.f32 0.0, %v6069_v52  ;;  %v6089_v56 = vadd.f32 %v1231_v26, %v6039_v3  ;;  %7186 = vst [vmem:[#allocation20_spill] sm:$0xff] %v6095_v5  ;;  %v7189_v3 = vld [vmem:[#allocation39_spill] sm:$0xff] }
 0x1a9   :  { %v4476_v48 = vpop.eup %4475  ;;  %v6084_v21 = vadd.f32 %v6024_v47, %v1167_v60  ;;  %v1169_v42 = vmul.f32 %v4474_v55, %v5904_v37  ;;  %v6093_v4 = vadd.f32 %v7185_v40, %v7160_v17  ;;  %v6099_v60 = vadd.f32 %v1183_v23, %v1182_v31  ;;  %v6111_v55 = vpop.f32.mrb[69].mxu0 }
 0x1aa   :  { %v4478_v62 = vpop.eup %4477  ;;  %4495 = vrcp.f32 %v1968_v57  ;;  %v961_v43 = vadd.f32 1.0, %v4476_v48  ;;  %v6102_v37 = vadd.f32 %v1220_v20, %v6043_v39  ;;  %v6109_v26 = vadd.f32 %v7189_v3, %v5812_v33  ;;  %7190 = vst [vmem:[#allocation23_spill] sm:$0xff] %v6111_v55  ;;  %v6113_v57 = vpop.f32.mrb[69].mxu1 }
 0x1ab   :  { %v4480_v47 = vpop.eup %4479  ;;  %v6105_v14 = vadd.f32 %v6030_v10, %v1169_v42  ;;  %7191 = vst [vmem:[#allocation36_spill] sm:$0xff] %v6113_v57  ;;  %v1848_v40 = vmul.f32 1.442695, %v1738_v13  ;;  %v1739_v31 = vsub.f32 0.0, %v6077_v29  ;;  %v740_v23 = vsub.f32 0.0, %v6081_v28  ;;  %v6117_v39 = vpop.f32.mrb[70].mxu0 }
 0x1ac   :  { %v4482_v48 = vpop.eup %4481  ;;  %4497 = vrcp.f32 %v961_v43  ;;  %7192 = vst [vmem:[#allocation37_spill] sm:$0xff] %v6117_v39  ;;  %v6119_v20 = vpop.f32.mrb[70].mxu1  ;;  %v1100_v42 = vmul.f32 %v4478_v62, %v5919_v27  ;;  %v1233_v13 = vrot.slane %v6089_v56, 2  ;;  %v850_v55 = vmul.f32 1.442695, %v731_v16 }
 0x1ad   :  { %7188 = vst [vmem:[#allocation22_spill] sm:$0xff] %v6105_v14  ;;  %7193 = vst [vmem:[#allocation38_spill] sm:$0xff] %v6119_v20  ;;  %v4484_v10 = vpop.eup %4483  ;;  %v1110_v3 = vmul.f32 %v4482_v48, %v5930_v49  ;;  %4499 = vpow2.f32 %v1830_v8  ;;  %v7194_v14 = vld [vmem:[#allocation40_spill] sm:$0xff]  ;;  %v1748_v11 = vsub.f32 0.0, %v6093_v4  ;;  %v6129_v39 = vpop.f32.mrb[71].mxu0  ;;  %v1101_v27 = vmul.f32 %v4480_v47, %v5923_v36 }
 0x1ae   :  { %v6125_v57 = vadd.f32 %v7194_v14, %v7161_v2  ;;  %v4486_v43 = vpop.eup %4485  ;;  %4501 = vpow2.f32 %v848_v24  ;;  %7195 = vst [vmem:[#allocation39_spill] sm:$0xff] %v6129_v39  ;;  %v6131_v20 = vpop.f32.mrb[71].mxu1  ;;  %v741_v62 = vsub.f32 0.0, %v6109_v26  ;;  %v1850_v48 = vmul.f32 1.442695, %v1739_v31  ;;  %v7197_v24 = vld [vmem:[#allocation41_spill] sm:$0xff] }
 0x1af   :  { %7196 = vst [vmem:[#allocation40_spill] sm:$0xff] %v6131_v20  ;;  %v4488_v5 = vpop.eup %4487  ;;  %v1276_v49 = vadd.f32 %v1110_v3, %v1100_v42  ;;  %v1111_v8 = vmul.f32 %v4486_v43, %v5951_v38  ;;  %4503 = vpow2.f32 %v1848_v40  ;;  %v868_v19 = vmul.f32 1.442695, %v740_v23  ;;  %v7198_v40 = vld [vmem:[#allocation42_spill] sm:$0xff] }
 0x1b0   :  { %v4490_v14 = vpop.eup %4489  ;;  %v6138_v16 = vadd.f32 %v7197_v24, %v5778_v59  ;;  %v2108_v39 = vmul.f32 %v4484_v10, %v5947_v30  ;;  %v1749_v36 = vsub.f32 0.0, %v6125_v57  ;;  %v2109_v38 = vmul.f32 %v4488_v5, %v5955_v44  ;;  %v7199_v44 = vld [vmem:[#allocation43_spill] sm:$0xff] }
 0x1b1   :  { %v4492_v35 = vpop.eup %4491  ;;  %v1289_v20 = vadd.f32 %v1111_v8, %v1101_v27  ;;  %v2118_v25 = vmul.f32 %v4490_v14, %v5960_v7  ;;  %4505 = vpow2.f32 %v850_v55  ;;  %v6147_v31 = vadd.f32 %v7198_v40, %v7160_v17 }
 0x1b2   :  { %v4494_v47 = vpop.eup %4493  ;;  %v2119_v42 = vmul.f32 %v4492_v35, %v5969_v58  ;;  %v1868_v43 = vmul.f32 1.442695, %v1748_v11  ;;  %v870_v30 = vmul.f32 1.442695, %v741_v62  ;;  %4507 = vpow2.f32 %v1850_v48  ;;  %v7202_v62 = vld [vmem:[#allocation44_spill] sm:$0xff]  ;;  %v6171_v48 = vpop.f32.mrb[72].mxu0 }
 0x1b3   :  { %v2188_v23 = vadd.f32 %v2118_v25, %v2108_v39  ;;  %v1120_v3 = vmul.f32 %v4494_v47, %v5974_v1  ;;  %v750_v7 = vsub.f32 0.0, %v6138_v16  ;;  %v6155_v5 = vadd.f32 %v7199_v44, %v5812_v33  ;;  %7203 = vst [vmem:[#allocation42_spill] sm:$0xff] %v6171_v48 }
 0x1b4   :  { %v4496_v10 = vpop.eup %4495  ;;  %v6150_v27 = vadd.f32 %v2119_v42, %v2109_v38  ;;  %v1196_v58 = vrot.slane %v6064_v12, 1  ;;  %v1870_v55 = vmul.f32 1.442695, %v1749_v36  ;;  %v7200_v11 = vrot.slane %v6056_v61, 1 }
 0x1b5   :  { %v6158_v35 = vadd.f32 %v1276_v49, %v1120_v3  ;;  %v2128_v25 = vmul.f32 %v4496_v10, %v5984_v9  ;;  %4509 = vpow2.f32 %v868_v19  ;;  %v1758_v8 = vsub.f32 0.0, %v6147_v31  ;;  %v6173_v49 = vpop.f32.mrb[72].mxu1  ;;  %v7205_v10 = vld [vmem:[#allocation45_spill] sm:$0xff] }
 0x1b6   :  { %v4498_v1 = vpop.eup %4497  ;;  %v6164_v39 = vadd.f32 %v7200_v11, %v6056_v61  ;;  %v6169_v14 = vadd.f32 %v7202_v62, %v7161_v2  ;;  %7204 = vst [vmem:[#allocation43_spill] sm:$0xff] %v6173_v49  ;;  %v1234_v9 = vadd.f32 %v1233_v13, %v6089_v56  ;;  %4511 = vpow2.f32 %v1868_v43  ;;  %v7207_v11 = vld [vmem:[#allocation47_spill] sm:$0xff] }
 0x1b7   :  { %v4500_v24 = vpop.eup %4499  ;;  %v6176_v36 = vadd.f32 %v2188_v23, %v2128_v25  ;;  %v1121_v47 = vmul.f32 %v4498_v1, %v5999_v32  ;;  %4513 = vpow2.f32 %v870_v30  ;;  %v888_v38 = vmul.f32 1.442695, %v750_v7 }
 0x1b8   :  { %7201 = vst [vmem:[#allocation41_spill] sm:$0xff] %v6164_v39  ;;  %v4502_v61 = vpop.eup %4501  ;;  %v1969_v19 = vadd.f32 1.0, %v4500_v24  ;;  %v751_v42 = vsub.f32 0.0, %v6155_v5  ;;  %4515 = vpow2.f32 %v1870_v55  ;;  %v6184_v44 = vadd.f32 %v7205_v10, %v5778_v59  ;;  %v7209_v10 = vld [vmem:[#allocation48_spill] sm:$0xff]  ;;  %v7222_v39 = vld [vmem:[#allocation54_spill] sm:$0xff] }
 0x1b9   :  { %v6180_v40 = vadd.f32 %v1289_v20, %v1121_v47  ;;  %v970_v3 = vadd.f32 1.0, %v4502_v61  ;;  %v4504_v56 = vpop.eup %4503  ;;  %v1222_v13 = vrot.slane %v6102_v37, 1  ;;  %v1888_v32 = vmul.f32 1.442695, %v1758_v8  ;;  %v7206_v20 = vld [vmem:[#allocation46_spill] sm:$0xff]  ;;  %v6201_v61 = vpop.f32.mrb[73].mxu0 }
 0x1ba   :  { %4517 = vrcp.f32 %v1969_v19  ;;  %v1759_v23 = vsub.f32 0.0, %v6169_v14  ;;  %v1244_v43 = vrot.slane %v6084_v21, 4  ;;  %v1978_v30 = vadd.f32 1.0, %v4504_v56  ;;  %7208 = vst [vmem:[#allocation44_spill] sm:$0xff] %v6201_v61 }
 0x1bb   :  { %4519 = vrcp.f32 %v970_v3  ;;  %v6191_v7 = vadd.f32 %v7206_v20, %v7160_v17  ;;  %v4506_v25 = vpop.eup %4505  ;;  %v1235_v55 = vrot.slane %v1234_v9, 1  ;;  %v890_v1 = vmul.f32 1.442695, %v751_v42  ;;  %v7210_v42 = vld [vmem:[#allocation50_spill] sm:$0xff] }
 0x1bc   :  { %4521 = vpow2.f32 %v888_v38  ;;  %v6195_v62 = vadd.f32 %v7207_v11, %v5812_v33  ;;  %v6198_v8 = vadd.f32 %v1196_v58, %v6064_v12  ;;  %v971_v24 = vadd.f32 1.0, %v4506_v25  ;;  %v4508_v19 = vpop.eup %4507 }
 0x1bd   :  { %4523 = vrcp.f32 %v1978_v30  ;;  %v760_v47 = vsub.f32 0.0, %v6184_v44  ;;  %v1890_v3 = vmul.f32 1.442695, %v1759_v23  ;;  %v6205_v38 = vadd.f32 %v7209_v10, %v7161_v2 }
 0x1be   :  { %4525 = vpow2.f32 %v1888_v32  ;;  %v6209_v56 = vadd.f32 %v7210_v42, %v5778_v59  ;;  %v6212_v12 = vadd.f32 %v1244_v43, %v6084_v21  ;;  %v1979_v58 = vadd.f32 1.0, %v4508_v19  ;;  %v7213_v21 = vld [vmem:[#allocation51_spill] sm:$0xff] }
 0x1bf   :  { %4527 = vrcp.f32 %v971_v24  ;;  %v1768_v30 = vsub.f32 0.0, %v6191_v7  ;;  %v4510_v20 = vpop.eup %4509  ;;  %v6216_v25 = vadd.f32 %v1222_v13, %v6102_v37  ;;  %v6218_v32 = vadd.f32 %v1235_v55, %v1234_v9  ;;  %v6225_v24 = vpop.f32.mrb[73].mxu1 }
 0x1c0   :  { %4529 = vpow2.f32 %v890_v1  ;;  %v761_v23 = vsub.f32 0.0, %v6195_v62  ;;  %v4512_v11 = vpop.eup %4511  ;;  %v980_v10 = vadd.f32 1.0, %v4510_v20  ;;  %v908_v42 = vmul.f32 1.442695, %v760_v47  ;;  %7214 = vst [vmem:[#allocation47_spill] sm:$0xff] %v6225_v24  ;;  %v6230_v47 = vpop.f32.mrb[74].mxu0 }
 0x1c1   :  { %7211 = vst [vmem:[#allocation45_spill] sm:$0xff] %v6216_v25  ;;  %7212 = vst [vmem:[#allocation46_spill] sm:$0xff] %v6218_v32  ;;  %4531 = vrcp.f32 %v1979_v58  ;;  %v6223_v43 = vadd.f32 %v7213_v21, %v7160_v17  ;;  %v4514_v19 = vpop.eup %4513  ;;  %v1988_v61 = vadd.f32 1.0, %v4512_v11  ;;  %v1769_v37 = vsub.f32 0.0, %v6205_v38  ;;  %v6232_v20 = vpop.f32.mrb[74].mxu1 }
 0x1c2   :  { %4533 = vpow2.f32 %v1890_v3  ;;  %v770_v9 = vsub.f32 0.0, %v6209_v56  ;;  %v4516_v13 = vpop.eup %4515  ;;  %v981_v1 = vadd.f32 1.0, %v4514_v19  ;;  %v1908_v58 = vmul.f32 1.442695, %v1768_v30  ;;  %7215 = vst [vmem:[#allocation48_spill] sm:$0xff] %v6230_v47  ;;  %7216 = vst [vmem:[#allocation50_spill] sm:$0xff] %v6232_v20 }
 0x1c3   :  { %4535 = vrcp.f32 %v980_v10  ;;  %v1989_v21 = vadd.f32 1.0, %v4516_v13  ;;  %v910_v24 = vmul.f32 1.442695, %v761_v23  ;;  %v7217_v3 = vld [vmem:[#allocation52_spill] sm:$0xff]  ;;  %v1778_v10 = vsub.f32 0.0, %v6223_v43  ;;  %v7218_v30 = vld [vmem:[#allocation53_spill] sm:$0xff] }
 0x1c4   :  { %v4518_v17 = vpop.eup %4517  ;;  %4537 = vrcp.f32 %v1988_v61  ;;  %v6236_v11 = vadd.f32 %v7217_v3, %v5812_v33  ;;  %v6242_v19 = vadd.f32 %v7218_v30, %v7161_v2  ;;  %v1910_v61 = vmul.f32 1.442695, %v1769_v37  ;;  %v6245_v13 = vpop.f32.mrb[75].mxu0 }
 0x1c5   :  { %v4520_v25 = vpop.eup %4519  ;;  %v2129_v32 = vmul.f32 %v4518_v17, %v6049_v18  ;;  %4539 = vrcp.f32 %v981_v1  ;;  %v928_v23 = vmul.f32 1.442695, %v770_v9  ;;  %7219 = vst [vmem:[#allocation51_spill] sm:$0xff] %v6245_v13  ;;  %v6247_v3 = vpop.f32.mrb[75].mxu1  ;;  %v7221_v17 = vld [vmem:[#allocation12_spill] sm:$0xff] }
 0x1c6   :  { %v4522_v55 = vpop.eup %4521  ;;  %v1130_v20 = vmul.f32 %v4520_v25, %v6054_v34  ;;  %4541 = vrcp.f32 %v1989_v21  ;;  %7220 = vst [vmem:[#allocation52_spill] sm:$0xff] %v6247_v3  ;;  %v6252_v49 = vadd.f32 %v7222_v39, %v7221_v17  ;;  %v771_v25 = vsub.f32 0.0, %v6236_v11  ;;  %v7224_v3 = vld [vmem:[#allocation25_spill] sm:$0xff]  ;;  %v6277_v13 = vpop.f32.mrb[76].mxu1 }
 0x1c7   :  { %v4524_v47 = vpop.eup %4523  ;;  %v2202_v18 = vadd.f32 %v6150_v27, %v2129_v32  ;;  %v990_v1 = vadd.f32 1.0, %v4522_v55  ;;  %4543 = vpow2.f32 %v908_v42  ;;  %v1928_v21 = vmul.f32 1.442695, %v1778_v10  ;;  %v7223_v55 = vld [vmem:[#allocation14_spill] sm:$0xff]  ;;  %7227 = vst [vmem:[#allocation53_spill] sm:$0xff] %v6277_v13 }
 0x1c8   :  { %v4526_v2 = vpop.eup %4525  ;;  %v1278_v30 = vadd.f32 %v6158_v35, %v1130_v20  ;;  %v2138_v34 = vmul.f32 %v4524_v47, %v6062_v22  ;;  %4545 = vpow2.f32 %v1908_v58  ;;  %v1779_v27 = vsub.f32 0.0, %v6242_v19  ;;  %v7225_v20 = vld [vmem:[#allocation56_spill] sm:$0xff] }
 0x1c9   :  { %v4528_v37 = vpop.eup %4527  ;;  %4547 = vrcp.f32 %v990_v1  ;;  %v1998_v9 = vadd.f32 1.0, %v4526_v2  ;;  %v6262_v35 = vadd.f32 %v7224_v3, %v7223_v55  ;;  %v1710_v47 = vsub.f32 0.0, %v6252_v49 }
 0x1ca   :  { %v4530_v32 = vpop.eup %4529  ;;  %v2190_v42 = vadd.f32 %v6176_v36, %v2138_v34  ;;  %v1131_v39 = vmul.f32 %v4528_v37, %v6069_v52  ;;  %4549 = vpow2.f32 %v910_v24  ;;  %v6267_v10 = vadd.f32 %v7225_v20, %v7221_v17  ;;  %v7226_v37 = vld [vmem:[#allocation55_spill] sm:$0xff] }
 0x1cb   :  { %v4532_v22 = vpop.eup %4531  ;;  %4551 = vrcp.f32 %v1998_v9  ;;  %v991_v58 = vadd.f32 1.0, %v4530_v32  ;;  %v930_v52 = vmul.f32 1.442695, %v771_v25  ;;  %v1930_v34 = vmul.f32 1.442695, %v1779_v27  ;;  %v6275_v32 = vpop.f32.mrb[76].mxu0 }
 0x1cc   :  { %v4534_v1 = vpop.eup %4533  ;;  %v1291_v2 = vadd.f32 %v6180_v40, %v1131_v39  ;;  %v2139_v36 = vmul.f32 %v4532_v22, %v6077_v29  ;;  %4553 = vpow2.f32 %v1910_v61  ;;  %v6273_v9 = vadd.f32 %v7226_v37, %v5364_v15  ;;  %v6281_v61 = vpop.f32.mrb[77].mxu0 }
 0x1cd   :  { %v4536_v24 = vpop.eup %4535  ;;  %4555 = vrcp.f32 %v991_v58  ;;  %v1999_v3 = vadd.f32 1.0, %v4534_v1  ;;  %v1711_v29 = vsub.f32 0.0, %v6262_v35  ;;  %7228 = vst [vmem:[#allocation12_spill] sm:$0xff] %v6281_v61  ;;  %v1792_v39 = vmul.f32 1.442695, %v1710_v47 }
 0x1ce   :  { %v4538_v20 = vpop.eup %4537  ;;  %v2203_v48 = vadd.f32 %v2202_v18, %v2139_v36  ;;  %v1140_v40 = vmul.f32 %v4536_v24, %v6081_v28  ;;  %4557 = vpow2.f32 %v928_v23  ;;  %v1720_v22 = vsub.f32 0.0, %v6267_v10  ;;  %v7229_v18 = vld [vmem:[#allocation58_spill] sm:$0xff] }
 0x1cf   :  { %v4540_v25 = vpop.eup %4539  ;;  %v2148_v27 = vmul.f32 %v4538_v20, %v6093_v4  ;;  %4559 = vrcp.f32 %v1999_v3  ;;  %v6288_v28 = vadd.f32 %v7229_v18, %v7223_v55  ;;  %v1712_v4 = vsub.f32 0.0, %v6273_v9  ;;  %v6292_v3 = vpop.f32.mrb[77].mxu1 }
 0x1d0   :  { %v4542_v58 = vpop.eup %4541  ;;  %v1279_v1 = vadd.f32 %v1278_v30, %v1140_v40  ;;  %v1141_v37 = vmul.f32 %v4540_v25, %v6109_v26  ;;  %4561 = vpow2.f32 %v1928_v21  ;;  %7230 = vst [vmem:[#allocation54_spill] sm:$0xff] %v6292_v3  ;;  %v1794_v30 = vmul.f32 1.442695, %v1711_v29 }
 0x1d1   :  { %v4544_v23 = vpop.eup %4543  ;;  %v2191_v36 = vadd.f32 %v2190_v42, %v2148_v27  ;;  %v2149_v24 = vmul.f32 %v4542_v58, %v6125_v57  ;;  %4563 = vpow2.f32 %v930_v52  ;;  %v7231_v21 = vrot.slane %v6212_v12, 2 }
 0x1d2   :  { %v4546_v47 = vpop.eup %4545  ;;  %v1292_v20 = vadd.f32 %v1291_v2, %v1141_v37  ;;  %v1000_v61 = vadd.f32 1.0, %v4544_v23  ;;  %4565 = vpow2.f32 %v1930_v34  ;;  %v1812_v27 = vmul.f32 1.442695, %v1720_v22  ;;  %v7232_v37 = vld [vmem:[#allocation26_spill] sm:$0xff]  ;;  %v6312_v22 = vpop.f32.mrb[78].mxu1 }
 0x1d3   :  { %v4548_v26 = vpop.eup %4547  ;;  %v6297_v40 = vadd.f32 %v7231_v21, %v6212_v12  ;;  %v2204_v25 = vadd.f32 %v2203_v48, %v2149_v24  ;;  %v2008_v42 = vadd.f32 1.0, %v4546_v47  ;;  %4567 = vpow2.f32 %v1792_v39  ;;  %v6305_v12 = vpop.f32.mrb[78].mxu0  ;;  %7235 = vst [vmem:[#allocation25_spill] sm:$0xff] %v6312_v22 }
 0x1d4   :  { %v4550_v57 = vpop.eup %4549  ;;  %v1150_v52 = vmul.f32 %v4548_v26, %v6138_v16  ;;  %4569 = vrcp.f32 %v1000_v61  ;;  %v1721_v58 = vsub.f32 0.0, %v6288_v28  ;;  %v1796_v29 = vmul.f32 1.442695, %v1712_v4  ;;  %7233 = vst [vmem:[#allocation14_spill] sm:$0xff] %v6305_v12  ;;  %v7234_v16 = vld [vmem:[#allocation57_spill] sm:$0xff]  ;;  %v7236_v26 = vld [vmem:[#allocation59_spill] sm:$0xff] }
 0x1d5   :  { %v4552_v2 = vpop.eup %4551  ;;  %4571 = vrcp.f32 %v2008_v42  ;;  %v1001_v34 = vadd.f32 1.0, %v4550_v57  ;;  %v6303_v18 = vadd.f32 %v7232_v37, %v5441_v6  ;;  %v6310_v61 = vadd.f32 %v7234_v16, %v5364_v15  ;;  %v6320_v57 = vpop.f32.mrb[79].mxu0 }
 0x1d6   :  { %v4554_v48 = vpop.eup %4553  ;;  %v1280_v23 = vadd.f32 %v1279_v1, %v1150_v52  ;;  %v2158_v39 = vmul.f32 %v4552_v2, %v6147_v31  ;;  %4573 = vpow2.f32 %v1794_v30  ;;  %v1248_v4 = vrot.slane %v6297_v40, 1  ;;  %7237 = vst [vmem:[#allocation56_spill] sm:$0xff] %v6320_v57  ;;  %v6327_v16 = vpop.f32.mrb[79].mxu1 }
 0x1d7   :  { %v4556_v24 = vpop.eup %4555  ;;  %4575 = vrcp.f32 %v1001_v34  ;;  %v2009_v47 = vadd.f32 1.0, %v4554_v48  ;;  %v6317_v21 = vadd.f32 %v7236_v26, %v5441_v6  ;;  %v1814_v30 = vmul.f32 1.442695, %v1721_v58  ;;  %v7238_v34 = vld [vmem:[#allocation27_spill] sm:$0xff]  ;;  %7239 = vst [vmem:[#allocation55_spill] sm:$0xff] %v6327_v16 }
 0x1d8   :  { %v4558_v42 = vpop.eup %4557  ;;  %v2192_v1 = vadd.f32 %v2191_v36, %v2158_v39  ;;  %v1151_v31 = vmul.f32 %v4556_v24, %v6155_v5  ;;  %4577 = vpow2.f32 %v1812_v27  ;;  %v1713_v37 = vsub.f32 0.0, %v6303_v18 }
 0x1d9   :  { %v4560_v52 = vpop.eup %4559  ;;  %4579 = vrcp.f32 %v2009_v47  ;;  %v1010_v2 = vadd.f32 1.0, %v4558_v42  ;;  %v6325_v48 = vadd.f32 %v7238_v34, %v7221_v17  ;;  %v1722_v5 = vsub.f32 0.0, %v6310_v61  ;;  %v7240_v34 = vld [vmem:[#allocation28_spill] sm:$0xff] }
 0x1da   :  { %v4562_v26 = vpop.eup %4561  ;;  %v1293_v22 = vadd.f32 %v1292_v20, %v1151_v31  ;;  %v2159_v36 = vmul.f32 %v4560_v52, %v6169_v14  ;;  %4581 = vpow2.f32 %v1796_v29  ;;  %v1723_v39 = vsub.f32 0.0, %v6317_v21 }
 0x1db   :  { %v4564_v27 = vpop.eup %4563  ;;  %4583 = vrcp.f32 %v1010_v2  ;;  %v2018_v58 = vadd.f32 1.0, %v4562_v26  ;;  %v6334_v57 = vadd.f32 %v7240_v34, %v5364_v15  ;;  %v1798_v14 = vmul.f32 1.442695, %v1713_v37  ;;  %v7241_v26 = vld [vmem:[#allocation29_spill] sm:$0xff] }
 0x1dc   :  { %v4566_v24 = vpop.eup %4565  ;;  %v2205_v47 = vadd.f32 %v2204_v25, %v2159_v36  ;;  %v1011_v42 = vadd.f32 1.0, %v4564_v27  ;;  %4585 = vpow2.f32 %v1814_v30  ;;  %v1730_v29 = vsub.f32 0.0, %v6325_v48 }
 0x1dd   :  { %v4568_v16 = vpop.eup %4567  ;;  %4587 = vrcp.f32 %v2018_v58  ;;  %v2019_v20 = vadd.f32 1.0, %v4566_v24  ;;  %v1816_v2 = vmul.f32 1.442695, %v1722_v5  ;;  %v6339_v12 = vadd.f32 %v7241_v26, %v7223_v55  ;;  %v7242_v58 = vld [vmem:[#allocation30_spill] sm:$0xff] }
 0x1de   :  { %v4570_v31 = vpop.eup %4569  ;;  %4589 = vrcp.f32 %v1011_v42  ;;  %v1950_v52 = vadd.f32 1.0, %v4568_v16  ;;  %v4909_v36 = vmov 1983009808   ;;  %v6344_v24 = vadd.f32 %v7242_v58, %v5441_v6 }
 0x1df   :  { %v4572_v25 = vpop.eup %4571  ;;  %v1160_v30 = vmul.f32 %v4570_v31, %v6184_v44  ;;  %4591 = vrcp.f32 %v2019_v20  ;;  %v2345_v27 = vunpack.c.l.s4 %v4909_v36  ;;  %v1818_v16 = vmul.f32 1.442695, %v1723_v39  ;;  %v7243_v44 = vld [vmem:[#allocation31_spill] sm:$0xff] }
 0x1e0   :  { %v4574_v37 = vpop.eup %4573  ;;  %v2168_v34 = vmul.f32 %v4572_v25, %v6191_v7  ;;  %4593 = vrcp.f32 %v1950_v52  ;;  %v1732_v5 = vsub.f32 0.0, %v6334_v57  ;;  %v1832_v3 = vmul.f32 1.442695, %v1730_v29 }
 0x1e1   :  { %v4576_v42 = vpop.eup %4575  ;;  %v1281_v26 = vadd.f32 %v1280_v23, %v1160_v30  ;;  %4595 = vpow2.f32 %v1798_v14  ;;  %v6350_v20 = vadd.f32 %v7243_v44, %v7221_v17  ;;  %v1731_v13 = vsub.f32 0.0, %v6339_v12 }
 0x1e2   :  { %v4578_v31 = vpop.eup %4577  ;;  %v2193_v36 = vadd.f32 %v2192_v1, %v2168_v34  ;;  %v1161_v58 = vmul.f32 %v4576_v42, %v6195_v62  ;;  %4597 = vpow2.f32 %v1816_v2  ;;  %v6355_v39 = vadd.f32 %v1248_v4, %v6297_v40  ;;  %v7244_v2 = vld [vmem:[#allocation61_spill] sm:$0xff] }
 0x1e3   :  { %v4580_v7 = vpop.eup %4579  ;;  %v1951_v52 = vadd.f32 1.0, %v4574_v37  ;;  %v1960_v25 = vadd.f32 1.0, %v4578_v31  ;;  %v1733_v23 = vsub.f32 0.0, %v6344_v24  ;;  %4599 = vpow2.f32 %v1818_v16 }
 0x1e4   :  { %v4582_v14 = vpop.eup %4581  ;;  %v1294_v29 = vadd.f32 %v1293_v22, %v1161_v58  ;;  %v2169_v30 = vmul.f32 %v4580_v7, %v6205_v38  ;;  %v1836_v44 = vmul.f32 1.442695, %v1732_v5  ;;  %v2346_v34 = vunpack.c.0.s8 %v2345_v27  ;;  %v7245_v5 = vld [vmem:[#allocation62_spill] sm:$0xff] }
 0x1e5   :  { %v4584_v1 = vpop.eup %4583  ;;  %4601 = vrcp.f32 %v1960_v25  ;;  %v1740_v62 = vsub.f32 0.0, %v6350_v20  ;;  %v6362_v42 = vadd.f32 %v7244_v2, %v5364_v15  ;;  %v1834_v31 = vmul.f32 1.442695, %v1731_v13 }
 0x1e6   :  { %v4586_v40 = vpop.eup %4585  ;;  %v2206_v4 = vadd.f32 %v2205_v47, %v2169_v30  ;;  %v1170_v37 = vmul.f32 %v4584_v1, %v6209_v56  ;;  %4603 = vpow2.f32 %v1832_v3  ;;  %v1838_v16 = vmul.f32 1.442695, %v1733_v23  ;;  %v7246_v1 = vld [vmem:[#allocation32_spill] sm:$0xff] }
 0x1e7   :  { %v4588_v22 = vpop.eup %4587  ;;  %4605 = vrcp.f32 %v1951_v52  ;;  %v1961_v38 = vadd.f32 1.0, %v4586_v40  ;;  %v6367_v27 = vadd.f32 %v7245_v5, %v7223_v55  ;;  %v1952_v2 = vadd.f32 1.0, %v4582_v14  ;;  %v7248_v14 = vld [vmem:[#allocation10_spill] sm:$0xff] }
 0x1e8   :  { %v4590_v58 = vpop.eup %4589  ;;  %v6369_v7 = vadd.f32 %v1281_v26, %v1170_v37  ;;  %v2178_v25 = vmul.f32 %v4588_v22, %v6223_v43  ;;  %4607 = vpow2.f32 %v1836_v44  ;;  %v1852_v13 = vmul.f32 1.442695, %v1740_v62 }
 0x1e9   :  { %v4592_v47 = vpop.eup %4591  ;;  %v1171_v56 = vmul.f32 %v4590_v58, %v6236_v11  ;;  %4609 = vrcp.f32 %v1961_v38  ;;  %v1742_v3 = vsub.f32 0.0, %v6362_v42  ;;  %v6377_v26 = vadd.f32 %v7246_v1, %v5441_v6 }
 0x1ea   :  { %v4594_v52 = vpop.eup %4593  ;;  %v2194_v23 = vadd.f32 %v2193_v36, %v2178_v25  ;;  %v2179_v30 = vmul.f32 %v4592_v47, %v6242_v19  ;;  %4611 = vpow2.f32 %v1834_v31  ;;  %v6382_v44 = vsub.s32 %v2346_v34, %v7248_v14 }
 0x1eb   :  { %v4596_v40 = vpop.eup %4595  ;;  %v6379_v43 = vadd.f32 %v1294_v29, %v1171_v56  ;;  %4613 = vpow2.f32 %v1838_v16  ;;  %v6386_v11 = vadd.f32 %v5880_v51, %v7221_v17  ;;  %v1741_v22 = vsub.f32 0.0, %v6367_v27 }
 0x1ec   :  { %v4598_v62 = vpop.eup %4597  ;;  %v2195_v36 = vrot.slane %v2194_v23, 4  ;;  %v2207_v37 = vadd.f32 %v2206_v4, %v2179_v30  ;;  %4615 = vrcp.f32 %v1952_v2  ;;  %v1953_v19 = vadd.f32 1.0, %v4596_v40 }
 0x1ed   :  { %7247 = vst [vmem:[#allocation58_spill] sm:$0xff] %v6379_v43  ;;  %v1962_v31 = vadd.f32 1.0, %v4598_v62  ;;  %4617 = vpow2.f32 %v1852_v13  ;;  %v6391_v29 = vadd.f32 %v5882_v46, %v5364_v15  ;;  %v4600_v34 = vpop.eup %4599  ;;  %v1856_v5 = vmul.f32 1.442695, %v1742_v3 }
 0x1ee   :  { %v2196_v38 = vadd.f32 %v2195_v36, %v2194_v23  ;;  %v2208_v16 = vrot.slane %v2207_v37, 4  ;;  %v1743_v51 = vsub.f32 0.0, %v6377_v26  ;;  %v2110_v4 = vmul.f32 %v4594_v52, %v6252_v49 }
 0x1ef   :  { %v4602_v58 = vpop.eup %4601  ;;  %v1963_v25 = vadd.f32 1.0, %v4600_v34  ;;  %v1750_v2 = vsub.f32 0.0, %v6386_v11  ;;  %v6398_v47 = vadd.f32 %v5887_v41, %v7223_v55  ;;  %4619 = vrcp.f32 %v1953_v19 }
 0x1f0   :  { %v4604_v56 = vpop.eup %4603  ;;  %v2197_v13 = vrot.slane %v2196_v38, 2  ;;  %v2209_v46 = vadd.f32 %v2208_v16, %v2207_v37  ;;  %v2120_v30 = vmul.f32 %v4602_v58, %v6267_v10  ;;  %4621 = vrcp.f32 %v1962_v31 }
 0x1f1   :  { %v4606_v23 = vpop.eup %4605  ;;  %v1970_v3 = vadd.f32 1.0, %v4604_v56  ;;  %v1854_v1 = vmul.f32 1.442695, %v1741_v22  ;;  %v1752_v40 = vsub.f32 0.0, %v6391_v29  ;;  %v1858_v36 = vmul.f32 1.442695, %v1743_v51 }
 0x1f2   :  { %v4608_v49 = vpop.eup %4607  ;;  %v2198_v52 = vadd.f32 %v2197_v13, %v2196_v38  ;;  %v2210_v14 = vrot.slane %v2209_v46, 2  ;;  %v6402_v62 = vadd.f32 %v2120_v30, %v2110_v4  ;;  %4623 = vrcp.f32 %v1963_v25 }
 0x1f3   :  { %v4610_v41 = vpop.eup %4609  ;;  %v1972_v34 = vadd.f32 1.0, %v4608_v49  ;;  %v1872_v43 = vmul.f32 1.442695, %v1750_v2  ;;  %v1751_v37 = vsub.f32 0.0, %v6398_v47  ;;  %v2111_v31 = vmul.f32 %v4606_v23, %v6262_v35  ;;  %v7249_v49 = vld [vmem:[#allocation33_spill] sm:$0xff] }
 0x1f4   :  { %v4612_v10 = vpop.eup %4611  ;;  %v2199_v19 = vrot.slane %v2198_v52, 1  ;;  %v2211_v16 = vadd.f32 %v2210_v14, %v2209_v46  ;;  %v2121_v22 = vmul.f32 %v4610_v41, %v6288_v28  ;;  %4625 = vrcp.f32 %v1970_v3  ;;  %v7250_v14 = vld [vmem:[#allocation34_spill] sm:$0xff] }
 0x1f5   :  { %v4614_v58 = vpop.eup %4613  ;;  %v1971_v38 = vadd.f32 1.0, %v4612_v10  ;;  %v1876_v56 = vmul.f32 1.442695, %v1752_v40  ;;  %v6409_v51 = vadd.f32 %v5889_v50, %v5441_v6  ;;  %4627 = vrcp.f32 %v1972_v34 }
 0x1f6   :  { %v4616_v4 = vpop.eup %4615  ;;  %v2200_v25 = vadd.f32 %v2199_v19, %v2198_v52  ;;  %v2212_v2 = vrot.slane %v2211_v16, 1  ;;  %v6411_v13 = vadd.f32 %v2121_v22, %v2111_v31  ;;  %v1973_v46 = vadd.f32 1.0, %v4614_v58  ;;  %v7252_v58 = vld [vmem:[#allocation63_spill] sm:$0xff] }
 0x1f7   :  { %v4618_v30 = vpop.eup %4617  ;;  %4629 = vrcp.f32 %v1971_v38  ;;  %v1874_v35 = vmul.f32 1.442695, %v1751_v37  ;;  %v1753_v28 = vsub.f32 0.0, %v6409_v51  ;;  %v2112_v50 = vmul.f32 %v4616_v4, %v6273_v9 }
 0x1f8   :  { %v6416_v23 = vsel %vm2321_vm3, %v6099_v60, %v2200_v25  ;;  %v2213_v3 = vadd.f32 %v2212_v2, %v2211_v16  ;;  %v1980_v40 = vadd.f32 1.0, %v4618_v30  ;;  %4631 = vpow2.f32 %v1856_v5  ;;  %v7251_v5 = vld [vmem:[#allocation35_spill] sm:$0xff] }
 0x1f9   :  { %4633 = vrcp.f32 %v1973_v46  ;;  %v6421_v52 = vadd.f32 %v7249_v49, %v7221_v17  ;;  %v6425_v41 = vadd.f32 %v7250_v14, %v5364_v15  ;;  %v4620_v34 = vpop.eup %4619  ;;  %v1878_v60 = vmul.f32 1.442695, %v1753_v28  ;;  %v7254_v49 = vld [vmem:[#allocation65_spill] sm:$0xff] }
 0x1fa   :  { %v6429_v37 = vsel %vm2321_vm3, %v6198_v8, %v2213_v3  ;;  %4635 = vrcp.f32 %v1980_v40  ;;  %v6433_v10 = vadd.f32 %v7251_v5, %v7223_v55  ;;  %v4622_v9 = vpop.eup %4621  ;;  %v6443_v38 = vadd.f32 %v7252_v58, %v5441_v6 }
 0x1fb   :  { %v2342_v19 = vcombine.low %v6416_v23, %v6429_v37  ;;  %4637 = vpow2.f32 %v1854_v1  ;;  %v1760_v16 = vsub.f32 0.0, %v6421_v52  ;;  %v1762_v31 = vsub.f32 0.0, %v6425_v41  ;;  %v7268_v23 = vld [vmem:[#allocation23_spill] sm:$0xff] }
 0x1fc   :  { %v2122_v22 = vmul.f32 %v4622_v9, %v6310_v61  ;;  %4639 = vpow2.f32 %v1858_v36  ;;  %v1761_v8 = vsub.f32 0.0, %v6433_v10  ;;  %v4624_v4 = vpop.eup %4623  ;;  %v2113_v25 = vmul.f32 %v4620_v34, %v6303_v18  ;;  %v7253_v36 = vld [vmem:[#allocation64_spill] sm:$0xff] }
 0x1fd   :  { %4641 = vpow2.f32 %v1872_v43  ;;  %v1892_v2 = vmul.f32 1.442695, %v1760_v16  ;;  %v1896_v30 = vmul.f32 1.442695, %v1762_v31  ;;  %v2123_v46 = vmul.f32 %v4624_v4, %v6317_v21  ;;  %v7255_v21 = vld [vmem:[#allocation66_spill] sm:$0xff] }
 0x1fe   :  { %v2240_v1 = vadd.f32 %v2122_v22, %v2112_v50  ;;  %4643 = vpow2.f32 %v1876_v56  ;;  %v1894_v28 = vmul.f32 1.442695, %v1761_v8  ;;  %v4626_v3 = vpop.eup %4625  ;;  %v1763_v61 = vsub.f32 0.0, %v6443_v38 }
 0x1ff   :  { %4645 = vpow2.f32 %v1874_v35  ;;  %v6450_v40 = vadd.f32 %v7253_v36, %v7221_v17  ;;  %v6454_v14 = vadd.f32 %v7254_v49, %v5364_v15  ;;  %v4628_v18 = vpop.eup %4627  ;;  %v2253_v43 = vadd.f32 %v2123_v46, %v2113_v25 }
 0x200   :  { %v2130_v50 = vmul.f32 %v4626_v3, %v6325_v48  ;;  %4647 = vpow2.f32 %v1878_v60  ;;  %v6459_v56 = vadd.f32 %v7255_v21, %v7223_v55  ;;  %v2132_v34 = vmul.f32 %v4628_v18, %v6334_v57 }
 0x201   :  { %v4630_v35 = vpop.eup %4629  ;;  %4649 = vpow2.f32 %v1892_v2  ;;  %v1898_v5 = vmul.f32 1.442695, %v1763_v61  ;;  %v1770_v9 = vsub.f32 0.0, %v6450_v40  ;;  %v1772_v48 = vsub.f32 0.0, %v6454_v14 }
 0x202   :  { %v4632_v16 = vpop.eup %4631  ;;  %v2215_v31 = vadd.f32 %v6402_v62, %v2130_v50  ;;  %v2131_v22 = vmul.f32 %v4630_v35, %v6339_v12  ;;  %4651 = vpow2.f32 %v1896_v30  ;;  %v6466_v8 = vadd.f32 %v2240_v1, %v2132_v34  ;;  %v7256_v1 = vld [vmem:[#allocation11_spill] sm:$0xff] }
 0x203   :  { %v4634_v60 = vpop.eup %4633  ;;  %v1982_v58 = vadd.f32 1.0, %v4632_v16  ;;  %4653 = vpow2.f32 %v1894_v28  ;;  %v1912_v4 = vmul.f32 1.442695, %v1770_v9  ;;  %v1916_v46 = vmul.f32 1.442695, %v1772_v48 }
 0x204   :  { %v4636_v25 = vpop.eup %4635  ;;  %v6469_v57 = vadd.f32 %v6411_v13, %v2131_v22  ;;  %v2133_v2 = vmul.f32 %v4634_v60, %v6344_v24  ;;  %4655 = vpow2.f32 %v1898_v5  ;;  %v1771_v30 = vsub.f32 0.0, %v6459_v56 }
 0x205   :  { %v4638_v62 = vpop.eup %4637  ;;  %v2140_v12 = vmul.f32 %v4636_v25, %v6350_v20  ;;  %4657 = vrcp.f32 %v1982_v58  ;;  %v6476_v3 = vadd.f32 %v7256_v1, %v5441_v6  ;;  %v6482_v24 = vadd.f32 %v5978_v0, %v7221_v17 }
 0x206   :  { %v4640_v28 = vpop.eup %4639  ;;  %v6478_v61 = vadd.f32 %v2253_v43, %v2133_v2  ;;  %v1981_v36 = vadd.f32 1.0, %v4638_v62  ;;  %4659 = vpow2.f32 %v1912_v4  ;;  %v1914_v18 = vmul.f32 1.442695, %v1771_v30  ;;  %v7257_v4 = vld [vmem:[#allocation13_spill] sm:$0xff]  ;;  %v7259_v62 = vld [vmem:[#allocation16_spill] sm:$0xff] }
 0x207   :  { %v4642_v13 = vpop.eup %4641  ;;  %v6484_v49 = vadd.f32 %v2215_v31, %v2140_v12  ;;  %v1983_v20 = vadd.f32 1.0, %v4640_v28  ;;  %4661 = vpow2.f32 %v1916_v46  ;;  %v1773_v35 = vsub.f32 0.0, %v6476_v3 }
 0x208   :  { %v4644_v50 = vpop.eup %4643  ;;  %4663 = vrcp.f32 %v1981_v36  ;;  %v1990_v21 = vadd.f32 1.0, %v4642_v13  ;;  %v1780_v43 = vsub.f32 0.0, %v6482_v24  ;;  %v6490_v0 = vadd.f32 %v5980_v53, %v5364_v15  ;;  %v7258_v53 = vld [vmem:[#allocation15_spill] sm:$0xff] }
 0x209   :  { %v4646_v34 = vpop.eup %4645  ;;  %4665 = vrcp.f32 %v1983_v20  ;;  %v1992_v5 = vadd.f32 1.0, %v4644_v50  ;;  %v1918_v16 = vmul.f32 1.442695, %v1773_v35  ;;  %v4910_v22 = vmov 0.0  }
 0x20a   :  { %v4648_v17 = vpop.eup %4647  ;;  %4667 = vrcp.f32 %v1990_v21  ;;  %v1991_v9 = vadd.f32 1.0, %v4646_v34  ;;  %v1932_v31 = vmul.f32 1.442695, %v1780_v43  ;;  %87 = vst [vmem:[#allocation2 + $0x10] sm:$0xf] %v4910_v22  ;;  %v1782_v58 = vsub.f32 0.0, %v6490_v0 }
 0x20b   :  { %v4650_v48 = vpop.eup %4649  ;;  %4669 = vrcp.f32 %v1992_v5  ;;  %v1993_v60 = vadd.f32 1.0, %v4648_v17  ;;  %v6496_v25 = vadd.f32 %v7257_v4, %v7223_v55  ;;  %v6500_v46 = vadd.f32 %v7258_v53, %v5441_v6  ;;  %v7260_v43 = vld [vmem:[#allocation24_spill] sm:$0xff]  ;;  %v7261_v53 = vld [vmem:[#allocation19_spill] sm:$0xff] }
 0x20c   :  { %v4652_v2 = vpop.eup %4651  ;;  %4671 = vrcp.f32 %v1991_v9  ;;  %v2000_v15 = vadd.f32 1.0, %v4650_v48  ;;  %v6504_v12 = vadd.f32 %v6008_v45, %v7259_v62  ;;  %v1936_v28 = vmul.f32 1.442695, %v1782_v58 }
 0x20d   :  { %v4654_v30 = vpop.eup %4653  ;;  %4673 = vrcp.f32 %v1993_v60  ;;  %v2002_v1 = vadd.f32 1.0, %v4652_v2  ;;  %v1781_v36 = vsub.f32 0.0, %v6496_v25  ;;  %v1783_v20 = vsub.f32 0.0, %v6500_v46 }
 0x20e   :  { %v4656_v13 = vpop.eup %4655  ;;  %4675 = vrcp.f32 %v2000_v15  ;;  %v2001_v55 = vadd.f32 1.0, %v4654_v30  ;;  %v1714_v50 = vsub.f32 0.0, %v6504_v12  ;;  %v6511_v45 = vadd.f32 %v6016_v54, %v7260_v43 }
 0x20f   :  { %v4658_v21 = vpop.eup %4657  ;;  %4677 = vrcp.f32 %v2002_v1  ;;  %v2003_v6 = vadd.f32 1.0, %v4656_v13  ;;  %v1934_v35 = vmul.f32 1.442695, %v1781_v36  ;;  %v1938_v17 = vmul.f32 1.442695, %v1783_v20 }
 0x210   :  { %v4660_v34 = vpop.eup %4659  ;;  %v2142_v5 = vmul.f32 %v4658_v21, %v6362_v42  ;;  %4679 = vrcp.f32 %v2001_v55  ;;  %v1800_v9 = vmul.f32 1.442695, %v1714_v50  ;;  %v1715_v58 = vsub.f32 0.0, %v6511_v45 }
 0x211   :  { %v4662_v48 = vpop.eup %4661  ;;  %4681 = vrcp.f32 %v2003_v6  ;;  %v2010_v60 = vadd.f32 1.0, %v4660_v34  ;;  %v6517_v4 = vadd.f32 %v6021_v63, %v7259_v62  ;;  %v6522_v42 = vadd.f32 %v7261_v53, %v7260_v43 }
 0x212   :  { %v4664_v2 = vpop.eup %4663  ;;  %v2242_v15 = vadd.f32 %v6466_v8, %v2142_v5  ;;  %v2012_v54 = vadd.f32 1.0, %v4662_v48  ;;  %4683 = vpow2.f32 %v1914_v18  ;;  %v1802_v36 = vmul.f32 1.442695, %v1715_v58  ;;  %v7262_v8 = vld [vmem:[#allocation17_spill] sm:$0xff] }
 0x213   :  { %v4666_v30 = vpop.eup %4665  ;;  %v2141_v1 = vmul.f32 %v4664_v2, %v6367_v27  ;;  %4685 = vrcp.f32 %v2010_v60  ;;  %v1724_v13 = vsub.f32 0.0, %v6517_v4  ;;  %v1725_v20 = vsub.f32 0.0, %v6522_v42 }
 0x214   :  { %v4668_v55 = vpop.eup %4667  ;;  %v2143_v63 = vmul.f32 %v4666_v30, %v6377_v26  ;;  %4687 = vrcp.f32 %v2012_v54  ;;  %v6530_v18 = vadd.f32 %v7262_v8, %v5778_v59  ;;  %v6586_v37 = vadd.f32 %v7268_v23, %v7260_v43  ;;  %v7273_v23 = vld [vmem:[#allocation40_spill] sm:$0xff] }
 0x215   :  { %v4670_v50 = vpop.eup %4669  ;;  %v2229_v21 = vadd.f32 %v6469_v57, %v2141_v1  ;;  %v2150_v6 = vmul.f32 %v4668_v55, %v6386_v11  ;;  %4689 = vpow2.f32 %v1918_v16  ;;  %v1820_v27 = vmul.f32 1.442695, %v1724_v13  ;;  %v7263_v16 = vld [vmem:[#allocation18_spill] sm:$0xff]  ;;  %v7264_v55 = vld [vmem:[#allocation49_spill] sm:$0xff] }
 0x216   :  { %v4672_v34 = vpop.eup %4671  ;;  %v2255_v5 = vadd.f32 %v6478_v61, %v2143_v63  ;;  %v2152_v48 = vmul.f32 %v4670_v50, %v6391_v29  ;;  %4691 = vpow2.f32 %v1932_v31  ;;  %v1822_v26 = vmul.f32 1.442695, %v1725_v20 }
 0x217   :  { %v4674_v60 = vpop.eup %4673  ;;  %v2217_v58 = vadd.f32 %v6484_v49, %v2150_v6  ;;  %v2151_v2 = vmul.f32 %v4672_v34, %v6398_v47  ;;  %4693 = vpow2.f32 %v1936_v28  ;;  %v1716_v54 = vsub.f32 0.0, %v6530_v18  ;;  %v7265_v34 = vld [vmem:[#allocation67_spill] sm:$0xff] }
 0x218   :  { %v4676_v57 = vpop.eup %4675  ;;  %v2243_v53 = vadd.f32 %v2242_v15, %v2152_v48  ;;  %v2153_v11 = vmul.f32 %v4674_v60, %v6409_v51  ;;  %4695 = vpow2.f32 %v1934_v35  ;;  %v6542_v61 = vadd.f32 %v7263_v16, %v5812_v33  ;;  %v7266_v60 = vld [vmem:[#allocation20_spill] sm:$0xff] }
 0x219   :  { %v4678_v29 = vpop.eup %4677  ;;  %v2230_v31 = vadd.f32 %v2229_v21, %v2151_v2  ;;  %v2160_v30 = vmul.f32 %v4676_v57, %v6421_v52  ;;  %4697 = vpow2.f32 %v1938_v17  ;;  %v1804_v49 = vmul.f32 1.442695, %v1716_v54 }
 0x21a   :  { %v4680_v1 = vpop.eup %4679  ;;  %v2256_v47 = vadd.f32 %v2255_v5, %v2153_v11  ;;  %v2162_v28 = vmul.f32 %v4678_v29, %v6425_v41  ;;  %4699 = vpow2.f32 %v1800_v9  ;;  %v1717_v15 = vsub.f32 0.0, %v6542_v61 }
 0x21b   :  { %v4682_v13 = vpop.eup %4681  ;;  %v2218_v51 = vadd.f32 %v2217_v58, %v2160_v30  ;;  %v2161_v35 = vmul.f32 %v4680_v1, %v6433_v10  ;;  %4701 = vpow2.f32 %v1802_v36  ;;  %v6550_v63 = vadd.f32 %v7264_v55, %v5778_v59  ;;  %v7267_v30 = vld [vmem:[#allocation21_spill] sm:$0xff] }
 0x21c   :  { %v4684_v20 = vpop.eup %4683  ;;  %v2244_v52 = vadd.f32 %v2243_v53, %v2162_v28  ;;  %v2163_v17 = vmul.f32 %v4682_v13, %v6443_v38  ;;  %4703 = vpow2.f32 %v1820_v27  ;;  %v1806_v8 = vmul.f32 1.442695, %v1717_v15 }
 0x21d   :  { %v4686_v50 = vpop.eup %4685  ;;  %v6553_v41 = vadd.f32 %v2230_v31, %v2161_v35  ;;  %v2011_v9 = vadd.f32 1.0, %v4684_v20  ;;  %4705 = vpow2.f32 %v1822_v26  ;;  %v1726_v21 = vsub.f32 0.0, %v6550_v63 }
 0x21e   :  { %v4688_v6 = vpop.eup %4687  ;;  %v6556_v10 = vadd.f32 %v2256_v47, %v2163_v17  ;;  %v2170_v36 = vmul.f32 %v4686_v50, %v6450_v40  ;;  %4707 = vpow2.f32 %v1804_v49  ;;  %v6561_v5 = vadd.f32 %v7265_v34, %v5812_v33  ;;  %v7270_v17 = vld [vmem:[#allocation37_spill] sm:$0xff] }
 0x21f   :  { %v4690_v38 = vpop.eup %4689  ;;  %v2172_v27 = vmul.f32 %v4688_v6, %v6454_v14  ;;  %4709 = vrcp.f32 %v2011_v9  ;;  %v1824_v48 = vmul.f32 1.442695, %v1726_v21  ;;  %v6566_v26 = vadd.f32 %v7266_v60, %v7259_v62 }
 0x220   :  { %v4692_v58 = vpop.eup %4691  ;;  %v6568_v2 = vadd.f32 %v2218_v51, %v2170_v36  ;;  %v2013_v54 = vadd.f32 1.0, %v4690_v38  ;;  %4711 = vpow2.f32 %v1806_v8  ;;  %v1727_v40 = vsub.f32 0.0, %v6561_v5  ;;  %v7269_v51 = vld [vmem:[#allocation36_spill] sm:$0xff] }
 0x221   :  { %v4694_v57 = vpop.eup %4693  ;;  %v6575_v53 = vrot.slane %v2342_v19, %v6382_v44  ;;  %v6577_v14 = vadd.f32 %v2244_v52, %v2172_v27  ;;  %v2020_v11 = vadd.f32 1.0, %v4692_v58  ;;  %4713 = vpow2.f32 %v1824_v48 }
 0x222   :  { %v4696_v16 = vpop.eup %4695  ;;  %4715 = vrcp.f32 %v2013_v54  ;;  %v2022_v29 = vadd.f32 1.0, %v4694_v57  ;;  %v1734_v31 = vsub.f32 0.0, %v6566_v26  ;;  %v6582_v49 = vadd.f32 %v7267_v30, %v5778_v59  ;;  %v7271_v54 = vld [vmem:[#allocation38_spill] sm:$0xff] }
 0x223   :  { %v4698_v1 = vpop.eup %4697  ;;  %4717 = vrcp.f32 %v2020_v11  ;;  %v2021_v47 = vadd.f32 1.0, %v4696_v16  ;;  %v1826_v28 = vmul.f32 1.442695, %v1727_v40  ;;  %v6591_v35 = vadd.f32 %v7269_v51, %v5812_v33 }
 0x224   :  { %v4700_v19 = vpop.eup %4699  ;;  %4719 = vrcp.f32 %v2022_v29  ;;  %v2023_v15 = vadd.f32 1.0, %v4698_v1  ;;  %v1736_v13 = vsub.f32 0.0, %v6582_v49  ;;  %v1735_v52 = vsub.f32 0.0, %v6586_v37  ;;  %v7272_v29 = vld [vmem:[#allocation39_spill] sm:$0xff] }
 0x225   :  { %v4702_v55 = vpop.eup %4701  ;;  %4721 = vrcp.f32 %v2021_v47  ;;  %v1954_v20 = vadd.f32 1.0, %v4700_v19  ;;  %v6596_v8 = vadd.f32 %v7270_v17, %v7259_v62  ;;  %v1840_v21 = vmul.f32 1.442695, %v1734_v31 }
 0x226   :  { %v4704_v50 = vpop.eup %4703  ;;  %4723 = vrcp.f32 %v2023_v15  ;;  %v1955_v9 = vadd.f32 1.0, %v4702_v55  ;;  %v1737_v6 = vsub.f32 0.0, %v6591_v35  ;;  %v1844_v38 = vmul.f32 1.442695, %v1736_v13  ;;  %v7274_v55 = vld [vmem:[#allocation42_spill] sm:$0xff] }
 0x227   :  { %v4706_v36 = vpop.eup %4705  ;;  %4725 = vrcp.f32 %v1954_v20  ;;  %v1964_v34 = vadd.f32 1.0, %v4704_v50  ;;  %v1842_v27 = vmul.f32 1.442695, %v1735_v52  ;;  %v1744_v58 = vsub.f32 0.0, %v6596_v8 }
 0x228   :  { %v4708_v48 = vpop.eup %4707  ;;  %4727 = vrcp.f32 %v1955_v9  ;;  %v1965_v60 = vadd.f32 1.0, %v4706_v36  ;;  %v6602_v40 = vadd.f32 %v7271_v54, %v5778_v59  ;;  %v1846_v16 = vmul.f32 1.442695, %v1737_v6 }
 0x229   :  { %v4710_v57 = vpop.eup %4709  ;;  %4729 = vrcp.f32 %v1964_v34  ;;  %v1956_v11 = vadd.f32 1.0, %v4708_v48  ;;  %v6606_v31 = vadd.f32 %v7272_v29, %v7260_v43  ;;  %v6612_v19 = vadd.f32 %v7273_v23, %v5812_v33 }
 0x22a   :  { %v4712_v30 = vpop.eup %4711  ;;  %v2171_v1 = vmul.f32 %v4710_v57, %v6459_v56  ;;  %4731 = vrcp.f32 %v1965_v60  ;;  %v1746_v47 = vsub.f32 0.0, %v6602_v40  ;;  %v6617_v20 = vadd.f32 %v7274_v55, %v7259_v62 }
 0x22b   :  { %v4714_v15 = vpop.eup %4713  ;;  %4733 = vrcp.f32 %v1956_v11  ;;  %v1957_v13 = vadd.f32 1.0, %v4712_v30  ;;  %v1745_v51 = vsub.f32 0.0, %v6606_v31  ;;  %v1860_v50 = vmul.f32 1.442695, %v1744_v58  ;;  %v7275_v58 = vld [vmem:[#allocation43_spill] sm:$0xff] }
 0x22c   :  { %v4716_v52 = vpop.eup %4715  ;;  %v2232_v17 = vadd.f32 %v6553_v41, %v2171_v1  ;;  %v1966_v56 = vadd.f32 1.0, %v4714_v15  ;;  %4735 = vpow2.f32 %v1826_v28  ;;  %v1864_v36 = vmul.f32 1.442695, %v1746_v47 }
 0x22d   :  { %v4718_v9 = vpop.eup %4717  ;;  %v2173_v6 = vmul.f32 %v4716_v52, %v6476_v3  ;;  %4737 = vrcp.f32 %v1957_v13  ;;  %v1747_v34 = vsub.f32 0.0, %v6612_v19  ;;  %v1862_v54 = vmul.f32 1.442695, %v1745_v51 }
 0x22e   :  { %v4720_v48 = vpop.eup %4719  ;;  %v2180_v60 = vmul.f32 %v4718_v9, %v6482_v24  ;;  %4739 = vrcp.f32 %v1966_v56  ;;  %v1754_v57 = vsub.f32 0.0, %v6617_v20  ;;  %v6628_v3 = vadd.f32 %v7275_v58, %v5778_v59 }
 0x22f   :  { %v4722_v11 = vpop.eup %4721  ;;  %v2258_v41 = vadd.f32 %v6556_v10, %v2173_v6  ;;  %v2182_v28 = vmul.f32 %v4720_v48, %v6490_v0  ;;  %4741 = vpow2.f32 %v1840_v21  ;;  %v1866_v24 = vmul.f32 1.442695, %v1747_v34 }
 0x230   :  { %v4724_v29 = vpop.eup %4723  ;;  %v2220_v30 = vadd.f32 %v6568_v2, %v2180_v60  ;;  %v2181_v1 = vmul.f32 %v4722_v11, %v6496_v25  ;;  %4743 = vpow2.f32 %v1844_v38  ;;  %v1880_v10 = vmul.f32 1.442695, %v1754_v57 }
 0x231   :  { %v4726_v47 = vpop.eup %4725  ;;  %v2246_v23 = vadd.f32 %v6577_v14, %v2182_v28  ;;  %v2183_v15 = vmul.f32 %v4724_v29, %v6500_v46  ;;  %4745 = vpow2.f32 %v1842_v27 }
 0x232   :  { %v4728_v0 = vpop.eup %4727  ;;  %v2221_v21 = vrot.slane %v2220_v30, 4  ;;  %v2233_v13 = vadd.f32 %v2232_v17, %v2181_v1  ;;  %v2114_v51 = vmul.f32 %v4726_v47, %v6504_v12  ;;  %4747 = vpow2.f32 %v1846_v16 }
 0x233   :  { %v4730_v55 = vpop.eup %4729  ;;  %v2247_v52 = vrot.slane %v2246_v23, 4  ;;  %v2259_v2 = vadd.f32 %v2258_v41, %v2183_v15  ;;  %v2115_v25 = vmul.f32 %v4728_v0, %v6511_v45  ;;  %4749 = vpow2.f32 %v1860_v50 }
 0x234   :  { %v4732_v38 = vpop.eup %4731  ;;  %v2222_v56 = vadd.f32 %v2221_v21, %v2220_v30  ;;  %v2234_v9 = vrot.slane %v2233_v13, 4  ;;  %v2124_v14 = vmul.f32 %v4730_v55, %v6517_v4  ;;  %4751 = vpow2.f32 %v1864_v36 }
 0x235   :  { %v4734_v46 = vpop.eup %4733  ;;  %v2248_v27 = vadd.f32 %v2247_v52, %v2246_v23  ;;  %v2260_v6 = vrot.slane %v2259_v2, 4  ;;  %v2125_v17 = vmul.f32 %v4732_v38, %v6522_v42  ;;  %4753 = vpow2.f32 %v1862_v54 }
 0x236   :  { %v4736_v12 = vpop.eup %4735  ;;  %v2223_v16 = vrot.slane %v2222_v56, 2  ;;  %v2235_v34 = vadd.f32 %v2234_v9, %v2233_v13  ;;  %v6638_v48 = vadd.f32 %v2124_v14, %v2114_v51  ;;  %v1756_v45 = vsub.f32 0.0, %v6628_v3  ;;  %v7276_v14 = vld [vmem:[#allocation41_spill] sm:$0xff] }
 0x237   :  { %v6641_v50 = vpop.eup %4737  ;;  %v2249_v60 = vrot.slane %v2248_v27, 2  ;;  %v2261_v57 = vadd.f32 %v2260_v6, %v2259_v2  ;;  %v6643_v11 = vadd.f32 %v2125_v17, %v2115_v25  ;;  %v1967_v4 = vadd.f32 1.0, %v4736_v12  ;;  %v7277_v17 = vld [vmem:[#allocation46_spill] sm:$0xff] }
 0x238   :  { %v4740_v36 = vpop.eup %4739  ;;  %v2224_v41 = vadd.f32 %v2223_v16, %v2222_v56  ;;  %v2236_v28 = vrot.slane %v2235_v34, 2  ;;  %v2116_v42 = vmul.f32 %v4734_v46, %v6530_v18  ;;  %4755 = vpow2.f32 %v1866_v24 }
 0x239   :  { %v4742_v54 = vpop.eup %4741  ;;  %v2250_v58 = vadd.f32 %v2249_v60, %v2248_v27  ;;  %v2262_v29 = vrot.slane %v2261_v57, 2  ;;  %v2126_v30 = vmul.f32 %v4740_v36, %v6550_v63  ;;  %4757 = vrcp.f32 %v1967_v4  ;;  %v7278_v60 = vld [vmem:[#allocation45_spill] sm:$0xff] }
 0x23a   :  { %v4744_v1 = vpop.eup %4743  ;;  %v2225_v47 = vrot.slane %v2224_v41, 1  ;;  %v2237_v23 = vadd.f32 %v2236_v28, %v2235_v34  ;;  %v1974_v15 = vadd.f32 1.0, %v4742_v54  ;;  %4759 = vpow2.f32 %v1880_v10 }
 0x23b   :  { %v4746_v0 = vpop.eup %4745  ;;  %v2251_v21 = vrot.slane %v2250_v58, 1  ;;  %v2263_v13 = vadd.f32 %v2262_v29, %v2261_v57  ;;  %v6647_v51 = vadd.f32 %v2126_v30, %v2116_v42  ;;  %v1976_v55 = vadd.f32 1.0, %v4744_v1  ;;  %v7279_v42 = vld [vmem:[#allocation44_spill] sm:$0xff]  ;;  %v7280_v30 = vld [vmem:[#allocation47_spill] sm:$0xff] }
 0x23c   :  { %v4748_v52 = vpop.eup %4747  ;;  %v2226_v18 = vadd.f32 %v2225_v47, %v2224_v41  ;;  %v2238_v24 = vrot.slane %v2237_v23, 1  ;;  %4761 = vrcp.f32 %v1974_v15  ;;  %v1975_v2 = vadd.f32 1.0, %v4746_v0 }
 0x23d   :  { %v4750_v25 = vpop.eup %4749  ;;  %v2252_v38 = vadd.f32 %v2251_v21, %v2250_v58  ;;  %v2264_v63 = vrot.slane %v2263_v13, 1  ;;  %4763 = vrcp.f32 %v1976_v55  ;;  %v1977_v56 = vadd.f32 1.0, %v4748_v52 }
 0x23e   :  { %v4752_v9 = vpop.eup %4751  ;;  %v2324_v10 = vsel %vm2321_vm3, %v7276_v14, %v2226_v18  ;;  %v2239_v46 = vadd.f32 %v2238_v24, %v2237_v23  ;;  %4765 = vrcp.f32 %v1975_v2  ;;  %v1984_v27 = vadd.f32 1.0, %v4750_v25  ;;  %v7282_v14 = vld [vmem:[#allocation50_spill] sm:$0xff] }
 0x23f   :  { %v4754_v6 = vpop.eup %4753  ;;  %v6653_v12 = vsel %vm2321_vm3, %v7277_v17, %v2252_v38  ;;  %v2265_v16 = vadd.f32 %v2264_v63, %v2263_v13  ;;  %4767 = vrcp.f32 %v1977_v56  ;;  %v1986_v34 = vadd.f32 1.0, %v4752_v9 }
 0x240   :  { %v2325_v57 = vsel %vm2321_vm3, %v7278_v60, %v2239_v46  ;;  %4769 = vrcp.f32 %v1984_v27  ;;  %v1985_v4 = vadd.f32 1.0, %v4754_v6  ;;  %v1884_v36 = vmul.f32 1.442695, %v1756_v45  ;;  %v7281_v45 = vld [vmem:[#allocation48_spill] sm:$0xff] }
 0x241   :  { %v2343_v41 = vcombine.low %v2324_v10, %v2325_v57  ;;  %v6659_v28 = vsel %vm2321_vm3, %v6355_v39, %v2265_v16  ;;  %4771 = vrcp.f32 %v1986_v34  ;;  %v6663_v54 = vadd.f32 %v7279_v42, %v7260_v43  ;;  %v7284_v16 = vld [vmem:[#allocation52_spill] sm:$0xff] }
 0x242   :  { %v4756_v58 = vpop.eup %4755  ;;  %v2359_v29 = vcombine.low %v6653_v12, %v6659_v28  ;;  %4773 = vrcp.f32 %v1985_v4  ;;  %v6669_v1 = vadd.f32 %v7280_v30, %v5812_v33  ;;  %v6673_v47 = vadd.f32 %v7281_v45, %v7259_v62  ;;  %v2530_v12 = vld [vmem:[#allocation4 + $0x3f8] sm:$0xff] }
 0x243   :  { %v4758_v39 = vpop.eup %4757  ;;  %v6676_v23 = vrot.slane %v2343_v41, %v6382_v44  ;;  %v1987_v15 = vadd.f32 1.0, %v4756_v58  ;;  %4775 = vpow2.f32 %v1884_v36  ;;  %v1755_v0 = vsub.f32 0.0, %v6663_v54 }
 0x244   :  { %v4760_v21 = vpop.eup %4759  ;;  %v2117_v13 = vmul.f32 %v6641_v50, %v6542_v61  ;;  %v2127_v55 = vmul.f32 %v4758_v39, %v6561_v5  ;;  %v1757_v52 = vsub.f32 0.0, %v6669_v1  ;;  %v1764_v18 = vsub.f32 0.0, %v6673_v47  ;;  %v7283_v50 = vld [vmem:[#allocation51_spill] sm:$0xff] }
 0x245   :  { %v2358_v24 = vcombine.low %v6575_v53, %v6676_v23  ;;  %4777 = vrcp.f32 %v1987_v15  ;;  %v1994_v2 = vadd.f32 1.0, %v4760_v21  ;;  %v1882_v25 = vmul.f32 1.442695, %v1755_v0 }
 0x246   :  { %v4762_v38 = vpop.eup %4761  ;;  %v2305_v63 = vadd.f32 %v2127_v55, %v2117_v13  ;;  %v1886_v56 = vmul.f32 1.442695, %v1757_v52  ;;  %v1900_v9 = vmul.f32 1.442695, %v1764_v18  ;;  %v6688_v10 = vadd.f32 %v7282_v14, %v5778_v59  ;;  %v7285_v18 = vld [vmem:[#allocation53_spill] sm:$0xff] }
 0x247   :  { %v4764_v61 = vpop.eup %4763  ;;  %v2134_v5 = vmul.f32 %v4762_v38, %v6566_v26  ;;  %4779 = vrcp.f32 %v1994_v2  ;;  %v6693_v46 = vadd.f32 %v7283_v50, %v7260_v43  ;;  %v6699_v34 = vadd.f32 %v7284_v16, %v5812_v33 }
 0x248   :  { %v4766_v27 = vpop.eup %4765  ;;  %v2136_v6 = vmul.f32 %v4764_v61, %v6582_v49  ;;  %4781 = vpow2.f32 %v1882_v25  ;;  %v1766_v17 = vsub.f32 0.0, %v6688_v10  ;;  %v6720_v2 = vadd.f32 %v7285_v18, %v5778_v59 }
 0x249   :  { %v4768_v60 = vpop.eup %4767  ;;  %v2267_v57 = vadd.f32 %v6638_v48, %v2134_v5  ;;  %v2135_v26 = vmul.f32 %v4766_v27, %v6586_v37  ;;  %4783 = vpow2.f32 %v1886_v56  ;;  %v1765_v4 = vsub.f32 0.0, %v6693_v46  ;;  %v7288_v27 = vld [vmem:[#allocation14_spill] sm:$0xff] }
 0x24a   :  { %v4770_v36 = vpop.eup %4769  ;;  %v2293_v41 = vadd.f32 %v6647_v51, %v2136_v6  ;;  %v2137_v49 = vmul.f32 %v4768_v60, %v6591_v35  ;;  %4785 = vpow2.f32 %v1900_v9  ;;  %v1904_v42 = vmul.f32 1.442695, %v1766_v17  ;;  %v7289_v17 = vld [vmem:[#allocation25_spill] sm:$0xff] }
 0x24b   :  { %v4772_v58 = vpop.eup %4771  ;;  %v2280_v30 = vadd.f32 %v6643_v11, %v2135_v26  ;;  %v2144_v45 = vmul.f32 %v4770_v36, %v6596_v8  ;;  %v1902_v39 = vmul.f32 1.442695, %v1765_v4  ;;  %v1767_v48 = vsub.f32 0.0, %v6699_v34 }
 0x24c   :  { %v4774_v15 = vpop.eup %4773  ;;  %v2306_v37 = vadd.f32 %v2305_v63, %v2137_v49  ;;  %v2146_v0 = vmul.f32 %v4772_v58, %v6602_v40  ;;  %4787 = vpow2.f32 %v1904_v42  ;;  %v6712_v51 = vadd.f32 %v6275_v32, %v7259_v62  ;;  %v7286_v32 = vld [vmem:[#allocation12_spill] sm:$0xff]  ;;  %v2419_v49 = vld [vmem:[#allocation4 + $0x80] sm:$0xff]  ;;  %v2420_v42 = vld [vmem:[#allocation4 + $0x88] sm:$0xff] }
 0x24d   :  { %v4776_v35 = vpop.eup %4775  ;;  %v2268_v21 = vadd.f32 %v2267_v57, %v2144_v45  ;;  %v2145_v13 = vmul.f32 %v4774_v15, %v6606_v31  ;;  %4789 = vpow2.f32 %v1902_v39  ;;  %v1906_v11 = vmul.f32 1.442695, %v1767_v48  ;;  %v7287_v31 = vld [vmem:[#allocation54_spill] sm:$0xff]  ;;  %v2404_v39 = vld [vmem:[#allocation4 + $0x8] sm:$0xff] }
 0x24e   :  { %v6715_v55 = vadd.f32 %v2293_v41, %v2146_v0  ;;  %v1996_v8 = vadd.f32 1.0, %v4776_v35  ;;  %v1774_v52 = vsub.f32 0.0, %v6712_v51  ;;  %v6726_v38 = vadd.f32 %v7286_v32, %v7260_v43  ;;  %v2403_v45 = vld [vmem:[#allocation4] sm:$0xff]  ;;  %v2452_v35 = vld [vmem:[#allocation4 + $0x188] sm:$0xff] }
 0x24f   :  { %v4778_v40 = vpop.eup %4777  ;;  %v6722_v25 = vadd.f32 %v2280_v30, %v2145_v13  ;;  %4791 = vpow2.f32 %v1906_v11  ;;  %v6730_v63 = vadd.f32 %v7287_v31, %v5812_v33  ;;  %v1776_v14 = vsub.f32 0.0, %v6720_v2  ;;  %v2451_v48 = vld [vmem:[#allocation4 + $0x180] sm:$0xff]  ;;  %v2421_v13 = vld [vmem:[#allocation4 + $0x90] sm:$0xff]  ;;  %v2422_v11 = vld [vmem:[#allocation4 + $0x98] sm:$0xff] }
 0x250   :  { %v2147_v56 = vmul.f32 %v4778_v40, %v6612_v19  ;;  %4793 = vrcp.f32 %v1996_v8  ;;  %v1920_v9 = vmul.f32 1.442695, %v1774_v52  ;;  %v1775_v5 = vsub.f32 0.0, %v6726_v38  ;;  %v7291_v52 = vld [vmem:[#allocation55_spill] sm:$0xff]  ;;  %v2435_v32 = vld [vmem:[#allocation4 + $0x100] sm:$0xff] }
 0x251   :  { %v4780_v61 = vpop.eup %4779  ;;  %v1777_v50 = vsub.f32 0.0, %v6730_v63  ;;  %v6738_v6 = vadd.f32 %v7288_v27, %v7259_v62  ;;  %v6742_v16 = vadd.f32 %v7289_v17, %v5778_v59  ;;  %v1924_v26 = vmul.f32 1.442695, %v1776_v14  ;;  %v2436_v31 = vld [vmem:[#allocation4 + $0x108] sm:$0xff]  ;;  %v2453_v27 = vld [vmem:[#allocation4 + $0x190] sm:$0xff]  ;;  %v2454_v17 = vld [vmem:[#allocation4 + $0x198] sm:$0xff] }
 0x252   :  { %v4782_v60 = vpop.eup %4781  ;;  %v6744_v57 = vadd.f32 %v2306_v37, %v2147_v56  ;;  %v2154_v19 = vmul.f32 %v4780_v61, %v6617_v20  ;;  %4795 = vpow2.f32 %v1920_v9  ;;  %v1922_v59 = vmul.f32 1.442695, %v1775_v5  ;;  %v7290_v37 = vld [vmem:[#allocation56_spill] sm:$0xff]  ;;  %v2406_v5 = vld [vmem:[#allocation4 + $0x18] sm:$0xff] }
 0x253   :  { %v4784_v4 = vpop.eup %4783  ;;  %v1995_v36 = vadd.f32 1.0, %v4782_v60  ;;  %v1784_v41 = vsub.f32 0.0, %v6738_v6  ;;  %4797 = vpow2.f32 %v1924_v26  ;;  %v1786_v20 = vsub.f32 0.0, %v6742_v16  ;;  %v2405_v56 = vld [vmem:[#allocation4 + $0x10] sm:$0xff]  ;;  %v2424_v26 = vld [vmem:[#allocation4 + $0xa8] sm:$0xff] }
 0x254   :  { %v4786_v58 = vpop.eup %4785  ;;  %v6748_v62 = vadd.f32 %v2268_v21, %v2154_v19  ;;  %v1997_v30 = vadd.f32 1.0, %v4784_v4  ;;  %v6753_v0 = vadd.f32 %v7290_v37, %v7260_v43  ;;  %v1926_v21 = vmul.f32 1.442695, %v1777_v50  ;;  %v2437_v4 = vld [vmem:[#allocation4 + $0x110] sm:$0xff] }
 0x255   :  { %4799 = vrcp.f32 %v1995_v36  ;;  %v2004_v15 = vadd.f32 1.0, %v4786_v58  ;;  %v6757_v18 = vadd.f32 %v7291_v52, %v5812_v33  ;;  %v3904_v40 = vpack.c.bf16 %v2420_v42, %v2419_v49  ;;  %v2423_v33 = vld [vmem:[#allocation4 + $0xa0] sm:$0xff]  ;;  %v2426_v52 = vld [vmem:[#allocation4 + $0xb8] sm:$0xff] }
 0x256   :  { %v4788_v8 = vpop.eup %4787  ;;  %4801 = vrcp.f32 %v1997_v30  ;;  %v1940_v61 = vmul.f32 1.442695, %v1784_v41  ;;  %v3906_v43 = vpack.c.bf16 %v2404_v39, %v2403_v45  ;;  %v1785_v50 = vsub.f32 0.0, %v6753_v0  ;;  %v2438_v41 = vld [vmem:[#allocation4 + $0x118] sm:$0xff]  ;;  %v2455_v30 = vld [vmem:[#allocation4 + $0x1a0] sm:$0xff]  ;;  %v2456_v45 = vld [vmem:[#allocation4 + $0x1a8] sm:$0xff] }
 0x257   :  { %v4790_v9 = vpop.eup %4789  ;;  %4803 = vrcp.f32 %v2004_v15  ;;  %v2006_v14 = vadd.f32 1.0, %v4788_v8  ;;  %3905 = vmatprep.subr.bf16.mxu0 %v3904_v40  ;;  %v3936_v19 = vpack.c.bf16 %v2452_v35, %v2451_v48  ;;  %v1944_v49 = vmul.f32 1.442695, %v1786_v20  ;;  %v2407_v48 = vld [vmem:[#allocation4 + $0x20] sm:$0xff]  ;;  %v2408_v35 = vld [vmem:[#allocation4 + $0x28] sm:$0xff] }
 0x258   :  { %v2005_v60 = vadd.f32 1.0, %v4790_v9  ;;  %4805 = vpow2.f32 %v1922_v59  ;;  %3907 = vmatpush3.bf16.msra.mxu0 %v3906_v43  ;;  %v3908_v42 = vpack.c.bf16 %v2422_v11, %v2421_v13  ;;  %v3938_v58 = vpack.c.bf16 %v2436_v31, %v2435_v32  ;;  %v2425_v11 = vld [vmem:[#allocation4 + $0xb0] sm:$0xff]  ;;  %v2440_v43 = vld [vmem:[#allocation4 + $0x128] sm:$0xff] }
 0x259   :  { %v4792_v36 = vpop.eup %4791  ;;  %4807 = vrcp.f32 %v2006_v14  ;;  %v1787_v59 = vsub.f32 0.0, %v6757_v18  ;;  %3937 = vmatprep.subr.bf16.mxu1 %v3936_v19  ;;  %v3910_v37 = vpack.c.bf16 %v2406_v5, %v2405_v56  ;;  %v3940_v20 = vpack.c.bf16 %v2454_v17, %v2453_v27  ;;  %v2439_v14 = vld [vmem:[#allocation4 + $0x120] sm:$0xff]  ;;  %v2458_v27 = vld [vmem:[#allocation4 + $0x1b8] sm:$0xff] }
 0x25a   :  { %v4794_v39 = vpop.eup %4793  ;;  %4809 = vrcp.f32 %v2005_v60  ;;  %v2007_v15 = vadd.f32 1.0, %v4792_v36  ;;  %3909 = vmatprep.subr.bf16.mxu0 %v3908_v42  ;;  %3939 = vmatpush3.bf16.msra.mxu1 %v3938_v58  ;;  %v3912_v13 = vpack.c.bf16 %v2424_v26, %v2423_v33  ;;  %v1942_v32 = vmul.f32 1.442695, %v1785_v50  ;;  %v2409_v50 = vld [vmem:[#allocation4 + $0x30] sm:$0xff]  ;;  %v2410_v33 = vld [vmem:[#allocation4 + $0x38] sm:$0xff]  ;;  %v2427_v36 = vld [vmem:[#allocation4 + $0xc0] sm:$0xff] }
 0x25b   :  { %v2156_v8 = vmul.f32 %v4794_v39, %v6628_v3  ;;  %4811 = vpow2.f32 %v1926_v21  ;;  %v3942_v31 = vpack.c.bf16 %v2438_v41, %v2437_v4  ;;  %v3944_v9 = vpack.c.bf16 %v2456_v45, %v2455_v30  ;;  %3941 = vmatprep.subr.bf16.mxu1 %v3940_v20  ;;  %v2457_v21 = vld [vmem:[#allocation4 + $0x1b0] sm:$0xff]  ;;  %v2428_v42 = vld [vmem:[#allocation4 + $0xc8] sm:$0xff]  ;;  %v2411_v20 = vld [vmem:[#allocation4 + $0x40] sm:$0xff] }
 0x25c   :  { %v4796_v40 = vpop.eup %4795  ;;  %4813 = vrcp.f32 %v2007_v15  ;;  %3911 = vmatpush3.bf16.msra.mxu0 %v3910_v37  ;;  %v3914_v3 = vpack.c.bf16 %v2408_v35, %v2407_v48  ;;  %v1946_v60 = vmul.f32 1.442695, %v1787_v59  ;;  %v3916_v19 = vpack.c.bf16 %v2426_v52, %v2425_v11  ;;  %v2441_v30 = vld [vmem:[#allocation4 + $0x130] sm:$0xff]  ;;  %v2459_v59 = vld [vmem:[#allocation4 + $0x1c0] sm:$0xff]  ;;  %v2460_v37 = vld [vmem:[#allocation4 + $0x1c8] sm:$0xff] }
 0x25d   :  { %v6763_v56 = vadd.f32 %v6715_v55, %v2156_v8  ;;  %v2014_v5 = vadd.f32 1.0, %v4796_v40  ;;  %4815 = vpow2.f32 %v1940_v61  ;;  %v4798_v17 = vpop.eup %4797  ;;  %3913 = vmatprep.subr.bf16.mxu0 %v3912_v13  ;;  %v3946_v55 = vpack.c.bf16 %v2440_v43, %v2439_v14  ;;  %v2412_v13 = vld [vmem:[#allocation4 + $0x48] sm:$0xff]  ;;  %v2443_v43 = vld [vmem:[#allocation4 + $0x140] sm:$0xff] }
 0x25e   :  { %4817 = vpow2.f32 %v1944_v49  ;;  %v2016_v4 = vadd.f32 1.0, %v4798_v17  ;;  %3943 = vmatpush3.bf16.msra.mxu1 %v3942_v31  ;;  %v3948_v41 = vpack.c.bf16 %v2458_v27, %v2457_v21  ;;  %v2442_v49 = vld [vmem:[#allocation4 + $0x138] sm:$0xff]  ;;  %v3918_v15 = vpack.c.bf16 %v2410_v33, %v2409_v50  ;;  %v2461_v27 = vld [vmem:[#allocation4 + $0x1d0] sm:$0xff] }
 0x25f   :  { %v4800_v26 = vpop.eup %4799  ;;  %4819 = vrcp.f32 %v2014_v5  ;;  %3945 = vmatprep.subr.bf16.mxu1 %v3944_v9  ;;  %v2430_v31 = vld [vmem:[#allocation4 + $0xd8] sm:$0xff]  ;;  %v2444_v5 = vld [vmem:[#allocation4 + $0x148] sm:$0xff]  ;;  %v2413_v33 = vld [vmem:[#allocation4 + $0x50] sm:$0xff] }
 0x260   :  { %v4802_v61 = vpop.eup %4801  ;;  %v2155_v58 = vmul.f32 %v4800_v26, %v6663_v54  ;;  %4821 = vpow2.f32 %v1942_v32  ;;  %3915 = vmatpush3.bf16.msra.mxu0 %v3914_v3  ;;  %v3920_v54 = vpack.c.bf16 %v2428_v42, %v2427_v36  ;;  %v2429_v32 = vld [vmem:[#allocation4 + $0xd0] sm:$0xff]  ;;  %v2462_v17 = vld [vmem:[#allocation4 + $0x1d8] sm:$0xff]  ;;  %v2431_v36 = vld [vmem:[#allocation4 + $0xe0] sm:$0xff] }
 0x261   :  { %v4804_v45 = vpop.eup %4803  ;;  %v2157_v39 = vmul.f32 %v4802_v61, %v6669_v1  ;;  %4823 = vrcp.f32 %v2016_v4  ;;  %3917 = vmatprep.subr.bf16.mxu0 %v3916_v19  ;;  %v3950_v1 = vpack.c.bf16 %v2442_v49, %v2441_v30  ;;  %v2432_v42 = vld [vmem:[#allocation4 + $0xe8] sm:$0xff]  ;;  %v2399_v61 = vmul.f32 0.015625, %v2358_v24 }
 0x262   :  { %v4806_v48 = vpop.eup %4805  ;;  %v2282_v35 = vadd.f32 %v6722_v25, %v2155_v58  ;;  %v2164_v8 = vmul.f32 %v4804_v45, %v6673_v47  ;;  %4825 = vpow2.f32 %v1946_v60  ;;  %3947 = vmatpush3.bf16.msra.mxu1 %v3946_v55  ;;  %v3952_v47 = vpack.c.bf16 %v2460_v37, %v2459_v59  ;;  %v2445_v45 = vld [vmem:[#allocation4 + $0x150] sm:$0xff] }
 0x263   :  { %v4808_v11 = vpop.eup %4807  ;;  %v2308_v52 = vadd.f32 %v6744_v57, %v2157_v39  ;;  %v2015_v40 = vadd.f32 1.0, %v4806_v48  ;;  %3949 = vmatprep.subr.bf16.mxu1 %v3948_v41  ;;  %v3922_v57 = vpack.c.bf16 %v2412_v13, %v2411_v20  ;;  %v3956_v49 = vpack.c.bf16 %v2462_v17, %v2461_v27  ;;  %v2446_v39 = vld [vmem:[#allocation4 + $0x158] sm:$0xff]  ;;  %v2463_v48 = vld [vmem:[#allocation4 + $0x1e0] sm:$0xff]  ;;  %v2416_v20 = vld [vmem:[#allocation4 + $0x68] sm:$0xff] }
 0x264   :  { %v4810_v9 = vpop.eup %4809  ;;  %v2270_v14 = vadd.f32 %v6748_v62, %v2164_v8  ;;  %v2166_v25 = vmul.f32 %v4808_v11, %v6688_v10  ;;  %3919 = vmatpush3.bf16.msra.mxu0 %v3918_v15  ;;  %v3924_v62 = vpack.c.bf16 %v2430_v31, %v2429_v32  ;;  %v2414_v10 = vld [vmem:[#allocation4 + $0x58] sm:$0xff]  ;;  %v6784_v53 = vrot.slane %v2399_v61, %v6382_v44  ;;  %v2465_v27 = vld [vmem:[#allocation4 + $0x1f0] sm:$0xff] }
 0x265   :  { %v4812_v3 = vpop.eup %4811  ;;  %v2165_v21 = vmul.f32 %v4810_v9, %v6693_v46  ;;  %4827 = vrcp.f32 %v2015_v40  ;;  %3921 = vmatprep.subr.bf16.mxu0 %v3920_v54  ;;  %v3954_v46 = vpack.c.bf16 %v2444_v5, %v2443_v43  ;;  %v3926_v37 = vpack.c.bf16 %v2414_v10, %v2413_v33  ;;  %v2415_v54 = vld [vmem:[#allocation4 + $0x60] sm:$0xff]  ;;  %v2434_v32 = vld [vmem:[#allocation4 + $0xf8] sm:$0xff]  ;;  %v2448_v5 = vld [vmem:[#allocation4 + $0x168] sm:$0xff] }
 0x266   :  { %v4814_v60 = vpop.eup %4813  ;;  %v2296_v19 = vadd.f32 %v6763_v56, %v2166_v25  ;;  %v2017_v50 = vadd.f32 1.0, %v4812_v3  ;;  %3951 = vmatpush3.bf16.msra.mxu1 %v3950_v1  ;;  %v7292_v56 = vld [vmem:[#allocation60_spill] sm:$0xff]  ;;  %v3928_v8 = vpack.c.bf16 %v2432_v42, %v2431_v36  ;;  %v2573_v13 = vcombine.high %v2399_v61, %v2399_v61  ;;  %v2447_v43 = vld [vmem:[#allocation4 + $0x160] sm:$0xff]  ;;  %v2466_v17 = vld [vmem:[#allocation4 + $0x1f8] sm:$0xff] }
 0x267   :  { %v4816_v26 = vpop.eup %4815  ;;  %v6774_v4 = vadd.f32 %v2282_v35, %v2165_v21  ;;  %v2167_v55 = vmul.f32 %v4814_v60, %v6699_v34  ;;  %v1257_v41 = vrot.slane %v7292_v56, 4  ;;  %3953 = vmatprep.subr.bf16.mxu1 %v3952_v47  ;;  %v2464_v35 = vld [vmem:[#allocation4 + $0x1e8] sm:$0xff]  ;;  %v3958_v40 = vpack.c.bf16 %v2446_v39, %v2445_v45  ;;  %v2433_v1 = vld [vmem:[#allocation4 + $0xf0] sm:$0xff]  ;;  %v2515_v39 = vld [vmem:[#allocation4 + $0x380] sm:$0xff] }
 0x268   :  { %v4818_v58 = vpop.eup %4817  ;;  %4829 = vrcp.f32 %v2017_v50  ;;  %v2024_v30 = vadd.f32 1.0, %v4816_v26  ;;  %3923 = vmatpush3.bf16.msra.mxu0 %v3922_v57  ;;  %v2588_v31 = vcombine.high %v6784_v53, %v6784_v53  ;;  %v3960_v47 = vpack.c.bf16 %v2464_v35, %v2463_v48  ;;  %v2417_v50 = vld [vmem:[#allocation4 + $0x70] sm:$0xff]  ;;  %v2467_v35 = vld [vmem:[#allocation4 + $0x200] sm:$0xff] }
 0x269   :  { %v4820_v15 = vpop.eup %4819  ;;  %v6781_v59 = vadd.f32 %v2308_v52, %v2167_v55  ;;  %v2026_v34 = vadd.f32 1.0, %v4818_v58  ;;  %3925 = vmatprep.subr.bf16.mxu0 %v3924_v62  ;;  %v6793_v3 = vrot.slane %v2573_v13, %v6382_v44  ;;  %v3930_v57 = vpack.c.bf16 %v2416_v20, %v2415_v54  ;;  %v2483_v55 = vld [vmem:[#allocation4 + $0x280] sm:$0xff]  ;;  %v2449_v61 = vld [vmem:[#allocation4 + $0x170] sm:$0xff]  ;;  %v2450_v58 = vld [vmem:[#allocation4 + $0x178] sm:$0xff] }
 0x26a   :  { %v4822_v23 = vpop.eup %4821  ;;  %v2174_v24 = vmul.f32 %v4820_v15, %v6712_v51  ;;  %4831 = vrcp.f32 %v2024_v30  ;;  %3955 = vmatpush3.bf16.msra.mxu1 %v3954_v46  ;;  %2689 = vmatprep.mubr.f32.mxu0 %v2588_v31  ;;  %v1283_v10 = vrot.slane %v6369_v7, 4  ;;  %v3962_v26 = vpack.c.bf16 %v2448_v5, %v2447_v43  ;;  %v2484_v46 = vld [vmem:[#allocation4 + $0x288] sm:$0xff]  ;;  %v7293_v30 = vld [vmem:[#allocation22_spill] sm:$0xff]  ;;  %v2485_v54 = vld [vmem:[#allocation4 + $0x290] sm:$0xff] }
 0x26b   :  { %v4824_v11 = vpop.eup %4823  ;;  %4833 = vrcp.f32 %v2026_v34  ;;  %v2025_v52 = vadd.f32 1.0, %v4822_v23  ;;  %3957 = vmatprep.subr.bf16.mxu1 %v3956_v49  ;;  %v2589_v62 = vcombine.high %v6793_v3, %v6793_v3  ;;  %v1258_v36 = vadd.f32 %v1257_v41, %v7292_v56  ;;  %v2516_v15 = vld [vmem:[#allocation4 + $0x388] sm:$0xff]  ;;  %v7294_v41 = vld [vmem:[#allocation58_spill] sm:$0xff]  ;;  %v2486_v20 = vld [vmem:[#allocation4 + $0x298] sm:$0xff] }
 0x26c   :  { %v4826_v9 = vpop.eup %4825  ;;  %v6789_v25 = vadd.f32 %v2270_v14, %v2174_v24  ;;  %v2176_v51 = vmul.f32 %v4824_v11, %v6720_v2  ;;  %3927 = vmatpush3.bf16.msra.mxu0 %v3926_v37  ;;  %v3932_v14 = vpack.c.bf16 %v2434_v32, %v2433_v1  ;;  %v2418_v2 = vld [vmem:[#allocation4 + $0x78] sm:$0xff]  ;;  %v3964_v42 = vpack.c.bf16 %v2466_v17, %v2465_v27  ;;  %v2468_v56 = vld [vmem:[#allocation4 + $0x208] sm:$0xff]  ;;  %v2469_v5 = vld [vmem:[#allocation4 + $0x210] sm:$0xff] }
 0x26d   :  { %4835 = vrcp.f32 %v2025_v52  ;;  %v2027_v21 = vadd.f32 1.0, %v4826_v9  ;;  %3929 = vmatprep.subr.bf16.mxu0 %v3928_v8  ;;  %2759 = vmatprep.mubr.f32.mxu1 %v2589_v62  ;;  %v1270_v49 = vrot.slane %v7293_v30, 4  ;;  %v3934_v45 = vpack.c.bf16 %v2418_v2, %v2417_v50  ;;  %v2487_v50 = vld [vmem:[#allocation4 + $0x2a0] sm:$0xff] }
 0x26e   :  { %v6795_v60 = vadd.f32 %v2296_v19, %v2176_v51  ;;  %3959 = vmatpush3.bf16.msra.mxu1 %v3958_v40  ;;  %v3968_v48 = vpack.c.bf16 %v2484_v46, %v2483_v55  ;;  %v1296_v23 = vrot.slane %v7294_v41, 4  ;;  %v3966_v8 = vpack.c.bf16 %v2450_v58, %v2449_v61  ;;  %v2499_v40 = vld [vmem:[#allocation4 + $0x300] sm:$0xff]  ;;  %v2518_v51 = vld [vmem:[#allocation4 + $0x398] sm:$0xff]  ;;  %v2520_v61 = vld [vmem:[#allocation4 + $0x3a8] sm:$0xff] }
 0x26f   :  { %v4828_v33 = vpop.eup %4827  ;;  %4837 = vrcp.f32 %v2027_v21  ;;  %3961 = vmatprep.subr.bf16.mxu1 %v3960_v47  ;;  %v1259_v11 = vrot.slane %v1258_v36, 2  ;;  %v4000_v52 = vpack.c.bf16 %v2516_v15, %v2515_v39  ;;  %v1271_v32 = vadd.f32 %v1270_v49, %v7293_v30  ;;  %v2470_v21 = vld [vmem:[#allocation4 + $0x218] sm:$0xff]  ;;  %v2472_v49 = vld [vmem:[#allocation4 + $0x228] sm:$0xff] }
 0x270   :  { %v2175_v19 = vmul.f32 %v4828_v33, %v6726_v38  ;;  %3931 = vmatpush3.bf16.msra.mxu0 %v3930_v57  ;;  %v1284_v38 = vadd.f32 %v1283_v10, %v6369_v7  ;;  %v3970_v9 = vpack.c.bf16 %v2468_v56, %v2467_v35  ;;  %v3972_v43 = vpack.c.bf16 %v2486_v20, %v2485_v54  ;;  %v2501_v33 = vld [vmem:[#allocation4 + $0x310] sm:$0xff]  ;;  %v2502_v10 = vld [vmem:[#allocation4 + $0x318] sm:$0xff] }
 0x271   :  { %3933 = vmatprep.subr.bf16.mxu0 %v3932_v14  ;;  %v1297_v17 = vadd.f32 %v1296_v23, %v7294_v41  ;;  %v1260_v55 = vadd.f32 %v1259_v11, %v1258_v36  ;;  %v1272_v46 = vrot.slane %v1271_v32, 2  ;;  %v4006_v36 = vpack.c.bf16 %v2502_v10, %v2501_v33  ;;  %v2503_v23 = vld [vmem:[#allocation4 + $0x320] sm:$0xff]  ;;  %v2521_v20 = vld [vmem:[#allocation4 + $0x3b0] sm:$0xff] }
 0x272   :  { %v4830_v34 = vpop.eup %4829  ;;  %v2284_v37 = vadd.f32 %v6774_v4, %v2175_v19  ;;  %3963 = vmatpush3.bf16.msra.mxu1 %v3962_v26  ;;  %v2500_v4 = vld [vmem:[#allocation4 + $0x308] sm:$0xff]  ;;  %v1285_v27 = vrot.slane %v1284_v38, 2 }
 0x273   :  { %v2177_v24 = vmul.f32 %v4830_v34, %v6730_v63  ;;  %3965 = vmatprep.subr.bf16.mxu1 %v3964_v42  ;;  %v2517_v63 = vld [vmem:[#allocation4 + $0x390] sm:$0xff]  ;;  %v2519_v42 = vld [vmem:[#allocation4 + $0x3a0] sm:$0xff]  ;;  %v1298_v39 = vrot.slane %v1297_v17, 2 }
 0x274   :  { %v4832_v13 = vpop.eup %4831  ;;  %3935 = vmatpush3.bf16.msra.mxu0 %v3934_v45  ;;  %v1286_v45 = vadd.f32 %v1285_v27, %v1284_v38  ;;  %v2489_v34 = vld [vmem:[#allocation4 + $0x2b0] sm:$0xff]  ;;  %v2522_v38 = vld [vmem:[#allocation4 + $0x3b8] sm:$0xff] }
 0x275   :  { %v4834_v1 = vpop.eup %4833  ;;  %v2310_v31 = vadd.f32 %v6781_v59, %v2177_v24  ;;  %v2184_v7 = vmul.f32 %v4832_v13, %v6738_v6  ;;  %3969 = vmatprep.subr.bf16.mxu0 %v3968_v48  ;;  %v4002_v59 = vpack.c.bf16 %v2500_v4, %v2499_v40  ;;  %v2488_v6 = vld [vmem:[#allocation4 + $0x2a8] sm:$0xff]  ;;  %v2490_v48 = vld [vmem:[#allocation4 + $0x2b8] sm:$0xff]  ;;  %v1261_v24 = vrot.slane %v1260_v55, 1  ;;  %v2473_v4 = vld [vmem:[#allocation4 + $0x230] sm:$0xff] }
 0x276   :  { %v2186_v47 = vmul.f32 %v4834_v1, %v6742_v16  ;;  %3967 = vmatpush3.bf16.msra.mxu1 %v3966_v8  ;;  %v4004_v16 = vpack.c.bf16 %v2518_v51, %v2517_v63  ;;  %v3980_v40 = vpack.c.bf16 %v2490_v48, %v2489_v34  ;;  %v2474_v1 = vld [vmem:[#allocation4 + $0x238] sm:$0xff]  ;;  %v2491_v51 = vld [vmem:[#allocation4 + $0x2c0] sm:$0xff]  ;;  %v2525_v48 = vld [vmem:[#allocation4 + $0x3d0] sm:$0xff] }
 0x277   :  { %v4836_v57 = vpop.eup %4835  ;;  %v2272_v14 = vadd.f32 %v6789_v25, %v2184_v7  ;;  %2690 = vmatmul.mubr.f32.vlgmr.msra.gmra.mrb[80].mxu0 %v6784_v53  ;;  %4001 = vmatprep.subr.bf16.mxu1 %v4000_v52  ;;  %v3974_v25 = vpack.c.bf16 %v2470_v21, %v2469_v5  ;;  %v2471_v53 = vld [vmem:[#allocation4 + $0x220] sm:$0xff]  ;;  %v1287_v7 = vrot.slane %v1286_v45, 1  ;;  %v4012_v21 = vpack.c.bf16 %v2522_v38, %v2521_v20  ;;  %v2506_v27 = vld [vmem:[#allocation4 + $0x338] sm:$0xff] }
 0x278   :  { %v2298_v2 = vadd.f32 %v6795_v60, %v2186_v47  ;;  %v2185_v62 = vmul.f32 %v4836_v57, %v6753_v0  ;;  %3971 = vmatpush3.bf16.msra.mxu0 %v3970_v9  ;;  %v3976_v0 = vpack.c.bf16 %v2488_v6, %v2487_v50  ;;  %v3978_v54 = vpack.c.bf16 %v2472_v49, %v2471_v53  ;;  %v2492_v47 = vld [vmem:[#allocation4 + $0x2c8] sm:$0xff]  ;;  %v2505_v57 = vld [vmem:[#allocation4 + $0x330] sm:$0xff]  ;;  %v2507_v49 = vld [vmem:[#allocation4 + $0x340] sm:$0xff] }
 0x279   :  { %v4838_v26 = vpop.eup %4837  ;;  %v2273_v19 = vrot.slane %v2272_v14, 4  ;;  %2760 = vmatmul.mubr.f32.vlgmr.msra.gmra.mrb[80].mxu1 %v6793_v3  ;;  %3973 = vmatprep.subr.bf16.mxu0 %v3972_v43  ;;  %v1273_v3 = vadd.f32 %v1272_v46, %v1271_v32  ;;  %v3982_v6 = vpack.c.bf16 %v2474_v1, %v2473_v4  ;;  %v3984_v10 = vpack.c.bf16 %v2492_v47, %v2491_v51  ;;  %v2476_v46 = vld [vmem:[#allocation4 + $0x248] sm:$0xff]  ;;  %v2527_v1 = vld [vmem:[#allocation4 + $0x3e0] sm:$0xff] }
 0x27a   :  { %v2299_v58 = vrot.slane %v2298_v2, 4  ;;  %v2285_v30 = vadd.f32 %v2284_v37, %v2185_v62  ;;  %v2187_v60 = vmul.f32 %v4838_v26, %v6757_v18  ;;  %4003 = vmatpush3.bf16.msra.mxu1 %v4002_v59  ;;  %v4008_v37 = vpack.c.bf16 %v2520_v61, %v2519_v42  ;;  %v2504_v18 = vld [vmem:[#allocation4 + $0x328] sm:$0xff]  ;;  %v2475_v26 = vld [vmem:[#allocation4 + $0x240] sm:$0xff] }
 0x27b   :  { %v2274_v15 = vadd.f32 %v2273_v19, %v2272_v14  ;;  %4005 = vmatprep.subr.bf16.mxu1 %v4004_v16  ;;  %v4010_v63 = vpack.c.bf16 %v2504_v18, %v2503_v23  ;;  %v1262_v14 = vadd.f32 %v1261_v24, %v1260_v55  ;;  %v1274_v59 = vrot.slane %v1273_v3, 1  ;;  %v2524_v62 = vld [vmem:[#allocation4 + $0x3c8] sm:$0xff]  ;;  %v2494_v55 = vld [vmem:[#allocation4 + $0x2d8] sm:$0xff]  ;;  %v2477_v23 = vld [vmem:[#allocation4 + $0x250] sm:$0xff] }
 0x27c   :  { %v2300_v35 = vadd.f32 %v2299_v58, %v2298_v2  ;;  %v2286_v56 = vrot.slane %v2285_v30, 4  ;;  %v2311_v41 = vadd.f32 %v2310_v31, %v2187_v60  ;;  %3975 = vmatpush3.bf16.msra.mxu0 %v3974_v25  ;;  %v1299_v31 = vadd.f32 %v1298_v39, %v1297_v17  ;;  %v2523_v2 = vld [vmem:[#allocation4 + $0x3c0] sm:$0xff]  ;;  %v2493_v58 = vld [vmem:[#allocation4 + $0x2d0] sm:$0xff]  ;;  %v2508_v39 = vld [vmem:[#allocation4 + $0x348] sm:$0xff] }
 0x27d   :  { %v2275_v8 = vrot.slane %v2274_v15, 2  ;;  %3977 = vmatprep.subr.bf16.mxu0 %v3976_v0  ;;  %v1288_v19 = vadd.f32 %v1287_v7, %v1286_v45  ;;  %v4014_v61 = vpack.c.bf16 %v2506_v27, %v2505_v57  ;;  %v4016_v53 = vpack.c.bf16 %v2524_v62, %v2523_v2  ;;  %v2526_v45 = vld [vmem:[#allocation4 + $0x3d8] sm:$0xff]  ;;  %v2528_v7 = vld [vmem:[#allocation4 + $0x3e8] sm:$0xff]  ;;  %v2479_v51 = vld [vmem:[#allocation4 + $0x260] sm:$0xff] }
 0x27e   :  { %v2301_v13 = vrot.slane %v2300_v35, 2  ;;  %v2287_v11 = vadd.f32 %v2286_v56, %v2285_v30  ;;  %v2312_v52 = vrot.slane %v2311_v41, 4  ;;  %4007 = vmatpush3.bf16.msra.mxu1 %v4006_v36  ;;  %v1300_v25 = vrot.slane %v1299_v31, 1  ;;  %v2478_v18 = vld [vmem:[#allocation4 + $0x258] sm:$0xff]  ;;  %v2480_v47 = vld [vmem:[#allocation4 + $0x268] sm:$0xff] }
 0x27f   :  { %v2276_v9 = vadd.f32 %v2275_v8, %v2274_v15  ;;  %4009 = vmatprep.subr.bf16.mxu1 %v4008_v37  ;;  %v1275_v15 = vadd.f32 %v1274_v59, %v1273_v3  ;;  %v3986_v34 = vpack.c.bf16 %v2476_v46, %v2475_v26  ;;  %v3988_v37 = vpack.c.bf16 %v2494_v55, %v2493_v58  ;;  %v2495_v8 = vld [vmem:[#allocation4 + $0x2e0] sm:$0xff]  ;;  %v2498_v57 = vld [vmem:[#allocation4 + $0x2f8] sm:$0xff]  ;;  %v2548_v46 = vld [vmem:[#allocation4 + $0x488] sm:$0xff] }
 0x280   :  { %v2302_v32 = vadd.f32 %v2301_v13, %v2300_v35  ;;  %v2288_v43 = vrot.slane %v2287_v11, 2  ;;  %v2313_v5 = vadd.f32 %v2312_v52, %v2311_v41  ;;  %3979 = vmatpush3.bf16.msra.mxu0 %v3978_v54  ;;  %v4018_v24 = vpack.c.bf16 %v2508_v39, %v2507_v49  ;;  %v2496_v54 = vld [vmem:[#allocation4 + $0x2e8] sm:$0xff]  ;;  %v2510_v52 = vld [vmem:[#allocation4 + $0x358] sm:$0xff]  ;;  %v2511_v59 = vld [vmem:[#allocation4 + $0x360] sm:$0xff] }
 0x281   :  { %v2277_v50 = vrot.slane %v2276_v9, 1  ;;  %3981 = vmatprep.subr.bf16.mxu0 %v3980_v40  ;;  %v1301_v20 = vadd.f32 %v1300_v25, %v1299_v31  ;;  %v4020_v13 = vpack.c.bf16 %v2526_v45, %v2525_v48  ;;  %v3990_v4 = vpack.c.bf16 %v2478_v18, %v2477_v23  ;;  %v2320_v27 = vld [vmem:[#allocation2 + $0x10] sm:$0xf]  ;;  %v2547_v26 = vld [vmem:[#allocation4 + $0x480] sm:$0xff]  ;;  %v2513_v25 = vld [vmem:[#allocation4 + $0x370] sm:$0xff] }
 0x282   :  { %v2303_v17 = vrot.slane %v2302_v32, 1  ;;  %v2289_v16 = vadd.f32 %v2288_v43, %v2287_v11  ;;  %v2314_v33 = vrot.slane %v2313_v5, 2  ;;  %4011 = vmatpush3.bf16.msra.mxu1 %v4010_v63  ;;  %v2509_v11 = vld [vmem:[#allocation4 + $0x350] sm:$0xff]  ;;  %v3992_v63 = vpack.c.bf16 %v2496_v54, %v2495_v8  ;;  %v2552_v23 = vld [vmem:[#allocation4 + $0x4a8] sm:$0xff] }
 0x283   :  { %v2278_v42 = vadd.f32 %v2277_v50, %v2276_v9  ;;  %4013 = vmatprep.subr.bf16.mxu1 %v4012_v21  ;;  %v2367_v31 = vrot.slane %v2359_v29, %v6382_v44  ;;  %v2497_v21 = vld [vmem:[#allocation4 + $0x2f0] sm:$0xff]  ;;  %v2512_v50 = vld [vmem:[#allocation4 + $0x368] sm:$0xff]  ;;  %v3994_v62 = vpack.c.bf16 %v2480_v47, %v2479_v51  ;;  %v4032_v55 = vpack.c.bf16 %v2548_v46, %v2547_v26  ;;  %v2997_v26 = vld [vmem:[#allocation6] sm:$0xff] }
 0x284   :  { %v2304_v30 = vadd.f32 %v2303_v17, %v2302_v32  ;;  %v2290_v60 = vrot.slane %v2289_v16, 1  ;;  %v2315_v0 = vadd.f32 %v2314_v33, %v2313_v5  ;;  %3983 = vmatpush3.bf16.msra.mxu0 %v3982_v6  ;;  %v4022_v5 = vpack.c.bf16 %v2510_v52, %v2509_v11  ;;  %v2529_v17 = vld [vmem:[#allocation4 + $0x3f0] sm:$0xff]  ;;  %v2554_v11 = vld [vmem:[#allocation4 + $0x4b8] sm:$0xff]  ;;  %v2998_v46 = vld [vmem:[#allocation6 + $0x8] sm:$0xff] }
 0x285   :  { %v2328_v36 = vsel %vm2321_vm3, %v1262_v14, %v2278_v42  ;;  %3985 = vmatprep.subr.bf16.mxu0 %v3984_v10  ;;  %v4024_v14 = vpack.c.bf16 %v2528_v7, %v2527_v1  ;;  %v3996_v28 = vpack.c.bf16 %v2498_v57, %v2497_v21  ;;  %v2481_v29 = vld [vmem:[#allocation4 + $0x270] sm:$0xff]  ;;  %v4026_v10 = vpack.c.bf16 %v2512_v50, %v2511_v59  ;;  %v2514_v42 = vld [vmem:[#allocation4 + $0x378] sm:$0xff]  ;;  %v2560_v59 = vld [vmem:[#allocation4 + $0x4e8] sm:$0xff] }
 0x286   :  { %v2330_v35 = vsel %vm2321_vm3, %v1288_v19, %v2304_v30  ;;  %v2291_v56 = vadd.f32 %v2290_v60, %v2289_v16  ;;  %v2316_v41 = vrot.slane %v2315_v0, 1  ;;  %4015 = vmatpush3.bf16.msra.mxu1 %v4014_v61  ;;  %v2482_v16 = vld [vmem:[#allocation4 + $0x278] sm:$0xff]  ;;  %v4028_v19 = vpack.c.bf16 %v2530_v12, %v2529_v17  ;;  %v2531_v30 = vld [vmem:[#allocation4 + $0x400] sm:$0xff]  ;;  %v2532_v60 = vld [vmem:[#allocation4 + $0x408] sm:$0xff] }
 0x287   :  { %4017 = vmatprep.subr.bf16.mxu1 %v4016_v53  ;;  %v3998_v61 = vpack.c.bf16 %v2482_v16, %v2481_v29  ;;  %v4030_v53 = vpack.c.bf16 %v2514_v42, %v2513_v25  ;;  %v2549_v39 = vld [vmem:[#allocation4 + $0x490] sm:$0xff]  ;;  %v2538_v7 = vld [vmem:[#allocation4 + $0x438] sm:$0xff] }
 0x288   :  { %v2329_v3 = vsel %vm2321_vm3, %v1275_v15, %v2291_v56  ;;  %v2317_v38 = vadd.f32 %v2316_v41, %v2315_v0  ;;  %3987 = vmatpush3.bf16.msra.mxu0 %v3986_v34  ;;  %v2550_v15 = vld [vmem:[#allocation4 + $0x498] sm:$0xff]  ;;  %v4034_v34 = vpack.c.bf16 %v2532_v60, %v2531_v30  ;;  %v2537_v1 = vld [vmem:[#allocation4 + $0x430] sm:$0xff] }
 0x289   :  { %v2360_v40 = vcombine.low %v2328_v36, %v2329_v3  ;;  %3989 = vmatprep.subr.bf16.mxu0 %v3988_v37  ;;  %v4036_v45 = vpack.c.bf16 %v2550_v15, %v2549_v39  ;;  %v2534_v56 = vld [vmem:[#allocation4 + $0x418] sm:$0xff]  ;;  %v2551_v37 = vld [vmem:[#allocation4 + $0x4a0] sm:$0xff]  ;;  %v2536_v3 = vld [vmem:[#allocation4 + $0x428] sm:$0xff]  ;;  %v4046_v51 = vpack.c.bf16 %v2538_v7, %v2537_v1 }
 0x28a   :  { %v2331_v9 = vsel %vm2321_vm3, %v1301_v20, %v2317_v38  ;;  %4019 = vmatpush3.bf16.msra.mxu1 %v4018_v24  ;;  %v4040_v54 = vpack.c.bf16 %v2552_v23, %v2551_v37  ;;  %v2535_v20 = vld [vmem:[#allocation4 + $0x420] sm:$0xff]  ;;  %v2541_v57 = vld [vmem:[#allocation4 + $0x450] sm:$0xff]  ;;  %v2562_v12 = vld [vmem:[#allocation4 + $0x4f8] sm:$0xff] }
 0x28b   :  { %v2374_v32 = vrot.slane %v2360_v40, %v6382_v44  ;;  %v2376_v43 = vcombine.low %v2330_v35, %v2331_v9  ;;  %4021 = vmatprep.subr.bf16.mxu1 %v4020_v13  ;;  %v2533_v35 = vld [vmem:[#allocation4 + $0x410] sm:$0xff]  ;;  %v4042_v40 = vpack.c.bf16 %v2536_v3, %v2535_v20  ;;  %v2555_v9 = vld [vmem:[#allocation4 + $0x4c0] sm:$0xff]  ;;  %v3000_v30 = vld [vmem:[#allocation6 + $0x18] sm:$0xff] }
 0x28c   :  { %3991 = vmatpush3.bf16.msra.mxu0 %v3990_v4  ;;  %v4038_v8 = vpack.c.bf16 %v2534_v56, %v2533_v35  ;;  %v2553_v13 = vld [vmem:[#allocation4 + $0x4b0] sm:$0xff]  ;;  %v3001_v39 = vld [vmem:[#allocation6 + $0x20] sm:$0xff]  ;;  %v3002_v15 = vld [vmem:[#allocation6 + $0x28] sm:$0xff] }
 0x28d   :  { %v2375_v6 = vcombine.low %v2367_v31, %v2374_v32  ;;  %v2383_v2 = vrot.slane %v2376_v43, %v6382_v44  ;;  %3993 = vmatprep.subr.bf16.mxu0 %v3992_v63  ;;  %v4044_v4 = vpack.c.bf16 %v2554_v11, %v2553_v13  ;;  %v2556_v63 = vld [vmem:[#allocation4 + $0x4c8] sm:$0xff]  ;;  %v2539_v31 = vld [vmem:[#allocation4 + $0x440] sm:$0xff]  ;;  %v2557_v43 = vld [vmem:[#allocation4 + $0x4d0] sm:$0xff] }
 0x28e   :  { %4023 = vmatpush3.bf16.msra.mxu1 %v4022_v5  ;;  %v4048_v47 = vpack.c.bf16 %v2556_v63, %v2555_v9  ;;  %v2540_v32 = vld [vmem:[#allocation4 + $0x448] sm:$0xff]  ;;  %v2561_v17 = vld [vmem:[#allocation4 + $0x4f0] sm:$0xff]  ;;  %v3004_v56 = vld [vmem:[#allocation6 + $0x38] sm:$0xff] }
 0x28f   :  { %v2389_v33 = vadd.f32 %v2383_v2, %v2320_v27  ;;  %4025 = vmatprep.subr.bf16.mxu1 %v4024_v14  ;;  %v2400_v58 = vmul.f32 0.015625, %v2375_v6  ;;  %v4050_v5 = vpack.c.bf16 %v2540_v32, %v2539_v31  ;;  %v2542_v27 = vld [vmem:[#allocation4 + $0x458] sm:$0xff]  ;;  %v2559_v14 = vld [vmem:[#allocation4 + $0x4e0] sm:$0xff]  ;;  %v4060_v29 = vpack.c.bf16 %v2562_v12, %v2561_v17  ;;  %v2545_v16 = vld [vmem:[#allocation4 + $0x470] sm:$0xff] }
 0x290   :  { %3995 = vmatpush3.bf16.msra.mxu0 %v3994_v62  ;;  %v4054_v50 = vpack.c.bf16 %v2542_v27, %v2541_v57  ;;  %v4056_v6 = vpack.c.bf16 %v2560_v59, %v2559_v14  ;;  %v2543_v2 = vld [vmem:[#allocation4 + $0x460] sm:$0xff]  ;;  %v2544_v62 = vld [vmem:[#allocation4 + $0x468] sm:$0xff]  ;;  %v2982_v42 = vld [vmem:[%s7020_s6 + $0x8] sm:$0xff] }
 0x291   :  { %2392 = vst [vmem:[#allocation2 + $0x10] sm:$0xf] %v2389_v33  ;;  %3997 = vmatprep.subr.bf16.mxu0 %v3996_v28  ;;  %v2597_v0 = vrot.slane %v2400_v58, %v6382_v44  ;;  %v2590_v49 = vcombine.high %v2400_v58, %v2400_v58  ;;  %v4058_v28 = vpack.c.bf16 %v2544_v62, %v2543_v2  ;;  %v2546_v33 = vld [vmem:[#allocation4 + $0x478] sm:$0xff]  ;;  %v2981_v25 = vld [vmem:[%s7020_s6] sm:$0xff]  ;;  %v2988_v23 = vld [vmem:[%s7020_s6 + $0x38] sm:$0xff] }
 0x292   :  { %4027 = vmatpush3.bf16.msra.mxu1 %v4026_v10  ;;  %v4062_v10 = vpack.c.bf16 %v2546_v33, %v2545_v16  ;;  %v4089_v58 = vpack.c.bf16 %v2982_v42, %v2981_v25  ;;  %v3003_v35 = vld [vmem:[#allocation6 + $0x30] sm:$0xff]  ;;  %v2987_v37 = vld [vmem:[%s7020_s6 + $0x30] sm:$0xff]  ;;  %v3010_v9 = vld [vmem:[#allocation6 + $0x68] sm:$0xff] }
 0x293   :  { %4029 = vmatprep.subr.bf16.mxu1 %v4028_v19  ;;  %v2605_v36 = vcombine.high %v2597_v0, %v2597_v0  ;;  %v2604_v48 = vrot.slane %v2590_v49, %v6382_v44  ;;  %v4065_v19 = vpack.c.bf16 %v2998_v46, %v2997_v26  ;;  %v2989_v20 = vld [vmem:[%s7020_s6 + $0x40] sm:$0xff]  ;;  %v2990_v3 = vld [vmem:[%s7020_s6 + $0x48] sm:$0xff]  ;;  %v3009_v7 = vld [vmem:[#allocation6 + $0x60] sm:$0xff] }
 0x294   :  { %3999 = vmatpush3.bf16.msra.mxu0 %v3998_v61  ;;  %v4911_v61 = vmov 0.0|0.0   ;;  %v3007_v13 = vld [vmem:[#allocation6 + $0x50] sm:$0xff]  ;;  %v3008_v11 = vld [vmem:[#allocation6 + $0x58] sm:$0xff]  ;;  %v4083_v63 = vpack.c.bf16 %v3010_v9, %v3009_v7  ;;  %v2402_v27 = vld [vmem:[%s7015_s1] sm:$0x3] }
 0x295   :  { %4033 = vmatprep.subr.bf16.mxu0 %v4032_v55  ;;  %2829 = vmatprep.mubr.f32.mxu0 %v2605_v36  ;;  %v2606_v41 = vcombine.high %v2604_v48, %v2604_v48  ;;  %v2999_v55 = vld [vmem:[#allocation6 + $0x10] sm:$0xff]  ;;  %v4071_v36 = vpack.c.bf16 %v3002_v15, %v3001_v39  ;;  %v3528_v59 = vld [vmem:[%s7019_s5] ss:$0 sm:$0xff]  ;;  %v3181_v9 = vld [vmem:[%s7023_s9 + $0x70] sm:$0xff] }
 0x296   :  { %4031 = vmatpush3.bf16.msra.mxu1 %v4030_v53  ;;  %v4068_v60 = vpack.c.bf16 %v3000_v30, %v2999_v55  ;;  %v2984_v53 = vld [vmem:[%s7020_s6 + $0x18] sm:$0xff]  ;;  %v3011_v32 = vld [vmem:[#allocation6 + $0x70] sm:$0xff] }
 0x297   :  { %2830 = vmatmul.mubr.f32.vlgmr.msra.gmra.mrb[82].mxu0 %v2597_v0  ;;  %2899 = vmatprep.mubr.f32.mxu1 %v2606_v41  ;;  %v2983_v0 = vld [vmem:[%s7020_s6 + $0x10] sm:$0xff]  ;;  %v4074_v41 = vpack.c.bf16 %v3004_v56, %v3003_v35 }
 0x298   :  { %v2398_v18 = vld [vmem:[#allocation2 + $0x10] sm:$0xf]  ;;  %4035 = vmatpush3.bf16.msra.mxu0 %v4034_v34  ;;  %4064 = vmatprep.subr.bf16.mxu1 %v4911_v61  ;;  %v4092_v49 = vpack.c.bf16 %v2984_v53, %v2983_v0  ;;  %v2985_v34 = vld [vmem:[%s7020_s6 + $0x20] sm:$0xff] }
 0x299   :  { %v2401_v24 = vmul.f32 0.015625, %v2398_v18  ;;  %2900 = vmatmul.mubr.f32.vlgmr.msra.gmra.mrb[82].mxu1 %v2604_v48  ;;  %4037 = vmatprep.subr.bf16.mxu0 %v4036_v45  ;;  %v2986_v48 = vld [vmem:[%s7020_s6 + $0x28] sm:$0xff]  ;;  %v4098_v18 = vpack.c.bf16 %v2988_v23, %v2987_v37  ;;  %v3169_v56 = vld [vmem:[%s7023_s9 + $0x10] sm:$0xff]  ;;  %v3171_v23 = vld [vmem:[%s7023_s9 + $0x20] sm:$0xff] }
 0x29a   :  { %4066 = vmatpush3.bf16.msra.mxu1 %v4065_v19  ;;  %v4095_v45 = vpack.c.bf16 %v2986_v48, %v2985_v34  ;;  %3805 = vmatprep.mubr.msk.f32.mxu1 %vm4912_vm4, %v4910_v22  ;;  %v3167_v48 = vld [vmem:[%s7023_s9] sm:$0xff] }
 0x29b   :  { %v2613_v38 = vrot.slane %v2401_v24, %v6382_v44  ;;  %v2558_v44 = vld [vmem:[#allocation4 + $0x4d8] sm:$0xff]  ;;  %4067 = vmatprep.subr.bf16.mxu1 %v4911_v61  ;;  %v3005_v24 = vld [vmem:[#allocation6 + $0x40] sm:$0xff] }
 0x29c   :  { %4039 = vmatpush3.bf16.msra.mxu0 %v4038_v8  ;;  %v4052_v21 = vpack.c.bf16 %v2558_v44, %v2557_v43  ;;  %v3006_v8 = vld [vmem:[#allocation6 + $0x48] sm:$0xff]  ;;  %v3012_v43 = vld [vmem:[#allocation6 + $0x78] sm:$0xff] }
 0x29d   :  { %v2614_v52 = vcombine.high %v2613_v38, %v2613_v38  ;;  %4041 = vmatprep.subr.bf16.mxu0 %v4040_v54  ;;  %v4077_v54 = vpack.c.bf16 %v3006_v8, %v3005_v24  ;;  %v4086_v44 = vpack.c.bf16 %v3012_v43, %v3011_v32  ;;  %v3173_v8 = vld [vmem:[%s7023_s9 + $0x30] sm:$0xff] }
 0x29e   :  { %4069 = vmatpush3.bf16.msra.mxu1 %v4068_v60 }
 0x29f   :  { %2969 = vmatprep.mubr.f32.mxu0 %v2614_v52  ;;  %4070 = vmatprep.subr.bf16.mxu1 %v4911_v61  ;;  %v4080_v52 = vpack.c.bf16 %v3008_v11, %v3007_v13  ;;  %v3177_v11 = vld [vmem:[%s7023_s9 + $0x50] sm:$0xff] }
 0x2a0   :  { %4043 = vmatpush3.bf16.msra.mxu0 %v4042_v40  ;;  %v2991_v40 = vld [vmem:[%s7020_s6 + $0x50] sm:$0xff] }
 0x2a1   :  { %4045 = vmatprep.subr.bf16.mxu0 %v4044_v4  ;;  %v2992_v4 = vld [vmem:[%s7020_s6 + $0x58] sm:$0xff] }
 0x2a2   :  { %4072 = vmatpush3.bf16.msra.mxu1 %v4071_v36  ;;  %v4104_v1 = vpack.c.bf16 %v2992_v4, %v2991_v40  ;;  %v3179_v4 = vld [vmem:[%s7023_s9 + $0x60] sm:$0xff] }
 0x2a3   :  { %4073 = vmatprep.subr.bf16.mxu1 %v4911_v61 }
 0x2a4   :  { %4047 = vmatpush3.bf16.msra.mxu0 %v4046_v51  ;;  %v2993_v51 = vld [vmem:[%s7020_s6 + $0x60] sm:$0xff] }
 0x2a5   :  { %4049 = vmatprep.subr.bf16.mxu0 %v4048_v47  ;;  %v2994_v47 = vld [vmem:[%s7020_s6 + $0x68] sm:$0xff] }
 0x2a6   :  { %4075 = vmatpush3.bf16.msra.mxu1 %v4074_v41  ;;  %v4107_v31 = vpack.c.bf16 %v2994_v47, %v2993_v51  ;;  %v3170_v41 = vld [vmem:[%s7023_s9 + $0x18] sm:$0xff] }
 0x2a7   :  { %4076 = vmatprep.subr.bf16.mxu1 %v4911_v61  ;;  %v4116_v37 = vpack.c.bf16 %v3170_v41, %v3169_v56 }
 0x2a8   :  { %4051 = vmatpush3.bf16.msra.mxu0 %v4050_v5  ;;  %v2995_v5 = vld [vmem:[%s7020_s6 + $0x70] sm:$0xff] }
 0x2a9   :  { %4053 = vmatprep.subr.bf16.mxu0 %v4052_v21  ;;  %v2996_v21 = vld [vmem:[%s7020_s6 + $0x78] sm:$0xff] }
 0x2aa   :  { %4078 = vmatpush3.bf16.msra.mxu1 %v4077_v54  ;;  %v4110_v57 = vpack.c.bf16 %v2996_v21, %v2995_v5  ;;  %v3174_v54 = vld [vmem:[%s7023_s9 + $0x38] sm:$0xff] }
 0x2ab   :  { %4079 = vmatprep.subr.bf16.mxu1 %v4911_v61 }
 0x2ac   :  { %4055 = vmatpush3.bf16.msra.mxu0 %v4054_v50 }
 0x2ad   :  { %4057 = vmatprep.subr.bf16.mxu0 %v4056_v6 }
 0x2ae   :  { %4081 = vmatpush3.bf16.msra.mxu1 %v4080_v52  ;;  %v3178_v52 = vld [vmem:[%s7023_s9 + $0x58] sm:$0xff] }
 0x2af   :  { %4082 = vmatprep.subr.bf16.mxu1 %v4911_v61  ;;  %v4128_v40 = vpack.c.bf16 %v3178_v52, %v3177_v11 }
 0x2b0   :  { %4059 = vmatpush3.bf16.msra.mxu0 %v4058_v28 }
 0x2b1   :  { %4061 = vmatprep.subr.bf16.mxu0 %v4060_v29 }
 0x2b2   :  { %4084 = vmatpush3.bf16.msra.mxu1 %v4083_v63  ;;  %v3182_v63 = vld [vmem:[%s7023_s9 + $0x78] sm:$0xff] }
 0x2b3   :  { %4085 = vmatprep.subr.bf16.mxu1 %v4911_v61  ;;  %v4134_v51 = vpack.c.bf16 %v3182_v63, %v3181_v9 }
 0x2b4   :  { %4063 = vmatpush3.bf16.msra.mxu0 %v4062_v10 }
 0x2b5   :  { %4088 = vmatprep.subr.bf16.mxu0 %v4911_v61 }
 0x2b6   :  { %4087 = vmatpush3.bf16.msra.mxu1 %v4086_v44 }
 0x2b7   :  { %2970 = vmatmul.mubr.f32.vlgmr.msra.gmra.mrb[84].mxu0 %v2613_v38  ;;  %v4101_v38 = vpack.c.bf16 %v2990_v3, %v2989_v20  ;;  %4112 = vmatprep.subr.bf16.mxu1 %v4911_v61  ;;  %v4122_v20 = vpack.c.bf16 %v3174_v54, %v3173_v8  ;;  %v3175_v3 = vld [vmem:[%s7023_s9 + $0x40] sm:$0xff] }
 0x2b8   :  { %4090 = vmatpush3.bf16.msra.mxu0 %v4089_v58  ;;  %3840 = vmatprep.mubr.msk.f32.mxu0 %vm4912_vm4, %v4910_v22 }
 0x2b9   :  { %4091 = vmatprep.subr.bf16.mxu0 %v4911_v61  ;;  %3806 = vmatmul.mubr.f32.vlgmr.msra.gmra.mrb[84].mxu1 %v2402_v27 }
 0x2ba   :  { %3875 = vmatprep.mubr.msk.f32.mxu1 %vm4912_vm4, %v4910_v22 }
 0x2bc   :  { %4093 = vmatpush3.bf16.msra.mxu0 %v4092_v49 }
 0x2bd   :  { %4094 = vmatprep.subr.bf16.mxu0 %v4911_v61 }
 0x2c0   :  { %4096 = vmatpush3.bf16.msra.mxu0 %v4095_v45  ;;  %v3168_v45 = vld [vmem:[%s7023_s9 + $0x8] sm:$0xff] }
 0x2c1   :  { %4097 = vmatprep.subr.bf16.mxu0 %v4911_v61  ;;  %v4113_v35 = vpack.c.bf16 %v3168_v45, %v3167_v48 }
 0x2c3   :  { %4114 = vmatpush3.bf16.msra.mxu1 %v4113_v35 }
 0x2c4   :  { %4099 = vmatpush3.bf16.msra.mxu0 %v4098_v18  ;;  %4115 = vmatprep.subr.bf16.mxu1 %v4911_v61  ;;  %v3172_v18 = vld [vmem:[%s7023_s9 + $0x28] sm:$0xff] }
 0x2c5   :  { %4100 = vmatprep.subr.bf16.mxu0 %v4911_v61  ;;  %v4119_v24 = vpack.c.bf16 %v3172_v18, %v3171_v23  ;;  %v3533_v23 = vld [vmem:[#allocation3] ss:$0 sm:$0xff] }
 0x2c7   :  { %4117 = vmatpush3.bf16.msra.mxu1 %v4116_v37 }
 0x2c8   :  { %4102 = vmatpush3.bf16.msra.mxu0 %v4101_v38  ;;  %4118 = vmatprep.subr.bf16.mxu1 %v4911_v61  ;;  %v3176_v38 = vld [vmem:[%s7023_s9 + $0x48] sm:$0xff] }
 0x2c9   :  { %4103 = vmatprep.subr.bf16.mxu0 %v4911_v61  ;;  %v4125_v13 = vpack.c.bf16 %v3176_v38, %v3175_v3 }
 0x2cb   :  { %4120 = vmatpush3.bf16.msra.mxu1 %v4119_v24 }
 0x2cc   :  { %4105 = vmatpush3.bf16.msra.mxu0 %v4104_v1  ;;  %4121 = vmatprep.subr.bf16.mxu1 %v4911_v61  ;;  %v3180_v1 = vld [vmem:[%s7023_s9 + $0x68] sm:$0xff] }
 0x2cd   :  { %4106 = vmatprep.subr.bf16.mxu0 %v4911_v61  ;;  %v4131_v7 = vpack.c.bf16 %v3180_v1, %v3179_v4 }
 0x2cf   :  { %4123 = vmatpush3.bf16.msra.mxu1 %v4122_v20 }
 0x2d0   :  { %4108 = vmatpush3.bf16.msra.mxu0 %v4107_v31  ;;  %4124 = vmatprep.subr.bf16.mxu1 %v4911_v61  ;;  %v3529_v31 = vld [vmem:[%s7022_s8] ss:$0 sm:$0xff] }
 0x2d1   :  { %4109 = vmatprep.subr.bf16.mxu0 %v4911_v61 }
 0x2d3   :  { %4126 = vmatpush3.bf16.msra.mxu1 %v4125_v13 }
 0x2d4   :  { %4111 = vmatpush3.bf16.msra.mxu0 %v4110_v57  ;;  %4127 = vmatprep.subr.bf16.mxu1 %v4911_v61 }
 0x2d5   :  { %4136 = vmatprep.subr.bf16.mxu0 %v4911_v61 }
 0x2d7   :  { %4129 = vmatpush3.bf16.msra.mxu1 %v4128_v40 }
 0x2d8   :  { %4130 = vmatprep.subr.bf16.mxu1 %v4911_v61 }
 0x2db   :  { %4132 = vmatpush3.bf16.msra.mxu1 %v4131_v7 }
 0x2dc   :  { %4133 = vmatprep.subr.bf16.mxu1 %v4911_v61 }
 0x2df   :  { %4135 = vmatpush3.bf16.msra.mxu1 %v4134_v51 }
 0x2e0   :  { %4148 = vmatprep.subr.bf16.mxu1 %v4911_v61 }
 0x34a   :  { %v3567_v14 = vpop.f32.mrb[80].mxu0 }
 0x34b   :  { %v3568_v50 = vpop.f32.mrb[81].mxu0 }
 0x34c   :  { %v3569_v6 = vadd.f32 %v3568_v50, %v3567_v14  ;;  %v3602_v2 = vpop.f32.mrb[80].mxu1  ;;  %v3266_v50 = vld [vmem:[%s7025_s11] sm:$0xff] }
 0x34d   :  { %v3603_v62 = vpop.f32.mrb[81].mxu1 }
 0x34e   :  { %v2692_v17 = vadd.f32 %v3569_v6, %v3528_v59  ;;  %v3604_v12 = vadd.f32 %v3603_v62, %v3602_v2  ;;  %v3267_v6 = vld [vmem:[%s7025_s11 + $0x8] sm:$0xff]  ;;  %v3268_v62 = vld [vmem:[%s7025_s11 + $0x10] sm:$0xff] }
 0x34f   :  { %v4137_v2 = vpack.c.bf16 %v3267_v6, %v3266_v50 }
 0x350   :  { %v2762_v28 = vadd.f32 %v3604_v12, %v2692_v17  ;;  %v3270_v12 = vld [vmem:[%s7025_s11 + $0x20] sm:$0xff] }
 0x36a   :  { %v3637_v29 = vpop.f32.mrb[82].mxu0 }
 0x36b   :  { %v3638_v16 = vpop.f32.mrb[83].mxu0 }
 0x36c   :  { %v3639_v33 = vadd.f32 %v3638_v16, %v3637_v29  ;;  %v3672_v10 = vpop.f32.mrb[82].mxu1  ;;  %v3272_v16 = vld [vmem:[%s7025_s11 + $0x30] sm:$0xff] }
 0x36d   :  { %v3673_v26 = vpop.f32.mrb[83].mxu1 }
 0x36e   :  { %v2832_v46 = vadd.f32 %v3639_v33, %v2762_v28  ;;  %v3674_v19 = vadd.f32 %v3673_v26, %v3672_v10  ;;  %v3271_v28 = vld [vmem:[%s7025_s11 + $0x28] sm:$0xff]  ;;  %v3273_v33 = vld [vmem:[%s7025_s11 + $0x38] sm:$0xff]  ;;  %v3530_v26 = vld [vmem:[%s7024_s10] ss:$0 sm:$0xff] }
 0x36f   :  { %v4143_v29 = vpack.c.bf16 %v3271_v28, %v3270_v12  ;;  %v4146_v10 = vpack.c.bf16 %v3273_v33, %v3272_v16 }
 0x370   :  { %v2902_v25 = vadd.f32 %v3674_v19, %v2832_v46 }
 0x38a   :  { %v3707_v42 = vpop.f32.mrb[84].mxu0 }
 0x38b   :  { %v3708_v58 = vpop.f32.mrb[85].mxu0 }
 0x38c   :  { %v3709_v55 = vadd.f32 %v3708_v58, %v3707_v42  ;;  %v3079_v36 = vpop.f32.mrb[84].mxu1 }
 0x38d   :  { %v3807_v34 = vpop.f32.mrb[85].mxu1 }
 0x38e   :  { %v2972_v30 = vadd.f32 %v3709_v55, %v2902_v25 }
 0x390   :  { %v2975_v60 = vsub.f32 0.0, %v2972_v30 }
 0x392   :  { %v2976_v0 = vmul.f32 1.442695, %v2975_v60 }
 0x394   :  { %4839 = vpow2.f32 %v2976_v0  ;;  %v3361_v0 = vld [vmem:[%s7027_s13] sm:$0xff] }
 0x39e   :  { %v4840_v53 = vpop.eup %4839 }
 0x39f   :  { %v2978_v49 = vadd.f32 1.0, %v4840_v53  ;;  %v3362_v53 = vld [vmem:[%s7027_s13 + $0x8] sm:$0xff] }
 0x3a1   :  { %4841 = vrcp.f32 %v2978_v49  ;;  %v4149_v49 = vpack.c.bf16 %v3362_v53, %v3361_v0 }
 0x3ab   :  { %v4842_v39 = vpop.eup %4841 }
 0x3ac   :  { %v2980_v15 = vmul.f32 %v4842_v39, %v2972_v30  ;;  %v3531_v39 = vld [vmem:[%s7026_s12] ss:$0 sm:$0xff] }
 0x3ae   :  { %3841 = vmatmul.mubr.f32.vlgmr.msra.gmra.mrb[86].mxu0 %v2980_v15 }
 0x3af   :  { %3894 = vmatprep.mubr.msk.f32.mxu0 %vm4912_vm4, %v4910_v22  ;;  %4138 = vmatpush3.bf16.msra.mxu0 %v4137_v2 }
 0x3b0   :  { %4139 = vmatprep.subr.bf16.mxu0 %v4911_v61 }
 0x481   :  { %v3149_v47 = vpop.f32.mrb[86].mxu0 }
 0x482   :  { %v3150_v32 = vadd.f32 %v3149_v47, %v3079_v36  ;;  %v3842_v43 = vpop.f32.mrb[87].mxu0 }
 0x484   :  { %v3160_v44 = vadd.f32 %v3529_v31, %v3150_v32 }
 0x486   :  { %v3161_v5 = vsub.f32 0.0, %v3160_v44 }
 0x488   :  { %v3162_v21 = vmul.f32 1.442695, %v3161_v5 }
 0x48a   :  { %4843 = vpow2.f32 %v3162_v21 }
 0x494   :  { %v4844_v57 = vpop.eup %4843 }
 0x495   :  { %v3164_v27 = vadd.f32 1.0, %v4844_v57 }
 0x497   :  { %4845 = vrcp.f32 %v3164_v27 }
 0x4a1   :  { %v4846_v14 = vpop.eup %4845 }
 0x4a2   :  { %v3166_v59 = vmul.f32 %v4846_v14, %v3160_v44 }
 0x4a4   :  { %3876 = vmatmul.mubr.f32.vlgmr.msra.gmra.mrb[86].mxu1 %v3166_v59 }
 0x4a5   :  { %3901 = vmatprep.mubr.msk.f32.mxu1 %vm4912_vm4, %v4910_v22  ;;  %v3269_v22 = vld [vmem:[%s7025_s11 + $0x18] sm:$0xff]  ;;  %4150 = vmatpush3.bf16.msra.mxu1 %v4149_v49 }
 0x4a6   :  { %v4140_v17 = vpack.c.bf16 %v3269_v22, %v3268_v62 }
 0x4a8   :  { %4141 = vmatpush3.bf16.msra.mxu0 %v4140_v17 }
 0x4a9   :  { %4142 = vmatprep.subr.bf16.mxu0 %v4911_v61 }
 0x4ac   :  { %4144 = vmatpush3.bf16.msra.mxu0 %v4143_v29 }
 0x4ad   :  { %4145 = vmatprep.subr.bf16.mxu0 %v4911_v61 }
 0x4b0   :  { %4147 = vmatpush3.bf16.msra.mxu0 %v4146_v10 }
 0x577   :  { %v3256_v46 = vpop.f32.mrb[86].mxu1 }
 0x578   :  { %v3257_v19 = vadd.f32 %v3530_v26, %v3256_v46  ;;  %v3877_v25 = vpop.f32.mrb[87].mxu1 }
 0x57a   :  { %v3260_v42 = vsub.f32 0.0, %v3257_v19 }
 0x57c   :  { %v3261_v58 = vmul.f32 1.442695, %v3260_v42 }
 0x57e   :  { %4847 = vpow2.f32 %v3261_v58 }
 0x588   :  { %v4848_v61 = vpop.eup %4847 }
 0x589   :  { %v3263_v55 = vadd.f32 1.0, %v4848_v61 }
 0x58b   :  { %4849 = vrcp.f32 %v3263_v55 }
 0x595   :  { %v4850_v30 = vpop.eup %4849 }
 0x596   :  { %v3265_v60 = vmul.f32 %v4850_v30, %v3257_v19 }
 0x598   :  { %3895 = vmatmul.mubr.msk.f32.vlgmr.msra.gmra.mrb[88].mxu0 %vm3281_vm5, %v3265_v60 }
 0x66b   :  { %v3351_v15 = vpop.f32.mrb[88].mxu0 }
 0x66c   :  { %v3352_v36 = vadd.f32 %v3531_v39, %v3351_v15  ;;  %v3896_v34 = vpop.f32.mrb[89].mxu0 }
 0x66e   :  { %v3355_v48 = vsub.f32 0.0, %v3352_v36 }
 0x670   :  { %v3356_v45 = vmul.f32 1.442695, %v3355_v48 }
 0x672   :  { %4851 = vpow2.f32 %v3356_v45 }
 0x67c   :  { %v4852_v35 = vpop.eup %4851 }
 0x67d   :  { %v3358_v56 = vadd.f32 1.0, %v4852_v35 }
 0x67f   :  { %4853 = vrcp.f32 %v3358_v56 }
 0x689   :  { %v4854_v41 = vpop.eup %4853 }
 0x68a   :  { %v3360_v37 = vmul.f32 %v4854_v41, %v3352_v36 }
 0x68c   :  { %3902 = vmatmul.mubr.msk.f32.vlgmr.msra.gmra.mrb[88].mxu1 %vm3370_vm6, %v3360_v37 }
 0x75f   :  { %v3440_v18 = vpop.f32.mrb[88].mxu1 }
 0x760   :  { %v3441_v24 = vadd.f32 %v3533_v23, %v3440_v18  ;;  %v3903_v8 = vpop.f32.mrb[89].mxu1 }
 0x762   :  { %3445 = vst.msk [vmem:[%s7029_s15] sm:$0x3] %vm3444_vm7, %v3441_v24 }
 0x763   :  { %3450 = vsyncpa [#allocation5], 1 }
 0x764   :  { %3451 = vsyncpa [#allocation7], 1 }

</bundles_post_ra>
